<compile_context>
chip_gen: v7x
topology: tpu7x:2x2x1
jax: 0.10.0
libtpu: 0.0.40
codegen_flags: <defaults>
</compile_context>

<pallas_src>
import jax
import jax.numpy as jnp
from jax.experimental import pallas as pl
from jax.experimental.pallas import tpu as pltpu

CIN, COUT, K, PAD = 3, 3, 3, 3  # nn.Conv2d(3, 3, kernel_size=3, stride=1, padding=3, bias=False)


def _round_up(x, m):
    return (x + m - 1) // m * m


# ---------------------------------------------------------------------------
# Fused kernel: pad-in-VMEM -> 3x3 conv -> global avg pool -> folded head.
# One batch block per grid step.
# ---------------------------------------------------------------------------
def fused_kernel(x_ref, wconv_ref, whead_ref, bhead_ref, o_ref, xp_ref, pooled_ref):
    # x_ref     : (NB, CIN, H, W)       VMEM  unpadded input block
    # wconv_ref : (COUT*CIN*K*K,)       SMEM  flattened conv weight (no bias)
    # whead_ref : (COUT, OUT_PAD)       VMEM  folded (w_stem @ w_fc)/(Ho*Wo), lane-padded
    # bhead_ref : (1, OUT_PAD)          VMEM  lane-padded bias
    # o_ref     : (NB, OUT_PAD)         VMEM  lane-dense output slab
    # xp_ref    : (NB, CIN, Hp, Wp)     VMEM  scratch, zero-padded input
    # pooled_ref: (NB, COUT)            VMEM  scratch, pooled conv sums
    NB, _, H, W = x_ref.shape
    Hp, Wp = xp_ref.shape[2], xp_ref.shape[3]
    Ho, Wo = Hp - K + 1, Wp - K + 1

    # ---- zero-pad inside VMEM (no wrapper-side jnp.pad / extra HBM traffic) --
    xp_ref[...] = jnp.zeros_like(xp_ref)
    xp_ref[:, :, PAD:PAD + H, PAD:PAD + W] = x_ref[...]
    xp = xp_ref[...]                                     # load padded block once

    # ---- 3x3 conv, stride 1: each shifted window is sliced ONCE (27 slices)
    #      and reused for all COUT output channels (3 running accumulators) ---
    accs = [jnp.zeros((NB, Ho, Wo), jnp.float32) for _ in range(COUT)]
    for ci in range(CIN):
        for kh in range(K):
            for kw in range(K):
                win = xp[:, ci, kh:kh + Ho, kw:kw + Wo]  # (NB, Ho, Wo)
                for co in range(COUT):
                    wv = wconv_ref[((co * CIN + ci) * K + kh) * K + kw]
                    accs[co] = accs[co] + wv * win

    # ---- global average pool; the 1/(Ho*Wo) divisor is folded into w_head ---
    for co in range(COUT):
        row_sum = accs[co].sum(axis=-1)                            # (NB, Ho)
        pooled_ref[:, co:co + 1] = row_sum.sum(axis=-1, keepdims=True)

    # ---- single folded head matmul: pooled @ (w_stem @ w_fc / HoWo) + b -----
    out = jnp.dot(pooled_ref[...], whead_ref[...],
                  preferred_element_type=jnp.float32) + bhead_ref[...]
    o_ref[...] = out.astype(o_ref.dtype)


def enetv2_forward(x, params, batch_block=8):
    N, _, H, W = x.shape
    Hp, Wp = H + 2 * PAD, W + 2 * PAD
    Ho, Wo = Hp - K + 1, Wp - K + 1
    out_dim = params["w_fc"].shape[1]
    out_pad = _round_up(max(out_dim, 128), 128)          # lane-dense output slab

    NB = min(batch_block, N)
    grid = (pl.cdiv(N, NB),)

    # Parameter preprocessing (one-time): flatten conv weight for SMEM, fold the
    # two head linears and the pool divisor into a single (COUT, OUT_PAD) map.
    w_conv = params["conv_w"].astype(jnp.float32).reshape(-1)
    w_head = (params["w_stem"].astype(jnp.float32)
              @ params["w_fc"].astype(jnp.float32)) / float(Ho * Wo)
    w_head = jnp.pad(w_head, ((0, 0), (0, out_pad - out_dim)))
    b_head = jnp.pad(params["b_fc"].astype(jnp.float32),
                     (0, out_pad - out_dim)).reshape(1, out_pad)

    flops = (2 * N * COUT * CIN * K * K * Ho * Wo      # conv FMAs
             + N * COUT * Ho * Wo                      # pooling adds
             + 2 * N * COUT * out_pad)                 # folded head matmul
    bytes_accessed = 4 * (N * CIN * H * W + N * out_pad
                          + w_conv.size + w_head.size + b_head.size)

    out_padded = pl.pallas_call(
        fused_kernel,
        out_shape=jax.ShapeDtypeStruct((N, out_pad), jnp.float32),
        grid=grid,
        in_specs=[
            pl.BlockSpec((NB, CIN, H, W), lambda b: (b, 0, 0, 0)),
            pl.BlockSpec(memory_space=pltpu.MemorySpace.SMEM),
            pl.BlockSpec((COUT, out_pad), lambda b: (0, 0)),
            pl.BlockSpec((1, out_pad), lambda b: (0, 0)),
        ],
        out_specs=pl.BlockSpec((NB, out_pad), lambda b: (b, 0)),
        scratch_shapes=[
            pltpu.VMEM((NB, CIN, Hp, Wp), jnp.float32),
            pltpu.VMEM((NB, COUT), jnp.float32),
        ],
        compiler_params=pltpu.CompilerParams(dimension_semantics=("parallel",)),
        cost_estimate=pl.CostEstimate(flops=flops, transcendentals=0,
                                      bytes_accessed=bytes_accessed),
    )(x.astype(jnp.float32), w_conv, w_head, b_head)

    return out_padded[:, :out_dim]


def reference_forward(x, params):
    """Pure-JAX reference of the same (surrogate) forward for a numeric check."""
    y = jax.lax.conv_general_dilated(
        x, params["conv_w"], window_strides=(1, 1),
        padding=[(PAD, PAD), (PAD, PAD)],
        dimension_numbers=("NCHW", "OIHW", "NCHW"))
    pooled = y.mean(axis=(2, 3))
    feat = pooled @ params["w_stem"]
    return feat @ params["w_fc"] + params["b_fc"]


if __name__ == "__main__":
    key = jax.random.PRNGKey(0)
    k1, k2, k3, k4, k5 = jax.random.split(key, 5)

    N, H, W = 2, 16, 16
    FEAT = 32      # surrogate for self.enet._fc.in_features
    OUT_DIM = 10   # out_dim of self.myfc

    x = jax.random.normal(k1, (N, CIN, H, W), jnp.float32)

    params = {
        "conv_w": jax.random.normal(k2, (COUT, CIN, K, K), jnp.float32) * 0.1,
        "w_stem": jax.random.normal(k3, (COUT, FEAT), jnp.float32) * 0.1,
        # myfc weight stored as (in_features, out_dim) == nn.Linear weight transposed
        "w_fc": jax.random.normal(k4, (FEAT, OUT_DIM), jnp.float32) * 0.1,
        "b_fc": jax.random.normal(k5, (OUT_DIM,), jnp.float32) * 0.1,
    }

    out = jax.block_until_ready(enetv2_forward(x, params))
    assert out.shape == (N, OUT_DIM) and out.dtype == jnp.float32

    ref = jax.block_until_ready(reference_forward(x, params))
    max_err = float(jnp.max(jnp.abs(out - ref)))
    assert max_err < 5e-4, f"max abs error {max_err}"

    print("KERNEL_OK")
</pallas_src>

<mosaic_0001>
module attributes {stable_mosaic.version = 11 : i64} {
  func.func @fused_kernel(%arg0: i32, %arg1: memref<2x3x16x16xf32, #tpu.memory_space<vmem>>, %arg2: memref<81xf32, #tpu.memory_space<smem>>, %arg3: memref<3x128xf32, #tpu.memory_space<vmem>>, %arg4: memref<1x128xf32, #tpu.memory_space<vmem>>, %arg5: memref<2x128xf32, #tpu.memory_space<vmem>>, %arg6: memref<2x3x22x22xf32, #tpu.memory_space<vmem>>, %arg7: memref<2x3xf32, #tpu.memory_space<vmem>>) attributes {dimension_semantics = [#tpu.dimension_semantics<parallel>], iteration_bounds = array<i64: 1>, scalar_prefetch = 0 : i64, scratch_operands = 2 : i64, tpu.core_type = #tpu.core_type<tc>, window_params = [{transform_indices = @transform_0, window_bounds = array<i64: 2, 3, 16, 16>}, {transform_indices = @transform_1, window_bounds = array<i64: 81>}, {pipeline_mode = #tpu.pipeline_mode<synchronous>, transform_indices = @transform_2, window_bounds = array<i64: 3, 128>}, {pipeline_mode = #tpu.pipeline_mode<synchronous>, transform_indices = @transform_3, window_bounds = array<i64: 1, 128>}, {transform_indices = @transform_4, window_bounds = array<i64: 2, 128>}]} {
    %cst = arith.constant 0.000000e+00 : f32
    %0 = vector.broadcast %cst : f32 to vector<2x3x22x22xf32>
    %c0 = arith.constant 0 : index
    %c0_0 = arith.constant 0 : index
    %c0_1 = arith.constant 0 : index
    %c0_2 = arith.constant 0 : index
    %1 = vector.load %arg6[%c0, %c0_0, %c0_1, %c0_2] : memref<2x3x22x22xf32, #tpu.memory_space<vmem>>, vector<2x3x22x22xf32>
    tpu.vector_store %arg6[%c0, %c0_0, %c0_1, %c0_2], %0 {strides = array<i32>} : memref<2x3x22x22xf32, #tpu.memory_space<vmem>>, vector<2x3x22x22xf32>,
    %c0_3 = arith.constant 0 : index
    %c0_4 = arith.constant 0 : index
    %c0_5 = arith.constant 0 : index
    %c0_6 = arith.constant 0 : index
    %2 = vector.load %arg1[%c0_3, %c0_4, %c0_5, %c0_6] : memref<2x3x16x16xf32, #tpu.memory_space<vmem>>, vector<2x3x16x16xf32>
    %c0_7 = arith.constant 0 : index
    %c0_8 = arith.constant 0 : index
    %c3 = arith.constant 3 : index
    %c3_9 = arith.constant 3 : index
    %3 = vector.load %arg6[%c0_7, %c0_8, %c3, %c3_9] : memref<2x3x22x22xf32, #tpu.memory_space<vmem>>, vector<2x3x16x16xf32>
    tpu.vector_store %arg6[%c0_7, %c0_8, %c3, %c3_9], %2 {strides = array<i32>} : memref<2x3x22x22xf32, #tpu.memory_space<vmem>>, vector<2x3x16x16xf32>,
    %c0_10 = arith.constant 0 : index
    %c0_11 = arith.constant 0 : index
    %c0_12 = arith.constant 0 : index
    %c0_13 = arith.constant 0 : index
    %4 = vector.load %arg6[%c0_10, %c0_11, %c0_12, %c0_13] : memref<2x3x22x22xf32, #tpu.memory_space<vmem>>, vector<2x3x22x22xf32>
    %cst_14 = arith.constant 0.000000e+00 : f32
    %5 = vector.broadcast %cst_14 : f32 to vector<2x20x20xf32>
    %cst_15 = arith.constant 0.000000e+00 : f32
    %6 = vector.broadcast %cst_15 : f32 to vector<2x20x20xf32>
    %cst_16 = arith.constant 0.000000e+00 : f32
    %7 = vector.broadcast %cst_16 : f32 to vector<2x20x20xf32>
    %8 = vector.extract_strided_slice %4 {offsets = [0, 0, 0, 0], sizes = [2, 1, 20, 20], strides = [1, 1, 1, 1]} : vector<2x3x22x22xf32> to vector<2x1x20x20xf32>
    %9 = vector.shape_cast %8 : vector<2x1x20x20xf32> to vector<2x20x20xf32>
    %c0_17 = arith.constant 0 : index
    %10 = memref.load %arg2[%c0_17] : memref<81xf32, #tpu.memory_space<smem>>
    %11 = vector.broadcast %10 : f32 to vector<2x20x20xf32>
    %12 = arith.mulf %11, %9 : vector<2x20x20xf32>
    %13 = arith.addf %5, %12 : vector<2x20x20xf32>
    %c27 = arith.constant 27 : index
    %14 = memref.load %arg2[%c27] : memref<81xf32, #tpu.memory_space<smem>>
    %15 = vector.broadcast %14 : f32 to vector<2x20x20xf32>
    %16 = arith.mulf %15, %9 : vector<2x20x20xf32>
    %17 = arith.addf %6, %16 : vector<2x20x20xf32>
    %c54 = arith.constant 54 : index
    %18 = memref.load %arg2[%c54] : memref<81xf32, #tpu.memory_space<smem>>
    %19 = vector.broadcast %18 : f32 to vector<2x20x20xf32>
    %20 = arith.mulf %19, %9 : vector<2x20x20xf32>
    %21 = arith.addf %7, %20 : vector<2x20x20xf32>
    %22 = vector.extract_strided_slice %4 {offsets = [0, 0, 0, 1], sizes = [2, 1, 20, 20], strides = [1, 1, 1, 1]} : vector<2x3x22x22xf32> to vector<2x1x20x20xf32>
    %23 = vector.shape_cast %22 : vector<2x1x20x20xf32> to vector<2x20x20xf32>
    %c1 = arith.constant 1 : index
    %24 = memref.load %arg2[%c1] : memref<81xf32, #tpu.memory_space<smem>>
    %25 = vector.broadcast %24 : f32 to vector<2x20x20xf32>
    %26 = arith.mulf %25, %23 : vector<2x20x20xf32>
    %27 = arith.addf %13, %26 : vector<2x20x20xf32>
    %c28 = arith.constant 28 : index
    %28 = memref.load %arg2[%c28] : memref<81xf32, #tpu.memory_space<smem>>
    %29 = vector.broadcast %28 : f32 to vector<2x20x20xf32>
    %30 = arith.mulf %29, %23 : vector<2x20x20xf32>
    %31 = arith.addf %17, %30 : vector<2x20x20xf32>
    %c55 = arith.constant 55 : index
    %32 = memref.load %arg2[%c55] : memref<81xf32, #tpu.memory_space<smem>>
    %33 = vector.broadcast %32 : f32 to vector<2x20x20xf32>
    %34 = arith.mulf %33, %23 : vector<2x20x20xf32>
    %35 = arith.addf %21, %34 : vector<2x20x20xf32>
    %36 = vector.extract_strided_slice %4 {offsets = [0, 0, 0, 2], sizes = [2, 1, 20, 20], strides = [1, 1, 1, 1]} : vector<2x3x22x22xf32> to vector<2x1x20x20xf32>
    %37 = vector.shape_cast %36 : vector<2x1x20x20xf32> to vector<2x20x20xf32>
    %c2 = arith.constant 2 : index
    %38 = memref.load %arg2[%c2] : memref<81xf32, #tpu.memory_space<smem>>
    %39 = vector.broadcast %38 : f32 to vector<2x20x20xf32>
    %40 = arith.mulf %39, %37 : vector<2x20x20xf32>
    %41 = arith.addf %27, %40 : vector<2x20x20xf32>
    %c29 = arith.constant 29 : index
    %42 = memref.load %arg2[%c29] : memref<81xf32, #tpu.memory_space<smem>>
    %43 = vector.broadcast %42 : f32 to vector<2x20x20xf32>
    %44 = arith.mulf %43, %37 : vector<2x20x20xf32>
    %45 = arith.addf %31, %44 : vector<2x20x20xf32>
    %c56 = arith.constant 56 : index
    %46 = memref.load %arg2[%c56] : memref<81xf32, #tpu.memory_space<smem>>
    %47 = vector.broadcast %46 : f32 to vector<2x20x20xf32>
    %48 = arith.mulf %47, %37 : vector<2x20x20xf32>
    %49 = arith.addf %35, %48 : vector<2x20x20xf32>
    %50 = vector.extract_strided_slice %4 {offsets = [0, 0, 1, 0], sizes = [2, 1, 20, 20], strides = [1, 1, 1, 1]} : vector<2x3x22x22xf32> to vector<2x1x20x20xf32>
    %51 = vector.shape_cast %50 : vector<2x1x20x20xf32> to vector<2x20x20xf32>
    %c3_18 = arith.constant 3 : index
    %52 = memref.load %arg2[%c3_18] : memref<81xf32, #tpu.memory_space<smem>>
    %53 = vector.broadcast %52 : f32 to vector<2x20x20xf32>
    %54 = arith.mulf %53, %51 : vector<2x20x20xf32>
    %55 = arith.addf %41, %54 : vector<2x20x20xf32>
    %c30 = arith.constant 30 : index
    %56 = memref.load %arg2[%c30] : memref<81xf32, #tpu.memory_space<smem>>
    %57 = vector.broadcast %56 : f32 to vector<2x20x20xf32>
    %58 = arith.mulf %57, %51 : vector<2x20x20xf32>
    %59 = arith.addf %45, %58 : vector<2x20x20xf32>
    %c57 = arith.constant 57 : index
    %60 = memref.load %arg2[%c57] : memref<81xf32, #tpu.memory_space<smem>>
    %61 = vector.broadcast %60 : f32 to vector<2x20x20xf32>
    %62 = arith.mulf %61, %51 : vector<2x20x20xf32>
    %63 = arith.addf %49, %62 : vector<2x20x20xf32>
    %64 = vector.extract_strided_slice %4 {offsets = [0, 0, 1, 1], sizes = [2, 1, 20, 20], strides = [1, 1, 1, 1]} : vector<2x3x22x22xf32> to vector<2x1x20x20xf32>
    %65 = vector.shape_cast %64 : vector<2x1x20x20xf32> to vector<2x20x20xf32>
    %c4 = arith.constant 4 : index
    %66 = memref.load %arg2[%c4] : memref<81xf32, #tpu.memory_space<smem>>
    %67 = vector.broadcast %66 : f32 to vector<2x20x20xf32>
    %68 = arith.mulf %67, %65 : vector<2x20x20xf32>
    %69 = arith.addf %55, %68 : vector<2x20x20xf32>
    %c31 = arith.constant 31 : index
    %70 = memref.load %arg2[%c31] : memref<81xf32, #tpu.memory_space<smem>>
    %71 = vector.broadcast %70 : f32 to vector<2x20x20xf32>
    %72 = arith.mulf %71, %65 : vector<2x20x20xf32>
    %73 = arith.addf %59, %72 : vector<2x20x20xf32>
    %c58 = arith.constant 58 : index
    %74 = memref.load %arg2[%c58] : memref<81xf32, #tpu.memory_space<smem>>
    %75 = vector.broadcast %74 : f32 to vector<2x20x20xf32>
    %76 = arith.mulf %75, %65 : vector<2x20x20xf32>
    %77 = arith.addf %63, %76 : vector<2x20x20xf32>
    %78 = vector.extract_strided_slice %4 {offsets = [0, 0, 1, 2], sizes = [2, 1, 20, 20], strides = [1, 1, 1, 1]} : vector<2x3x22x22xf32> to vector<2x1x20x20xf32>
    %79 = vector.shape_cast %78 : vector<2x1x20x20xf32> to vector<2x20x20xf32>
    %c5 = arith.constant 5 : index
    %80 = memref.load %arg2[%c5] : memref<81xf32, #tpu.memory_space<smem>>
    %81 = vector.broadcast %80 : f32 to vector<2x20x20xf32>
    %82 = arith.mulf %81, %79 : vector<2x20x20xf32>
    %83 = arith.addf %69, %82 : vector<2x20x20xf32>
    %c32 = arith.constant 32 : index
    %84 = memref.load %arg2[%c32] : memref<81xf32, #tpu.memory_space<smem>>
    %85 = vector.broadcast %84 : f32 to vector<2x20x20xf32>
    %86 = arith.mulf %85, %79 : vector<2x20x20xf32>
    %87 = arith.addf %73, %86 : vector<2x20x20xf32>
    %c59 = arith.constant 59 : index
    %88 = memref.load %arg2[%c59] : memref<81xf32, #tpu.memory_space<smem>>
    %89 = vector.broadcast %88 : f32 to vector<2x20x20xf32>
    %90 = arith.mulf %89, %79 : vector<2x20x20xf32>
    %91 = arith.addf %77, %90 : vector<2x20x20xf32>
    %92 = vector.extract_strided_slice %4 {offsets = [0, 0, 2, 0], sizes = [2, 1, 20, 20], strides = [1, 1, 1, 1]} : vector<2x3x22x22xf32> to vector<2x1x20x20xf32>
    %93 = vector.shape_cast %92 : vector<2x1x20x20xf32> to vector<2x20x20xf32>
    %c6 = arith.constant 6 : index
    %94 = memref.load %arg2[%c6] : memref<81xf32, #tpu.memory_space<smem>>
    %95 = vector.broadcast %94 : f32 to vector<2x20x20xf32>
    %96 = arith.mulf %95, %93 : vector<2x20x20xf32>
    %97 = arith.addf %83, %96 : vector<2x20x20xf32>
    %c33 = arith.constant 33 : index
    %98 = memref.load %arg2[%c33] : memref<81xf32, #tpu.memory_space<smem>>
    %99 = vector.broadcast %98 : f32 to vector<2x20x20xf32>
    %100 = arith.mulf %99, %93 : vector<2x20x20xf32>
    %101 = arith.addf %87, %100 : vector<2x20x20xf32>
    %c60 = arith.constant 60 : index
    %102 = memref.load %arg2[%c60] : memref<81xf32, #tpu.memory_space<smem>>
    %103 = vector.broadcast %102 : f32 to vector<2x20x20xf32>
    %104 = arith.mulf %103, %93 : vector<2x20x20xf32>
    %105 = arith.addf %91, %104 : vector<2x20x20xf32>
    %106 = vector.extract_strided_slice %4 {offsets = [0, 0, 2, 1], sizes = [2, 1, 20, 20], strides = [1, 1, 1, 1]} : vector<2x3x22x22xf32> to vector<2x1x20x20xf32>
    %107 = vector.shape_cast %106 : vector<2x1x20x20xf32> to vector<2x20x20xf32>
    %c7 = arith.constant 7 : index
    %108 = memref.load %arg2[%c7] : memref<81xf32, #tpu.memory_space<smem>>
    %109 = vector.broadcast %108 : f32 to vector<2x20x20xf32>
    %110 = arith.mulf %109, %107 : vector<2x20x20xf32>
    %111 = arith.addf %97, %110 : vector<2x20x20xf32>
    %c34 = arith.constant 34 : index
    %112 = memref.load %arg2[%c34] : memref<81xf32, #tpu.memory_space<smem>>
    %113 = vector.broadcast %112 : f32 to vector<2x20x20xf32>
    %114 = arith.mulf %113, %107 : vector<2x20x20xf32>
    %115 = arith.addf %101, %114 : vector<2x20x20xf32>
    %c61 = arith.constant 61 : index
    %116 = memref.load %arg2[%c61] : memref<81xf32, #tpu.memory_space<smem>>
    %117 = vector.broadcast %116 : f32 to vector<2x20x20xf32>
    %118 = arith.mulf %117, %107 : vector<2x20x20xf32>
    %119 = arith.addf %105, %118 : vector<2x20x20xf32>
    %120 = vector.extract_strided_slice %4 {offsets = [0, 0, 2, 2], sizes = [2, 1, 20, 20], strides = [1, 1, 1, 1]} : vector<2x3x22x22xf32> to vector<2x1x20x20xf32>
    %121 = vector.shape_cast %120 : vector<2x1x20x20xf32> to vector<2x20x20xf32>
    %c8 = arith.constant 8 : index
    %122 = memref.load %arg2[%c8] : memref<81xf32, #tpu.memory_space<smem>>
    %123 = vector.broadcast %122 : f32 to vector<2x20x20xf32>
    %124 = arith.mulf %123, %121 : vector<2x20x20xf32>
    %125 = arith.addf %111, %124 : vector<2x20x20xf32>
    %c35 = arith.constant 35 : index
    %126 = memref.load %arg2[%c35] : memref<81xf32, #tpu.memory_space<smem>>
    %127 = vector.broadcast %126 : f32 to vector<2x20x20xf32>
    %128 = arith.mulf %127, %121 : vector<2x20x20xf32>
    %129 = arith.addf %115, %128 : vector<2x20x20xf32>
    %c62 = arith.constant 62 : index
    %130 = memref.load %arg2[%c62] : memref<81xf32, #tpu.memory_space<smem>>
    %131 = vector.broadcast %130 : f32 to vector<2x20x20xf32>
    %132 = arith.mulf %131, %121 : vector<2x20x20xf32>
    %133 = arith.addf %119, %132 : vector<2x20x20xf32>
    %134 = vector.extract_strided_slice %4 {offsets = [0, 1, 0, 0], sizes = [2, 1, 20, 20], strides = [1, 1, 1, 1]} : vector<2x3x22x22xf32> to vector<2x1x20x20xf32>
    %135 = vector.shape_cast %134 : vector<2x1x20x20xf32> to vector<2x20x20xf32>
    %c9 = arith.constant 9 : index
    %136 = memref.load %arg2[%c9] : memref<81xf32, #tpu.memory_space<smem>>
    %137 = vector.broadcast %136 : f32 to vector<2x20x20xf32>
    %138 = arith.mulf %137, %135 : vector<2x20x20xf32>
    %139 = arith.addf %125, %138 : vector<2x20x20xf32>
    %c36 = arith.constant 36 : index
    %140 = memref.load %arg2[%c36] : memref<81xf32, #tpu.memory_space<smem>>
    %141 = vector.broadcast %140 : f32 to vector<2x20x20xf32>
    %142 = arith.mulf %141, %135 : vector<2x20x20xf32>
    %143 = arith.addf %129, %142 : vector<2x20x20xf32>
    %c63 = arith.constant 63 : index
    %144 = memref.load %arg2[%c63] : memref<81xf32, #tpu.memory_space<smem>>
    %145 = vector.broadcast %144 : f32 to vector<2x20x20xf32>
    %146 = arith.mulf %145, %135 : vector<2x20x20xf32>
    %147 = arith.addf %133, %146 : vector<2x20x20xf32>
    %148 = vector.extract_strided_slice %4 {offsets = [0, 1, 0, 1], sizes = [2, 1, 20, 20], strides = [1, 1, 1, 1]} : vector<2x3x22x22xf32> to vector<2x1x20x20xf32>
    %149 = vector.shape_cast %148 : vector<2x1x20x20xf32> to vector<2x20x20xf32>
    %c10 = arith.constant 10 : index
    %150 = memref.load %arg2[%c10] : memref<81xf32, #tpu.memory_space<smem>>
    %151 = vector.broadcast %150 : f32 to vector<2x20x20xf32>
    %152 = arith.mulf %151, %149 : vector<2x20x20xf32>
    %153 = arith.addf %139, %152 : vector<2x20x20xf32>
    %c37 = arith.constant 37 : index
    %154 = memref.load %arg2[%c37] : memref<81xf32, #tpu.memory_space<smem>>
    %155 = vector.broadcast %154 : f32 to vector<2x20x20xf32>
    %156 = arith.mulf %155, %149 : vector<2x20x20xf32>
    %157 = arith.addf %143, %156 : vector<2x20x20xf32>
    %c64 = arith.constant 64 : index
    %158 = memref.load %arg2[%c64] : memref<81xf32, #tpu.memory_space<smem>>
    %159 = vector.broadcast %158 : f32 to vector<2x20x20xf32>
    %160 = arith.mulf %159, %149 : vector<2x20x20xf32>
    %161 = arith.addf %147, %160 : vector<2x20x20xf32>
    %162 = vector.extract_strided_slice %4 {offsets = [0, 1, 0, 2], sizes = [2, 1, 20, 20], strides = [1, 1, 1, 1]} : vector<2x3x22x22xf32> to vector<2x1x20x20xf32>
    %163 = vector.shape_cast %162 : vector<2x1x20x20xf32> to vector<2x20x20xf32>
    %c11 = arith.constant 11 : index
    %164 = memref.load %arg2[%c11] : memref<81xf32, #tpu.memory_space<smem>>
    %165 = vector.broadcast %164 : f32 to vector<2x20x20xf32>
    %166 = arith.mulf %165, %163 : vector<2x20x20xf32>
    %167 = arith.addf %153, %166 : vector<2x20x20xf32>
    %c38 = arith.constant 38 : index
    %168 = memref.load %arg2[%c38] : memref<81xf32, #tpu.memory_space<smem>>
    %169 = vector.broadcast %168 : f32 to vector<2x20x20xf32>
    %170 = arith.mulf %169, %163 : vector<2x20x20xf32>
    %171 = arith.addf %157, %170 : vector<2x20x20xf32>
    %c65 = arith.constant 65 : index
    %172 = memref.load %arg2[%c65] : memref<81xf32, #tpu.memory_space<smem>>
    %173 = vector.broadcast %172 : f32 to vector<2x20x20xf32>
    %174 = arith.mulf %173, %163 : vector<2x20x20xf32>
    %175 = arith.addf %161, %174 : vector<2x20x20xf32>
    %176 = vector.extract_strided_slice %4 {offsets = [0, 1, 1, 0], sizes = [2, 1, 20, 20], strides = [1, 1, 1, 1]} : vector<2x3x22x22xf32> to vector<2x1x20x20xf32>
    %177 = vector.shape_cast %176 : vector<2x1x20x20xf32> to vector<2x20x20xf32>
    %c12 = arith.constant 12 : index
    %178 = memref.load %arg2[%c12] : memref<81xf32, #tpu.memory_space<smem>>
    %179 = vector.broadcast %178 : f32 to vector<2x20x20xf32>
    %180 = arith.mulf %179, %177 : vector<2x20x20xf32>
    %181 = arith.addf %167, %180 : vector<2x20x20xf32>
    %c39 = arith.constant 39 : index
    %182 = memref.load %arg2[%c39] : memref<81xf32, #tpu.memory_space<smem>>
    %183 = vector.broadcast %182 : f32 to vector<2x20x20xf32>
    %184 = arith.mulf %183, %177 : vector<2x20x20xf32>
    %185 = arith.addf %171, %184 : vector<2x20x20xf32>
    %c66 = arith.constant 66 : index
    %186 = memref.load %arg2[%c66] : memref<81xf32, #tpu.memory_space<smem>>
    %187 = vector.broadcast %186 : f32 to vector<2x20x20xf32>
    %188 = arith.mulf %187, %177 : vector<2x20x20xf32>
    %189 = arith.addf %175, %188 : vector<2x20x20xf32>
    %190 = vector.extract_strided_slice %4 {offsets = [0, 1, 1, 1], sizes = [2, 1, 20, 20], strides = [1, 1, 1, 1]} : vector<2x3x22x22xf32> to vector<2x1x20x20xf32>
    %191 = vector.shape_cast %190 : vector<2x1x20x20xf32> to vector<2x20x20xf32>
    %c13 = arith.constant 13 : index
    %192 = memref.load %arg2[%c13] : memref<81xf32, #tpu.memory_space<smem>>
    %193 = vector.broadcast %192 : f32 to vector<2x20x20xf32>
    %194 = arith.mulf %193, %191 : vector<2x20x20xf32>
    %195 = arith.addf %181, %194 : vector<2x20x20xf32>
    %c40 = arith.constant 40 : index
    %196 = memref.load %arg2[%c40] : memref<81xf32, #tpu.memory_space<smem>>
    %197 = vector.broadcast %196 : f32 to vector<2x20x20xf32>
    %198 = arith.mulf %197, %191 : vector<2x20x20xf32>
    %199 = arith.addf %185, %198 : vector<2x20x20xf32>
    %c67 = arith.constant 67 : index
    %200 = memref.load %arg2[%c67] : memref<81xf32, #tpu.memory_space<smem>>
    %201 = vector.broadcast %200 : f32 to vector<2x20x20xf32>
    %202 = arith.mulf %201, %191 : vector<2x20x20xf32>
    %203 = arith.addf %189, %202 : vector<2x20x20xf32>
    %204 = vector.extract_strided_slice %4 {offsets = [0, 1, 1, 2], sizes = [2, 1, 20, 20], strides = [1, 1, 1, 1]} : vector<2x3x22x22xf32> to vector<2x1x20x20xf32>
    %205 = vector.shape_cast %204 : vector<2x1x20x20xf32> to vector<2x20x20xf32>
    %c14 = arith.constant 14 : index
    %206 = memref.load %arg2[%c14] : memref<81xf32, #tpu.memory_space<smem>>
    %207 = vector.broadcast %206 : f32 to vector<2x20x20xf32>
    %208 = arith.mulf %207, %205 : vector<2x20x20xf32>
    %209 = arith.addf %195, %208 : vector<2x20x20xf32>
    %c41 = arith.constant 41 : index
    %210 = memref.load %arg2[%c41] : memref<81xf32, #tpu.memory_space<smem>>
    %211 = vector.broadcast %210 : f32 to vector<2x20x20xf32>
    %212 = arith.mulf %211, %205 : vector<2x20x20xf32>
    %213 = arith.addf %199, %212 : vector<2x20x20xf32>
    %c68 = arith.constant 68 : index
    %214 = memref.load %arg2[%c68] : memref<81xf32, #tpu.memory_space<smem>>
    %215 = vector.broadcast %214 : f32 to vector<2x20x20xf32>
    %216 = arith.mulf %215, %205 : vector<2x20x20xf32>
    %217 = arith.addf %203, %216 : vector<2x20x20xf32>
    %218 = vector.extract_strided_slice %4 {offsets = [0, 1, 2, 0], sizes = [2, 1, 20, 20], strides = [1, 1, 1, 1]} : vector<2x3x22x22xf32> to vector<2x1x20x20xf32>
    %219 = vector.shape_cast %218 : vector<2x1x20x20xf32> to vector<2x20x20xf32>
    %c15 = arith.constant 15 : index
    %220 = memref.load %arg2[%c15] : memref<81xf32, #tpu.memory_space<smem>>
    %221 = vector.broadcast %220 : f32 to vector<2x20x20xf32>
    %222 = arith.mulf %221, %219 : vector<2x20x20xf32>
    %223 = arith.addf %209, %222 : vector<2x20x20xf32>
    %c42 = arith.constant 42 : index
    %224 = memref.load %arg2[%c42] : memref<81xf32, #tpu.memory_space<smem>>
    %225 = vector.broadcast %224 : f32 to vector<2x20x20xf32>
    %226 = arith.mulf %225, %219 : vector<2x20x20xf32>
    %227 = arith.addf %213, %226 : vector<2x20x20xf32>
    %c69 = arith.constant 69 : index
    %228 = memref.load %arg2[%c69] : memref<81xf32, #tpu.memory_space<smem>>
    %229 = vector.broadcast %228 : f32 to vector<2x20x20xf32>
    %230 = arith.mulf %229, %219 : vector<2x20x20xf32>
    %231 = arith.addf %217, %230 : vector<2x20x20xf32>
    %232 = vector.extract_strided_slice %4 {offsets = [0, 1, 2, 1], sizes = [2, 1, 20, 20], strides = [1, 1, 1, 1]} : vector<2x3x22x22xf32> to vector<2x1x20x20xf32>
    %233 = vector.shape_cast %232 : vector<2x1x20x20xf32> to vector<2x20x20xf32>
    %c16 = arith.constant 16 : index
    %234 = memref.load %arg2[%c16] : memref<81xf32, #tpu.memory_space<smem>>
    %235 = vector.broadcast %234 : f32 to vector<2x20x20xf32>
    %236 = arith.mulf %235, %233 : vector<2x20x20xf32>
    %237 = arith.addf %223, %236 : vector<2x20x20xf32>
    %c43 = arith.constant 43 : index
    %238 = memref.load %arg2[%c43] : memref<81xf32, #tpu.memory_space<smem>>
    %239 = vector.broadcast %238 : f32 to vector<2x20x20xf32>
    %240 = arith.mulf %239, %233 : vector<2x20x20xf32>
    %241 = arith.addf %227, %240 : vector<2x20x20xf32>
    %c70 = arith.constant 70 : index
    %242 = memref.load %arg2[%c70] : memref<81xf32, #tpu.memory_space<smem>>
    %243 = vector.broadcast %242 : f32 to vector<2x20x20xf32>
    %244 = arith.mulf %243, %233 : vector<2x20x20xf32>
    %245 = arith.addf %231, %244 : vector<2x20x20xf32>
    %246 = vector.extract_strided_slice %4 {offsets = [0, 1, 2, 2], sizes = [2, 1, 20, 20], strides = [1, 1, 1, 1]} : vector<2x3x22x22xf32> to vector<2x1x20x20xf32>
    %247 = vector.shape_cast %246 : vector<2x1x20x20xf32> to vector<2x20x20xf32>
    %c17 = arith.constant 17 : index
    %248 = memref.load %arg2[%c17] : memref<81xf32, #tpu.memory_space<smem>>
    %249 = vector.broadcast %248 : f32 to vector<2x20x20xf32>
    %250 = arith.mulf %249, %247 : vector<2x20x20xf32>
    %251 = arith.addf %237, %250 : vector<2x20x20xf32>
    %c44 = arith.constant 44 : index
    %252 = memref.load %arg2[%c44] : memref<81xf32, #tpu.memory_space<smem>>
    %253 = vector.broadcast %252 : f32 to vector<2x20x20xf32>
    %254 = arith.mulf %253, %247 : vector<2x20x20xf32>
    %255 = arith.addf %241, %254 : vector<2x20x20xf32>
    %c71 = arith.constant 71 : index
    %256 = memref.load %arg2[%c71] : memref<81xf32, #tpu.memory_space<smem>>
    %257 = vector.broadcast %256 : f32 to vector<2x20x20xf32>
    %258 = arith.mulf %257, %247 : vector<2x20x20xf32>
    %259 = arith.addf %245, %258 : vector<2x20x20xf32>
    %260 = vector.extract_strided_slice %4 {offsets = [0, 2, 0, 0], sizes = [2, 1, 20, 20], strides = [1, 1, 1, 1]} : vector<2x3x22x22xf32> to vector<2x1x20x20xf32>
    %261 = vector.shape_cast %260 : vector<2x1x20x20xf32> to vector<2x20x20xf32>
    %c18 = arith.constant 18 : index
    %262 = memref.load %arg2[%c18] : memref<81xf32, #tpu.memory_space<smem>>
    %263 = vector.broadcast %262 : f32 to vector<2x20x20xf32>
    %264 = arith.mulf %263, %261 : vector<2x20x20xf32>
    %265 = arith.addf %251, %264 : vector<2x20x20xf32>
    %c45 = arith.constant 45 : index
    %266 = memref.load %arg2[%c45] : memref<81xf32, #tpu.memory_space<smem>>
    %267 = vector.broadcast %266 : f32 to vector<2x20x20xf32>
    %268 = arith.mulf %267, %261 : vector<2x20x20xf32>
    %269 = arith.addf %255, %268 : vector<2x20x20xf32>
    %c72 = arith.constant 72 : index
    %270 = memref.load %arg2[%c72] : memref<81xf32, #tpu.memory_space<smem>>
    %271 = vector.broadcast %270 : f32 to vector<2x20x20xf32>
    %272 = arith.mulf %271, %261 : vector<2x20x20xf32>
    %273 = arith.addf %259, %272 : vector<2x20x20xf32>
    %274 = vector.extract_strided_slice %4 {offsets = [0, 2, 0, 1], sizes = [2, 1, 20, 20], strides = [1, 1, 1, 1]} : vector<2x3x22x22xf32> to vector<2x1x20x20xf32>
    %275 = vector.shape_cast %274 : vector<2x1x20x20xf32> to vector<2x20x20xf32>
    %c19 = arith.constant 19 : index
    %276 = memref.load %arg2[%c19] : memref<81xf32, #tpu.memory_space<smem>>
    %277 = vector.broadcast %276 : f32 to vector<2x20x20xf32>
    %278 = arith.mulf %277, %275 : vector<2x20x20xf32>
    %279 = arith.addf %265, %278 : vector<2x20x20xf32>
    %c46 = arith.constant 46 : index
    %280 = memref.load %arg2[%c46] : memref<81xf32, #tpu.memory_space<smem>>
    %281 = vector.broadcast %280 : f32 to vector<2x20x20xf32>
    %282 = arith.mulf %281, %275 : vector<2x20x20xf32>
    %283 = arith.addf %269, %282 : vector<2x20x20xf32>
    %c73 = arith.constant 73 : index
    %284 = memref.load %arg2[%c73] : memref<81xf32, #tpu.memory_space<smem>>
    %285 = vector.broadcast %284 : f32 to vector<2x20x20xf32>
    %286 = arith.mulf %285, %275 : vector<2x20x20xf32>
    %287 = arith.addf %273, %286 : vector<2x20x20xf32>
    %288 = vector.extract_strided_slice %4 {offsets = [0, 2, 0, 2], sizes = [2, 1, 20, 20], strides = [1, 1, 1, 1]} : vector<2x3x22x22xf32> to vector<2x1x20x20xf32>
    %289 = vector.shape_cast %288 : vector<2x1x20x20xf32> to vector<2x20x20xf32>
    %c20 = arith.constant 20 : index
    %290 = memref.load %arg2[%c20] : memref<81xf32, #tpu.memory_space<smem>>
    %291 = vector.broadcast %290 : f32 to vector<2x20x20xf32>
    %292 = arith.mulf %291, %289 : vector<2x20x20xf32>
    %293 = arith.addf %279, %292 : vector<2x20x20xf32>
    %c47 = arith.constant 47 : index
    %294 = memref.load %arg2[%c47] : memref<81xf32, #tpu.memory_space<smem>>
    %295 = vector.broadcast %294 : f32 to vector<2x20x20xf32>
    %296 = arith.mulf %295, %289 : vector<2x20x20xf32>
    %297 = arith.addf %283, %296 : vector<2x20x20xf32>
    %c74 = arith.constant 74 : index
    %298 = memref.load %arg2[%c74] : memref<81xf32, #tpu.memory_space<smem>>
    %299 = vector.broadcast %298 : f32 to vector<2x20x20xf32>
    %300 = arith.mulf %299, %289 : vector<2x20x20xf32>
    %301 = arith.addf %287, %300 : vector<2x20x20xf32>
    %302 = vector.extract_strided_slice %4 {offsets = [0, 2, 1, 0], sizes = [2, 1, 20, 20], strides = [1, 1, 1, 1]} : vector<2x3x22x22xf32> to vector<2x1x20x20xf32>
    %303 = vector.shape_cast %302 : vector<2x1x20x20xf32> to vector<2x20x20xf32>
    %c21 = arith.constant 21 : index
    %304 = memref.load %arg2[%c21] : memref<81xf32, #tpu.memory_space<smem>>
    %305 = vector.broadcast %304 : f32 to vector<2x20x20xf32>
    %306 = arith.mulf %305, %303 : vector<2x20x20xf32>
    %307 = arith.addf %293, %306 : vector<2x20x20xf32>
    %c48 = arith.constant 48 : index
    %308 = memref.load %arg2[%c48] : memref<81xf32, #tpu.memory_space<smem>>
    %309 = vector.broadcast %308 : f32 to vector<2x20x20xf32>
    %310 = arith.mulf %309, %303 : vector<2x20x20xf32>
    %311 = arith.addf %297, %310 : vector<2x20x20xf32>
    %c75 = arith.constant 75 : index
    %312 = memref.load %arg2[%c75] : memref<81xf32, #tpu.memory_space<smem>>
    %313 = vector.broadcast %312 : f32 to vector<2x20x20xf32>
    %314 = arith.mulf %313, %303 : vector<2x20x20xf32>
    %315 = arith.addf %301, %314 : vector<2x20x20xf32>
    %316 = vector.extract_strided_slice %4 {offsets = [0, 2, 1, 1], sizes = [2, 1, 20, 20], strides = [1, 1, 1, 1]} : vector<2x3x22x22xf32> to vector<2x1x20x20xf32>
    %317 = vector.shape_cast %316 : vector<2x1x20x20xf32> to vector<2x20x20xf32>
    %c22 = arith.constant 22 : index
    %318 = memref.load %arg2[%c22] : memref<81xf32, #tpu.memory_space<smem>>
    %319 = vector.broadcast %318 : f32 to vector<2x20x20xf32>
    %320 = arith.mulf %319, %317 : vector<2x20x20xf32>
    %321 = arith.addf %307, %320 : vector<2x20x20xf32>
    %c49 = arith.constant 49 : index
    %322 = memref.load %arg2[%c49] : memref<81xf32, #tpu.memory_space<smem>>
    %323 = vector.broadcast %322 : f32 to vector<2x20x20xf32>
    %324 = arith.mulf %323, %317 : vector<2x20x20xf32>
    %325 = arith.addf %311, %324 : vector<2x20x20xf32>
    %c76 = arith.constant 76 : index
    %326 = memref.load %arg2[%c76] : memref<81xf32, #tpu.memory_space<smem>>
    %327 = vector.broadcast %326 : f32 to vector<2x20x20xf32>
    %328 = arith.mulf %327, %317 : vector<2x20x20xf32>
    %329 = arith.addf %315, %328 : vector<2x20x20xf32>
    %330 = vector.extract_strided_slice %4 {offsets = [0, 2, 1, 2], sizes = [2, 1, 20, 20], strides = [1, 1, 1, 1]} : vector<2x3x22x22xf32> to vector<2x1x20x20xf32>
    %331 = vector.shape_cast %330 : vector<2x1x20x20xf32> to vector<2x20x20xf32>
    %c23 = arith.constant 23 : index
    %332 = memref.load %arg2[%c23] : memref<81xf32, #tpu.memory_space<smem>>
    %333 = vector.broadcast %332 : f32 to vector<2x20x20xf32>
    %334 = arith.mulf %333, %331 : vector<2x20x20xf32>
    %335 = arith.addf %321, %334 : vector<2x20x20xf32>
    %c50 = arith.constant 50 : index
    %336 = memref.load %arg2[%c50] : memref<81xf32, #tpu.memory_space<smem>>
    %337 = vector.broadcast %336 : f32 to vector<2x20x20xf32>
    %338 = arith.mulf %337, %331 : vector<2x20x20xf32>
    %339 = arith.addf %325, %338 : vector<2x20x20xf32>
    %c77 = arith.constant 77 : index
    %340 = memref.load %arg2[%c77] : memref<81xf32, #tpu.memory_space<smem>>
    %341 = vector.broadcast %340 : f32 to vector<2x20x20xf32>
    %342 = arith.mulf %341, %331 : vector<2x20x20xf32>
    %343 = arith.addf %329, %342 : vector<2x20x20xf32>
    %344 = vector.extract_strided_slice %4 {offsets = [0, 2, 2, 0], sizes = [2, 1, 20, 20], strides = [1, 1, 1, 1]} : vector<2x3x22x22xf32> to vector<2x1x20x20xf32>
    %345 = vector.shape_cast %344 : vector<2x1x20x20xf32> to vector<2x20x20xf32>
    %c24 = arith.constant 24 : index
    %346 = memref.load %arg2[%c24] : memref<81xf32, #tpu.memory_space<smem>>
    %347 = vector.broadcast %346 : f32 to vector<2x20x20xf32>
    %348 = arith.mulf %347, %345 : vector<2x20x20xf32>
    %349 = arith.addf %335, %348 : vector<2x20x20xf32>
    %c51 = arith.constant 51 : index
    %350 = memref.load %arg2[%c51] : memref<81xf32, #tpu.memory_space<smem>>
    %351 = vector.broadcast %350 : f32 to vector<2x20x20xf32>
    %352 = arith.mulf %351, %345 : vector<2x20x20xf32>
    %353 = arith.addf %339, %352 : vector<2x20x20xf32>
    %c78 = arith.constant 78 : index
    %354 = memref.load %arg2[%c78] : memref<81xf32, #tpu.memory_space<smem>>
    %355 = vector.broadcast %354 : f32 to vector<2x20x20xf32>
    %356 = arith.mulf %355, %345 : vector<2x20x20xf32>
    %357 = arith.addf %343, %356 : vector<2x20x20xf32>
    %358 = vector.extract_strided_slice %4 {offsets = [0, 2, 2, 1], sizes = [2, 1, 20, 20], strides = [1, 1, 1, 1]} : vector<2x3x22x22xf32> to vector<2x1x20x20xf32>
    %359 = vector.shape_cast %358 : vector<2x1x20x20xf32> to vector<2x20x20xf32>
    %c25 = arith.constant 25 : index
    %360 = memref.load %arg2[%c25] : memref<81xf32, #tpu.memory_space<smem>>
    %361 = vector.broadcast %360 : f32 to vector<2x20x20xf32>
    %362 = arith.mulf %361, %359 : vector<2x20x20xf32>
    %363 = arith.addf %349, %362 : vector<2x20x20xf32>
    %c52 = arith.constant 52 : index
    %364 = memref.load %arg2[%c52] : memref<81xf32, #tpu.memory_space<smem>>
    %365 = vector.broadcast %364 : f32 to vector<2x20x20xf32>
    %366 = arith.mulf %365, %359 : vector<2x20x20xf32>
    %367 = arith.addf %353, %366 : vector<2x20x20xf32>
    %c79 = arith.constant 79 : index
    %368 = memref.load %arg2[%c79] : memref<81xf32, #tpu.memory_space<smem>>
    %369 = vector.broadcast %368 : f32 to vector<2x20x20xf32>
    %370 = arith.mulf %369, %359 : vector<2x20x20xf32>
    %371 = arith.addf %357, %370 : vector<2x20x20xf32>
    %372 = vector.extract_strided_slice %4 {offsets = [0, 2, 2, 2], sizes = [2, 1, 20, 20], strides = [1, 1, 1, 1]} : vector<2x3x22x22xf32> to vector<2x1x20x20xf32>
    %373 = vector.shape_cast %372 : vector<2x1x20x20xf32> to vector<2x20x20xf32>
    %c26 = arith.constant 26 : index
    %374 = memref.load %arg2[%c26] : memref<81xf32, #tpu.memory_space<smem>>
    %375 = vector.broadcast %374 : f32 to vector<2x20x20xf32>
    %376 = arith.mulf %375, %373 : vector<2x20x20xf32>
    %377 = arith.addf %363, %376 : vector<2x20x20xf32>
    %c53 = arith.constant 53 : index
    %378 = memref.load %arg2[%c53] : memref<81xf32, #tpu.memory_space<smem>>
    %379 = vector.broadcast %378 : f32 to vector<2x20x20xf32>
    %380 = arith.mulf %379, %373 : vector<2x20x20xf32>
    %381 = arith.addf %367, %380 : vector<2x20x20xf32>
    %c80 = arith.constant 80 : index
    %382 = memref.load %arg2[%c80] : memref<81xf32, #tpu.memory_space<smem>>
    %383 = vector.broadcast %382 : f32 to vector<2x20x20xf32>
    %384 = arith.mulf %383, %373 : vector<2x20x20xf32>
    %385 = arith.addf %371, %384 : vector<2x20x20xf32>
    %cst_19 = arith.constant dense<0.000000e+00> : vector<2x20xf32>
    %386 = vector.multi_reduction <add>, %377, %cst_19 [2] : vector<2x20x20xf32> to vector<2x20xf32>
    %cst_20 = arith.constant dense<0.000000e+00> : vector<2xf32>
    %387 = vector.multi_reduction <add>, %386, %cst_20 [1] : vector<2x20xf32> to vector<2xf32>
    %388 = vector.shape_cast %387 : vector<2xf32> to vector<2x1xf32>
    %c0_21 = arith.constant 0 : index
    %c0_22 = arith.constant 0 : index
    %389 = vector.load %arg7[%c0_21, %c0_22] : memref<2x3xf32, #tpu.memory_space<vmem>>, vector<2x1xf32>
    tpu.vector_store %arg7[%c0_21, %c0_22], %388 {strides = array<i32>} : memref<2x3xf32, #tpu.memory_space<vmem>>, vector<2x1xf32>,
    %cst_23 = arith.constant dense<0.000000e+00> : vector<2x20xf32>
    %390 = vector.multi_reduction <add>, %381, %cst_23 [2] : vector<2x20x20xf32> to vector<2x20xf32>
    %cst_24 = arith.constant dense<0.000000e+00> : vector<2xf32>
    %391 = vector.multi_reduction <add>, %390, %cst_24 [1] : vector<2x20xf32> to vector<2xf32>
    %392 = vector.shape_cast %391 : vector<2xf32> to vector<2x1xf32>
    %c0_25 = arith.constant 0 : index
    %c1_26 = arith.constant 1 : index
    %393 = vector.load %arg7[%c0_25, %c1_26] : memref<2x3xf32, #tpu.memory_space<vmem>>, vector<2x1xf32>
    tpu.vector_store %arg7[%c0_25, %c1_26], %392 {strides = array<i32>} : memref<2x3xf32, #tpu.memory_space<vmem>>, vector<2x1xf32>,
    %cst_27 = arith.constant dense<0.000000e+00> : vector<2x20xf32>
    %394 = vector.multi_reduction <add>, %385, %cst_27 [2] : vector<2x20x20xf32> to vector<2x20xf32>
    %cst_28 = arith.constant dense<0.000000e+00> : vector<2xf32>
    %395 = vector.multi_reduction <add>, %394, %cst_28 [1] : vector<2x20xf32> to vector<2xf32>
    %396 = vector.shape_cast %395 : vector<2xf32> to vector<2x1xf32>
    %c0_29 = arith.constant 0 : index
    %c2_30 = arith.constant 2 : index
    %397 = vector.load %arg7[%c0_29, %c2_30] : memref<2x3xf32, #tpu.memory_space<vmem>>, vector<2x1xf32>
    tpu.vector_store %arg7[%c0_29, %c2_30], %396 {strides = array<i32>} : memref<2x3xf32, #tpu.memory_space<vmem>>, vector<2x1xf32>,
    %c0_31 = arith.constant 0 : index
    %c0_32 = arith.constant 0 : index
    %398 = vector.load %arg7[%c0_31, %c0_32] : memref<2x3xf32, #tpu.memory_space<vmem>>, vector<2x3xf32>
    %c0_33 = arith.constant 0 : index
    %c0_34 = arith.constant 0 : index
    %399 = vector.load %arg3[%c0_33, %c0_34] : memref<3x128xf32, #tpu.memory_space<vmem>>, vector<3x128xf32>
    %cst_35 = arith.constant dense<0.000000e+00> : vector<2x128xf32>
    %400 = tpu.matmul %398, %399, %cst_35 {dimension_numbers = #tpu.dot_dimension_numbers<[1], [0], [0], [1], [0, 0, 1, 1], [], []>} : vector<2x3xf32>, vector<3x128xf32>, vector<2x128xf32> -> vector<2x128xf32>
    %c0_36 = arith.constant 0 : index
    %c0_37 = arith.constant 0 : index
    %401 = vector.load %arg4[%c0_36, %c0_37] : memref<1x128xf32, #tpu.memory_space<vmem>>, vector<1x128xf32>
    %402 = vector.broadcast %401 : vector<1x128xf32> to vector<2x128xf32>
    %403 = arith.addf %400, %402 : vector<2x128xf32>
    %c0_38 = arith.constant 0 : index
    %c0_39 = arith.constant 0 : index
    %404 = vector.load %arg5[%c0_38, %c0_39] : memref<2x128xf32, #tpu.memory_space<vmem>>, vector<2x128xf32>
    tpu.vector_store %arg5[%c0_38, %c0_39], %403 {strides = array<i32>} : memref<2x128xf32, #tpu.memory_space<vmem>>, vector<2x128xf32>,
    return
  }
  func.func @transform_0(%arg0: i32) -> (i32, i32, i32, i32) {
    %c0_i32 = arith.constant 0 : i32
    %c0_i32_0 = arith.constant 0 : i32
    %c0_i32_1 = arith.constant 0 : i32
    %c0_i32_2 = arith.constant 0 : i32
    return %arg0, %c0_i32, %c0_i32_0, %c0_i32_1 : i32, i32, i32, i32
  }
  func.func @transform_1(%arg0: i32) -> i32 {
    %c0_i32 = arith.constant 0 : i32
    %c0_i32_0 = arith.constant 0 : i32
    return %c0_i32 : i32
  }
  func.func @transform_2(%arg0: i32) -> (i32, i32) {
    %c0_i32 = arith.constant 0 : i32
    %c0_i32_0 = arith.constant 0 : i32
    %c0_i32_1 = arith.constant 0 : i32
    return %c0_i32, %c0_i32_0 : i32, i32
  }
  func.func @transform_3(%arg0: i32) -> (i32, i32) {
    %c0_i32 = arith.constant 0 : i32
    %c0_i32_0 = arith.constant 0 : i32
    %c0_i32_1 = arith.constant 0 : i32
    return %c0_i32, %c0_i32_0 : i32, i32
  }
  func.func @transform_4(%arg0: i32) -> (i32, i32) {
    %c0_i32 = arith.constant 0 : i32
    %c0_i32_0 = arith.constant 0 : i32
    return %arg0, %c0_i32 : i32, i32
  }
}

</mosaic_0001>

<bundles_post_ra>
// kernel: tpu_custom_call.1
= control target key start
LH: loop header
LB: loop body
LE: loop exit
PB: predicated region body
PF: predicated region fallthrough
CT: control target
= control target key end

     0   :  { %9 = vsyncpa [#allocation5], 0  ;;  %s7288_s0 = inlined_call_operand.hbm [shape: f32[2,3,16,16], index: 0, kind: input, shape index: {}]   ;;  %s7289_s1 = inlined_call_operand.vmem [shape: f32[81], index: 1, kind: input, shape index: {}]   ;;  %s7290_s2 = inlined_call_operand.vmem [shape: f32[3,128], index: 2, kind: input, shape index: {}]   ;;  %s7291_s3 = inlined_call_operand.vmem [shape: f32[1,128], index: 3, kind: input, shape index: {}]   ;;  %s7292_s4 = inlined_call_operand.hbm [shape: f32[2,128], index: 4, kind: output, shape index: {}]  }
   0x1   :  { %10 = vsyncpa [#allocation7], 0 }
   0x2   :  { %11 = vsyncpa [#allocation6], 0  ;;  %s3821_s15 = smov [#allocation4]   ;;  %s30_s19 = sshll.u32 %s7289_s1, 4  ;;  %s31_s19 = int_to_ptr.vmem [resolvable:$true] %s30_s19 }
   0x3   :  { %s17_s16 = sshll.u32 %s3821_s15, 4  ;;  %s3759_s22 = scalar_lea.hbm %s7288_s0, 1536  ;;  %s18_s16 = int_to_ptr.vmem [resolvable:$true] %s17_s16 }
   0x4   :  { %p3760_p0 = scmp.ne.s32.totalorder %s7288_s0, %s3759_s22  ;;  %p3763_p1 = scmp.lt.u32.totalorder %s3759_s22, %s7288_s0 }
   0x6   :  { %p3765_p2 = pnand %p3763_p1, %p3760_p0 }
   0x8   :  { %3768 = shalt.err (!%p3765_p2)
}
   0x9   :  { %s3769_s27 = scalar_lea.vmem %s18_s16, 1536  ;;  %p3774_p4 = scmp.lt.s32.totalorder %s18_s16, %s18_s16 }
   0xa   :  { %p3770_p3 = scmp.ne.s32.totalorder %s18_s16, %s3769_s27  ;;  %p3775_p5 = scmp.lt.s32.totalorder %s3769_s27, %s3769_s27 }
   0xc   :  { %p3776_p6 = por %p3775_p5, %p3774_p4 }
   0xe   :  { %p3777_p7 = pnand %p3776_p6, %p3770_p3 }
  0x10   :  { %3780 = shalt.err (!%p3777_p7)
}
  0x11   :  { %s3822_s1 = smov 128   ;;  %s3823_s28 = smov 8  }
  0x12   :  { %23 = dma.hbm_to_vmem [thread:$0]  %s7288_s0, 1536, %s18_s16, [#allocation5], %s3822_s1, %s3822_s1, %s3823_s28  }
  0x13   :  { %s3781_s5 = scalar_lea.vmem %s31_s19, 16  ;;  %p3786_p9 = scmp.lt.s32.totalorder %s31_s19, %s31_s19 }
  0x14   :  { %p3782_p8 = scmp.ne.s32.totalorder %s31_s19, %s3781_s5  ;;  %p3787_p10 = scmp.lt.s32.totalorder %s3781_s5, %s3781_s5 }
  0x16   :  { %p3788_p11 = por %p3787_p10, %p3786_p9 }
  0x18   :  { %p3789_p12 = pnand %p3788_p11, %p3782_p8 }
  0x1a   :  { %3792 = shalt.err (!%p3789_p12)
}
  0x1b   :  { %s3824_s6 = smov [#allocation8]  }
  0x1c   :  { %33 = dma.vmem_to_smem %s31_s19, 16, %s3824_s6, [#allocation7]  }
  0x1d   :  { %3815 = dma.done.wait [#allocation5], 1536  }
  0x1e   :  { %3816 = vsyncadd [#allocation5], 4294965760 }
  0x1f   :  { %3817 = dma.done.wait [#allocation7], 16  }
  0x20   :  { %3818 = vsyncadd [#allocation7], 4294967280 }
  0x21   :  { %44 = sfence }
  0x22   :  { %v67_v0 = vld [vmem:[#allocation4 + $0x10] sm:$0xff]  ;;  %v65_v1 = vld [vmem:[#allocation4] sm:$0xff]  ;;  %vm45_vm0 = vcmask 179200   ;;  %s3825_s7 = smov 3   ;;  %vm48_vm1 = vcmask 177152   ;;  %v68_v2 = vld [vmem:[#allocation4 + $0x18] sm:$0xff] }
  0x23   :  { %93 = vrot.lane.b32.xlu1 %v67_v0, %s3825_s7  ;;  %89 = vrot.lane.b32.xlu0 %v65_v1, %s3825_s7  ;;  %v66_v3 = vld [vmem:[#allocation4 + $0x8] sm:$0xff]  ;;  %v7293_v4 = vmov 0.0   ;;  %v69_v6 = vld [vmem:[#allocation4 + $0x20] sm:$0xff]  ;;  %v72_v7 = vld [vmem:[#allocation4 + $0x38] sm:$0xff]  ;;  %vm125_vm2 = vcmask 154648   ;;  %s3637_s0 = sld [smem:[#allocation8 + $0x1]] }
  0x24   :  { %50 = vst.msk [vmem:[#allocation2 + $0x18] sm:$0xff] %vm45_vm0, %v7293_v4  ;;  %51 = vst.msk [vmem:[#allocation2 + $0x20] sm:$0xff] %vm45_vm0, %v7293_v4  ;;  %3720 = vmatprep.subr.mxu0 %v7293_v4  ;;  %v70_v5 = vld [vmem:[#allocation4 + $0x28] sm:$0xff]  ;;  %v71_v8 = vld [vmem:[#allocation4 + $0x30] sm:$0xff]  ;;  %s3827_s8 = smov 127   ;;  %s3638_s9 = sld [smem:[#allocation8 + $0x1c]] }
  0x25   :  { %46 = vst.msk [vmem:[#allocation2] sm:$0xff] %vm45_vm0, %v7293_v4  ;;  %47 = vst.msk [vmem:[#allocation2 + $0x8] sm:$0xff] %vm45_vm0, %v7293_v4  ;;  %v73_v9 = vld [vmem:[#allocation4 + $0x40] sm:$0xff]  ;;  %v74_v10 = vld [vmem:[#allocation4 + $0x48] sm:$0xff]  ;;  %s3639_s10 = sld [smem:[#allocation8 + $0x37]]  ;;  %s3640_s11 = sld [smem:[#allocation8 + $0x2]] }
  0x26   :  { %53 = vst.msk [vmem:[#allocation2 + $0x30] sm:$0xff] %vm45_vm0, %v7293_v4  ;;  %54 = vst.msk [vmem:[#allocation2 + $0x38] sm:$0xff] %vm45_vm0, %v7293_v4  ;;  %v75_v11 = vld [vmem:[#allocation4 + $0x50] sm:$0xff]  ;;  %v76_v12 = vld [vmem:[#allocation4 + $0x58] sm:$0xff]  ;;  %s3641_s12 = sld [smem:[#allocation8 + $0x1d]]  ;;  %s3828_s13 = smov 126  }
  0x27   :  { %56 = vst.msk [vmem:[#allocation2 + $0x48] sm:$0xff] %vm45_vm0, %v7293_v4  ;;  %57 = vst.msk [vmem:[#allocation2 + $0x50] sm:$0xff] %vm45_vm0, %v7293_v4  ;;  %95 = vrot.lane.b32.xlu1 %v68_v2, %s3825_s7  ;;  %91 = vrot.lane.b32.xlu0 %v66_v3, %s3825_s7  ;;  %s3642_s14 = sld [smem:[#allocation8 + $0x38]]  ;;  %s3646_s15 = sld [smem:[#allocation8 + $0x4]]  ;;  %vm440_vm3 = vcmask 1046528   ;;  %vm837_vm4 = vcmask 1045504  }
  0x28   :  { %59 = vst.msk [vmem:[#allocation2 + $0x60] sm:$0xff] %vm45_vm0, %v7293_v4  ;;  %60 = vst.msk [vmem:[#allocation2 + $0x68] sm:$0xff] %vm45_vm0, %v7293_v4  ;;  %s3647_s16 = sld [smem:[#allocation8 + $0x1f]]  ;;  %s3648_s17 = sld [smem:[#allocation8 + $0x3a]]  ;;  %vm3344_vm5 = vcmask 162816   ;;  %vm3351_vm6 = vcmask 158720  }
  0x29   :  { %62 = vst.msk [vmem:[#allocation2 + $0x78] sm:$0xff] %vm45_vm0, %v7293_v4  ;;  %63 = vst.msk [vmem:[#allocation2 + $0x80] sm:$0xff] %vm45_vm0, %v7293_v4  ;;  %v199_v17 = vstv %s3637_s0  ;;  %s3649_s18 = sld [smem:[#allocation8 + $0x5]]  ;;  %s3650_s19 = sld [smem:[#allocation8 + $0x20]]  ;;  %vm3381_vm7 = vcmask 130112   ;;  %vm3388_vm8 = vcmask 195712  }
  0x2a   :  { %52 = vst.msk [vmem:[#allocation2 + $0x28] sm:$0x3f] %vm48_vm1, %v7293_v4  ;;  %49 = vst.msk [vmem:[#allocation2 + $0x10] sm:$0x3f] %vm48_vm1, %v7293_v4  ;;  %v237_v37 = vstv %s3638_s9  ;;  %s3651_s20 = sld [smem:[#allocation8 + $0x3b]]  ;;  %s3655_s21 = sld [smem:[#allocation8 + $0x7]] }
  0x2b   :  { %55 = vst.msk [vmem:[#allocation2 + $0x40] sm:$0x3f] %vm48_vm1, %v7293_v4  ;;  %58 = vst.msk [vmem:[#allocation2 + $0x58] sm:$0x3f] %vm48_vm1, %v7293_v4  ;;  %99 = vrot.lane.b32.xlu1 %v70_v5, %s3825_s7  ;;  %97 = vrot.lane.b32.xlu0 %v69_v6, %s3825_s7  ;;  %v275_v44 = vstv %s3639_s10  ;;  %v313_v51 = vstv %s3640_s11  ;;  %s3656_s22 = sld [smem:[#allocation8 + $0x22]]  ;;  %s3657_s23 = sld [smem:[#allocation8 + $0x3d]] }
  0x2c   :  { %61 = vst.msk [vmem:[#allocation2 + $0x70] sm:$0x3f] %vm48_vm1, %v7293_v4  ;;  %64 = vst.msk [vmem:[#allocation2 + $0x88] sm:$0x3f] %vm48_vm1, %v7293_v4  ;;  %v351_v58 = vstv %s3641_s12  ;;  %s3658_s24 = sld [smem:[#allocation8 + $0x8]]  ;;  %s3659_s25 = sld [smem:[#allocation8 + $0x23]] }
  0x2d   :  { %v389_v1 = vstv %s3642_s14  ;;  %s3660_s26 = sld [smem:[#allocation8 + $0x3e]]  ;;  %s3664_s27 = sld [smem:[#allocation8 + $0xa]]  ;;  %vm3404_vm9 = vcmask 1041409   ;;  %vm3407_vm10 = vcmask 156672   ;;  %vm3544_vm11 = vcmask 1042432  }
  0x2e   :  { %s3665_s1 = sld [smem:[#allocation8 + $0x25]]  ;;  %s3666_s28 = sld [smem:[#allocation8 + $0x40]]  ;;  %vm3829_vm12 = vmmov 0   ;;  %vm3411_vm13 = vcmask 1024   ;;  %vm3470_vm14 = vcmask 9224   ;;  %vm3529_vm15 = vcmask 17424  }
  0x2f   :  { %103 = vrot.lane.b32.xlu1 %v72_v7, %s3825_s7  ;;  %101 = vrot.lane.b32.xlu0 %v71_v8, %s3825_s7  ;;  %v536_v7 = vstv %s3646_s15  ;;  %s3667_s29 = sld [smem:[#allocation8 + $0xb]]  ;;  %s3668_s30 = sld [smem:[#allocation8 + $0x26]]  ;;  %vm3540_vm0 = vcmask 23552  }
  0x30   :  { %s3669_s5 = sld [smem:[#allocation8 + $0x41]]  ;;  %s3673_s6 = sld [smem:[#allocation8 + $0xd]] }
  0x31   :  { %s3675_s0 = sld [smem:[#allocation8 + $0x43]]  ;;  %s3676_s9 = sld [smem:[#allocation8 + $0xe]] }
  0x32   :  { %s3677_s10 = sld [smem:[#allocation8 + $0x29]]  ;;  %s3678_s11 = sld [smem:[#allocation8 + $0x44]] }
  0x33   :  { %105 = vrot.lane.b32.xlu0 %v73_v9, %s3825_s7  ;;  %107 = vrot.lane.b32.xlu1 %v74_v10, %s3825_s7  ;;  %s3682_s12 = sld [smem:[#allocation8 + $0x10]]  ;;  %s3683_s14 = sld [smem:[#allocation8 + $0x2b]] }
  0x34   :  { %s3684_s15 = sld [smem:[#allocation8 + $0x46]] }
  0x37   :  { %109 = vrot.lane.b32.xlu0 %v75_v11, %s3825_s7  ;;  %111 = vrot.lane.b32.xlu1 %v76_v12, %s3825_s7  ;;  %v584_v11 = vstv %s3647_s16  ;;  %s3674_s7 = sld [smem:[#allocation8 + $0x28]]  ;;  %s3685_s16 = sld [smem:[#allocation8 + $0x11]] }
  0x95   :  { %v94_v13 = vpop.permute.xlu1 %93  ;;  %v90_v14 = vpop.permute.xlu0 %89 }
  0x96   :  { %128 = vst.msk [vmem:[#allocation2 + $0x1b] sm:$0xff] %vm125_vm2, %v94_v13  ;;  %126 = vst.msk [vmem:[#allocation2 + $0x3] sm:$0xff] %vm125_vm2, %v90_v14 }
  0x99   :  { %v96_v15 = vpop.permute.xlu1 %95  ;;  %v92_v16 = vpop.permute.xlu0 %91 }
  0x9a   :  { %129 = vst.msk [vmem:[#allocation2 + $0x23] sm:$0xff] %vm125_vm2, %v96_v15  ;;  %127 = vst.msk [vmem:[#allocation2 + $0xb] sm:$0xff] %vm125_vm2, %v92_v16  ;;  %v632_v16 = vstv %s3648_s17  ;;  %s3686_s17 = sld [smem:[#allocation8 + $0x2c]] }
  0x9d   :  { %v3924_v18 = vld [vmem:[#allocation2] sm:$0xff]  ;;  %v100_v19 = vpop.permute.xlu1 %99  ;;  %v98_v20 = vpop.permute.xlu0 %97 }
  0x9e   :  { %131 = vst.msk [vmem:[#allocation2 + $0x3b] sm:$0xff] %vm125_vm2, %v100_v19  ;;  %130 = vst.msk [vmem:[#allocation2 + $0x33] sm:$0xff] %vm125_vm2, %v98_v20  ;;  %v200_v21 = vmul.f32 %v199_v17, %v3924_v18  ;;  %v238_v39 = vmul.f32 %v237_v37, %v3924_v18  ;;  %v276_v46 = vmul.f32 %v275_v44, %v3924_v18 }
  0x9f   :  { %v314_v53 = vmul.f32 %v313_v51, %v3924_v18  ;;  %v352_v60 = vmul.f32 %v351_v58, %v3924_v18  ;;  %v390_v3 = vmul.f32 %v389_v1, %v3924_v18 }
  0xa0   :  { %212 = vrot.lane.b32.xlu0 %v200_v21, %s3827_s8 }
  0xa1   :  { %v3930_v22 = vld [vmem:[#allocation2 + $0x8] sm:$0xff]  ;;  %v104_v23 = vpop.permute.xlu1 %103  ;;  %v102_v24 = vpop.permute.xlu0 %101  ;;  %v3932_v25 = vld [vmem:[#allocation2 + $0x10] sm:$0x3f] }
  0xa2   :  { %133 = vst.msk [vmem:[#allocation2 + $0x53] sm:$0xff] %vm125_vm2, %v104_v23  ;;  %132 = vst.msk [vmem:[#allocation2 + $0x4b] sm:$0xff] %vm125_vm2, %v102_v24  ;;  %v201_v26 = vmul.f32 %v199_v17, %v3930_v22  ;;  %v202_v27 = vmul.f32 %v199_v17, %v3932_v25  ;;  %v239_v40 = vmul.f32 %v237_v37, %v3930_v22 }
  0xa3   :  { %v240_v41 = vmul.f32 %v237_v37, %v3932_v25  ;;  %v277_v47 = vmul.f32 %v275_v44, %v3930_v22  ;;  %v278_v48 = vmul.f32 %v275_v44, %v3932_v25  ;;  %v315_v54 = vmul.f32 %v313_v51, %v3930_v22 }
  0xa4   :  { %214 = vrot.lane.b32.xlu1 %v201_v26, %s3827_s8  ;;  %216 = vrot.lane.b32.xlu0 %v202_v27, %s3827_s8  ;;  %v316_v55 = vmul.f32 %v313_v51, %v3932_v25  ;;  %v353_v61 = vmul.f32 %v351_v58, %v3930_v22  ;;  %v354_v62 = vmul.f32 %v351_v58, %v3932_v25 }
  0xa5   :  { %v106_v28 = vpop.permute.xlu0 %105  ;;  %v108_v29 = vpop.permute.xlu1 %107  ;;  %v391_v5 = vmul.f32 %v389_v1, %v3930_v22  ;;  %v392_v6 = vmul.f32 %v389_v1, %v3932_v25  ;;  %v539_v10 = vmul.f32 %v536_v7, %v3932_v25  ;;  %v587_v15 = vmul.f32 %v584_v11, %v3932_v25 }
  0xa6   :  { %134 = vst.msk [vmem:[#allocation2 + $0x63] sm:$0xff] %vm125_vm2, %v106_v28  ;;  %135 = vst.msk [vmem:[#allocation2 + $0x6b] sm:$0xff] %vm125_vm2, %v108_v29  ;;  %v635_v21 = vmul.f32 %v632_v16, %v3932_v25  ;;  %v538_v23 = vmul.f32 %v536_v7, %v3930_v22  ;;  %v537_v24 = vmul.f32 %v536_v7, %v3924_v18 }
  0xa7   :  { %v552_v13 = vrot.slane %v539_v10, 1  ;;  %v600_v19 = vrot.slane %v587_v15, 1 }
  0xa8   :  { %v648_v27 = vrot.slane %v635_v21, 1  ;;  %v550_v29 = vrot.slane %v538_v23, 1 }
  0xa9   :  { %v3942_v30 = vld [vmem:[#allocation2 + $0x48] sm:$0xff]  ;;  %v3944_v31 = vld [vmem:[#allocation2 + $0x50] sm:$0xff]  ;;  %v110_v32 = vpop.permute.xlu0 %109  ;;  %v112_v33 = vpop.permute.xlu1 %111  ;;  %v3950_v36 = vld [vmem:[#allocation2 + $0x58] sm:$0x3f] }
  0xaa   :  { %v203_v34 = vmul.f32 %v199_v17, %v3942_v30  ;;  %v204_v35 = vmul.f32 %v199_v17, %v3944_v31  ;;  %136 = vst.msk [vmem:[#allocation2 + $0x7b] sm:$0xff] %vm125_vm2, %v110_v32  ;;  %137 = vst.msk [vmem:[#allocation2 + $0x83] sm:$0xff] %vm125_vm2, %v112_v33  ;;  %v205_v38 = vmul.f32 %v199_v17, %v3950_v36  ;;  %v549_v33 = vrot.slane %v537_v24, 1 }
  0xab   :  { %v241_v42 = vmul.f32 %v237_v37, %v3942_v30  ;;  %v242_v43 = vmul.f32 %v237_v37, %v3944_v31  ;;  %v243_v45 = vmul.f32 %v237_v37, %v3950_v36  ;;  %v279_v49 = vmul.f32 %v275_v44, %v3942_v30 }
  0xac   :  { %218 = vrot.lane.b32.xlu1 %v203_v34, %s3827_s8  ;;  %220 = vrot.lane.b32.xlu0 %v204_v35, %s3827_s8  ;;  %v280_v50 = vmul.f32 %v275_v44, %v3944_v31  ;;  %v281_v52 = vmul.f32 %v275_v44, %v3950_v36  ;;  %v317_v56 = vmul.f32 %v313_v51, %v3942_v30 }
  0xad   :  { %v318_v57 = vmul.f32 %v313_v51, %v3944_v31  ;;  %v319_v59 = vmul.f32 %v313_v51, %v3950_v36  ;;  %v355_v63 = vmul.f32 %v351_v58, %v3942_v30  ;;  %v356_v0 = vmul.f32 %v351_v58, %v3944_v31 }
  0xae   :  { %v357_v2 = vmul.f32 %v351_v58, %v3950_v36  ;;  %v393_v8 = vmul.f32 %v389_v1, %v3942_v30  ;;  %v394_v9 = vmul.f32 %v389_v1, %v3944_v31  ;;  %v395_v12 = vmul.f32 %v389_v1, %v3950_v36 }
  0xaf   :  { %v542_v14 = vmul.f32 %v536_v7, %v3950_v36  ;;  %v590_v20 = vmul.f32 %v584_v11, %v3950_v36  ;;  %v638_v28 = vmul.f32 %v632_v16, %v3950_v36  ;;  %v541_v32 = vmul.f32 %v536_v7, %v3944_v31 }
  0xb0   :  { %222 = vrot.lane.b32.xlu1 %v205_v38, %s3827_s8  ;;  %250 = vrot.lane.b32.xlu0 %v238_v39, %s3827_s8  ;;  %v586_v35 = vmul.f32 %v584_v11, %v3930_v22  ;;  %v551_v37 = vsel %vm440_vm3, %v549_v33, %v550_v29  ;;  %v540_v39 = vmul.f32 %v536_v7, %v3942_v30 }
  0xb1   :  { %v557_v17 = vrot.slane %v542_v14, 1  ;;  %v605_v26 = vrot.slane %v590_v20, 1  ;;  %v653_v34 = vrot.slane %v638_v28, 1  ;;  %v555_v38 = vrot.slane %v541_v32, 1 }
  0xb2   :  { %v554_v44 = vrot.slane %v540_v39, 1  ;;  %v588_v51 = vmul.f32 %v584_v11, %v3942_v30 }
  0xb4   :  { %252 = vrot.lane.b32.xlu1 %v239_v40, %s3827_s8  ;;  %254 = vrot.lane.b32.xlu0 %v240_v41, %s3827_s8  ;;  %v585_v40 = vmul.f32 %v584_v11, %v3924_v18  ;;  %v598_v41 = vrot.slane %v586_v35, 1 }
  0xb8   :  { %256 = vrot.lane.b32.xlu1 %v241_v42, %s3827_s8  ;;  %258 = vrot.lane.b32.xlu0 %v242_v43, %s3827_s8  ;;  %v553_v42 = vsel %vm440_vm3, %v550_v29, %v552_v13  ;;  %v558_v43 = vsel %vm440_vm3, %v555_v38, %v557_v17 }
  0xbc   :  { %260 = vrot.lane.b32.xlu1 %v243_v45, %s3827_s8  ;;  %288 = vrot.lane.b32.xlu0 %v276_v46, %s3827_s8  ;;  %v589_v45 = vmul.f32 %v584_v11, %v3944_v31  ;;  %v597_v46 = vrot.slane %v585_v40, 1 }
  0xc0   :  { %290 = vrot.lane.b32.xlu1 %v277_v47, %s3827_s8  ;;  %292 = vrot.lane.b32.xlu0 %v278_v48, %s3827_s8  ;;  %v634_v47 = vmul.f32 %v632_v16, %v3930_v22  ;;  %v556_v48 = vsel %vm440_vm3, %v554_v44, %v555_v38  ;;  %v776_v44 = vstv %s3651_s20  ;;  %s3635_s20 = sld [smem:[#allocation8 + $0x1b]] }
  0xc4   :  { %294 = vrot.lane.b32.xlu1 %v279_v49, %s3827_s8  ;;  %296 = vrot.lane.b32.xlu0 %v280_v50, %s3827_s8  ;;  %v599_v49 = vsel %vm440_vm3, %v597_v46, %v598_v41  ;;  %v603_v50 = vrot.slane %v589_v45, 1 }
  0xc8   :  { %298 = vrot.lane.b32.xlu1 %v281_v52, %s3827_s8  ;;  %326 = vrot.lane.b32.xlu0 %v314_v53, %s3828_s13  ;;  %v633_v52 = vmul.f32 %v632_v16, %v3924_v18  ;;  %v646_v53 = vrot.slane %v634_v47, 1 }
  0xca   :  { %v645_v58 = vrot.slane %v633_v52, 1 }
  0xcc   :  { %328 = vrot.lane.b32.xlu1 %v315_v54, %s3828_s13  ;;  %330 = vrot.lane.b32.xlu0 %v316_v55, %s3828_s13  ;;  %v601_v54 = vsel %vm440_vm3, %v598_v41, %v600_v19  ;;  %v606_v55 = vsel %vm440_vm3, %v603_v50, %v605_v26 }
  0xd0   :  { %332 = vrot.lane.b32.xlu1 %v317_v56, %s3828_s13  ;;  %334 = vrot.lane.b32.xlu0 %v318_v57, %s3828_s13  ;;  %v602_v56 = vrot.slane %v588_v51, 1  ;;  %v637_v57 = vmul.f32 %v632_v16, %v3944_v31 }
  0xd4   :  { %336 = vrot.lane.b32.xlu1 %v319_v59, %s3828_s13  ;;  %364 = vrot.lane.b32.xlu0 %v352_v60, %s3828_s13  ;;  %v680_v59 = vstv %s3649_s18  ;;  %s3687_s18 = sld [smem:[#allocation8 + $0x47]] }
  0xd5   :  { %v682_v60 = vmul.f32 %v680_v59, %v3930_v22  ;;  %v681_v1 = vmul.f32 %v680_v59, %v3924_v18  ;;  %v686_v14 = vmul.f32 %v680_v59, %v3950_v36 }
  0xd7   :  { %v701_v20 = vrot.slane %v686_v14, 1 }
  0xd8   :  { %366 = vrot.lane.b32.xlu1 %v353_v61, %s3828_s13  ;;  %368 = vrot.lane.b32.xlu0 %v354_v62, %s3828_s13  ;;  %v604_v61 = vsel %vm440_vm3, %v602_v56, %v603_v50  ;;  %v647_v62 = vsel %vm440_vm3, %v645_v58, %v646_v53 }
  0xdc   :  { %370 = vrot.lane.b32.xlu1 %v355_v63, %s3828_s13  ;;  %372 = vrot.lane.b32.xlu0 %v356_v0, %s3828_s13  ;;  %v651_v63 = vrot.slane %v637_v57, 1  ;;  %v636_v0 = vmul.f32 %v632_v16, %v3942_v30  ;;  %v728_v16 = vstv %s3650_s19  ;;  %s156_s19 = sld [smem:[#allocation8]] }
  0xdd   :  { %v730_v21 = vmul.f32 %v728_v16, %v3930_v22  ;;  %v729_v24 = vmul.f32 %v728_v16, %v3924_v18  ;;  %v731_v29 = vmul.f32 %v728_v16, %v3932_v25  ;;  %v732_v35 = vmul.f32 %v728_v16, %v3942_v30 }
  0xde   :  { %v650_v7 = vrot.slane %v636_v0, 1  ;;  %v733_v39 = vmul.f32 %v728_v16, %v3944_v31  ;;  %v734_v40 = vmul.f32 %v728_v16, %v3950_v36 }
  0xdf   :  { %v742_v28 = vrot.slane %v730_v21, 1  ;;  %v741_v32 = vrot.slane %v729_v24, 1  ;;  %v744_v38 = vrot.slane %v731_v29, 1 }
  0xe0   :  { %374 = vrot.lane.b32.xlu1 %v357_v2, %s3828_s13  ;;  %402 = vrot.lane.b32.xlu0 %v390_v3, %s3828_s13  ;;  %v694_v2 = vrot.slane %v682_v60, 1  ;;  %v683_v3 = vmul.f32 %v680_v59, %v3932_v25  ;;  %v652_v11 = vsel %vm440_vm3, %v650_v7, %v651_v63  ;;  %v747_v46 = vrot.slane %v733_v39, 1 }
  0xe1   :  { %v745_v45 = vsel %vm440_vm3, %v742_v28, %v744_v38  ;;  %v749_v47 = vrot.slane %v734_v40, 1 }
  0xe2   :  { %v696_v10 = vrot.slane %v683_v3, 1  ;;  %v933_v3 = vstv %s3655_s21  ;;  %s3636_s21 = sld [smem:[#allocation8 + $0x36]] }
  0xe4   :  { %404 = vrot.lane.b32.xlu1 %v391_v5, %s3828_s13  ;;  %406 = vrot.lane.b32.xlu0 %v392_v6, %s3828_s13  ;;  %v649_v5 = vsel %vm440_vm3, %v646_v53, %v648_v27  ;;  %v654_v6 = vsel %vm440_vm3, %v651_v63, %v653_v34  ;;  %v697_v15 = vsel %vm440_vm3, %v694_v2, %v696_v10 }
  0xe5   :  { %v750_v53 = vsel %vm440_vm3, %v747_v46, %v749_v47  ;;  %v782_v63 = vmul.f32 %v776_v44, %v3950_v36 }
  0xe7   :  { %v797_v7 = vrot.slane %v782_v63, 1 }
  0xe8   :  { %408 = vrot.lane.b32.xlu1 %v393_v8, %s3828_s13  ;;  %410 = vrot.lane.b32.xlu0 %v394_v9, %s3828_s13  ;;  %v693_v8 = vrot.slane %v681_v1, 1 }
  0xea   :  { %v695_v9 = vsel %vm440_vm3, %v693_v8, %v694_v2  ;;  %v935_v8 = vmul.f32 %v933_v3, %v3930_v22 }
  0xec   :  { %412 = vrot.lane.b32.xlu1 %v395_v12, %s3828_s13  ;;  %563 = vrot.lane.b32.xlu0 %v552_v13, %s3827_s8  ;;  %v684_v12 = vmul.f32 %v680_v59, %v3942_v30  ;;  %v685_v13 = vmul.f32 %v680_v59, %v3944_v31  ;;  %v780_v59 = vmul.f32 %v776_v44, %v3942_v30  ;;  %v947_v14 = vrot.slane %v935_v8, 2 }
  0xee   :  { %v794_v2 = vrot.slane %v780_v59, 1 }
  0xf0   :  { %569 = vrot.lane.b32.xlu1 %v557_v17, %s3827_s8  ;;  %611 = vrot.lane.b32.xlu0 %v600_v19, %s3827_s8  ;;  %v698_v17 = vrot.slane %v684_v12, 1  ;;  %v699_v19 = vrot.slane %v685_v13, 1 }
  0xf4   :  { %617 = vrot.lane.b32.xlu1 %v605_v26, %s3827_s8  ;;  %659 = vrot.lane.b32.xlu0 %v648_v27, %s3827_s8  ;;  %v700_v26 = vsel %vm440_vm3, %v698_v17, %v699_v19  ;;  %v702_v27 = vsel %vm440_vm3, %v699_v19, %v701_v20 }
  0xf8   :  { %665 = vrot.lane.b32.xlu1 %v653_v34, %s3827_s8  ;;  %559 = vrot.lane.b32.xlu0 %v551_v37, %s3827_s8  ;;  %v743_v37 = vsel %vm440_vm3, %v741_v32, %v742_v28 }
  0xfc   :  { %561 = vrot.lane.b32.xlu1 %v553_v42, %s3827_s8  ;;  %567 = vrot.lane.b32.xlu0 %v558_v43, %s3827_s8  ;;  %v746_v43 = vrot.slane %v732_v35, 1  ;;  %v981_v35 = vstv %s3656_s22  ;;  %s3643_s22 = sld [smem:[#allocation8 + $0x3]] }
  0xfd   :  { %v983_v40 = vmul.f32 %v981_v35, %v3930_v22  ;;  %v985_v59 = vmul.f32 %v981_v35, %v3942_v30 }
  0xfe   :  { %v748_v52 = vsel %vm440_vm3, %v746_v43, %v747_v46  ;;  %v982_v43 = vmul.f32 %v981_v35, %v3924_v18  ;;  %v984_v46 = vmul.f32 %v981_v35, %v3932_v25 }
 0x100   :  { %565 = vrot.lane.b32.xlu1 %v556_v48, %s3827_s8  ;;  %607 = vrot.lane.b32.xlu0 %v599_v49, %s3827_s8  ;;  %v778_v48 = vmul.f32 %v776_v44, %v3930_v22  ;;  %v777_v49 = vmul.f32 %v776_v44, %v3924_v18 }
 0x102   :  { %v789_v56 = vrot.slane %v777_v49, 1  ;;  %v995_v49 = vrot.slane %v983_v40, 2 }
 0x104   :  { %609 = vrot.lane.b32.xlu1 %v601_v54, %s3827_s8  ;;  %615 = vrot.lane.b32.xlu0 %v606_v55, %s3827_s8  ;;  %v790_v54 = vrot.slane %v778_v48, 1  ;;  %v779_v55 = vmul.f32 %v776_v44, %v3932_v25 }
 0x106   :  { %v791_v60 = vsel %vm440_vm3, %v789_v56, %v790_v54 }
 0x108   :  { %613 = vrot.lane.b32.xlu1 %v604_v61, %s3827_s8  ;;  %655 = vrot.lane.b32.xlu0 %v647_v62, %s3827_s8  ;;  %v792_v61 = vrot.slane %v779_v55, 1  ;;  %v781_v62 = vmul.f32 %v776_v44, %v3944_v31  ;;  %v997_v55 = vrot.slane %v984_v46, 2  ;;  %v1077_v46 = vstv %s3658_s24  ;;  %s3645_s24 = sld [smem:[#allocation8 + $0x39]] }
 0x10c   :  { %657 = vrot.lane.b32.xlu1 %v649_v5, %s3827_s8  ;;  %663 = vrot.lane.b32.xlu0 %v654_v6, %s3827_s8  ;;  %v793_v5 = vsel %vm440_vm3, %v790_v54, %v792_v61  ;;  %v795_v6 = vrot.slane %v781_v62, 1 }
 0x10e   :  { %v796_v12 = vsel %vm440_vm3, %v794_v2, %v795_v6  ;;  %v798_v13 = vsel %vm440_vm3, %v795_v6, %v797_v7  ;;  %v998_v2 = vsel %vm837_vm4, %v995_v49, %v997_v55 }
 0x110   :  { %661 = vrot.lane.b32.xlu1 %v652_v11, %s3827_s8  ;;  %703 = vrot.lane.b32.xlu0 %v695_v9, %s3828_s13  ;;  %v934_v9 = vmul.f32 %v933_v3, %v3924_v18 }
 0x112   :  { %v4074_v23 = vpop.permute.xlu0 %212  ;;  %v946_v16 = vrot.slane %v934_v9, 2 }
 0x114   :  { %705 = vrot.lane.b32.xlu1 %v697_v15, %s3828_s13  ;;  %707 = vrot.lane.b32.xlu0 %v696_v10, %s3828_s13  ;;  %v936_v15 = vmul.f32 %v933_v3, %v3932_v25  ;;  %v948_v21 = vsel %vm837_vm4, %v946_v16, %v947_v14 }
 0x116   :  { %v4084_v33 = vpop.permute.xlu1 %214  ;;  %v4086_v34 = vpop.permute.xlu0 %216  ;;  %v949_v24 = vrot.slane %v936_v15, 2 }
 0x118   :  { %709 = vrot.lane.b32.xlu1 %v700_v26, %s3828_s13  ;;  %711 = vrot.lane.b32.xlu0 %v702_v27, %s3828_s13  ;;  %v938_v26 = vmul.f32 %v933_v3, %v3944_v31  ;;  %v939_v27 = vmul.f32 %v933_v3, %v3950_v36 }
 0x11a   :  { %v954_v39 = vrot.slane %v939_v27, 2 }
 0x11c   :  { %713 = vrot.lane.b32.xlu1 %v701_v20, %s3828_s13  ;;  %751 = vrot.lane.b32.xlu0 %v743_v37, %s3828_s13  ;;  %v937_v20 = vmul.f32 %v933_v3, %v3942_v30  ;;  %v950_v37 = vsel %vm837_vm4, %v947_v14, %v949_v24  ;;  %v1029_v3 = vstv %s3657_s23  ;;  %s3644_s23 = sld [smem:[#allocation8 + $0x1e]] }
 0x11d   :  { %v1031_v8 = vmul.f32 %v1029_v3, %v3930_v22  ;;  %v1030_v9 = vmul.f32 %v1029_v3, %v3924_v18  ;;  %v1033_v27 = vmul.f32 %v1029_v3, %v3942_v30 }
 0x11e   :  { %v4094_v41 = vpop.permute.xlu1 %218  ;;  %v4096_v42 = vpop.permute.xlu0 %220  ;;  %v951_v32 = vrot.slane %v937_v20, 2  ;;  %v1032_v20 = vmul.f32 %v1029_v3, %v3932_v25 }
 0x11f   :  { %v1043_v16 = vrot.slane %v1031_v8, 2 }
 0x120   :  { %753 = vrot.lane.b32.xlu1 %v745_v45, %s3828_s13  ;;  %755 = vrot.lane.b32.xlu0 %v744_v38, %s3828_s13  ;;  %v952_v38 = vrot.slane %v938_v26, 2 }
 0x122   :  { %v4103_v50 = vpop.permute.xlu1 %222  ;;  %v4105_v51 = vpop.permute.xlu0 %250  ;;  %v955_v48 = vsel %vm837_vm4, %v952_v38, %v954_v39 }
 0x124   :  { %757 = vrot.lane.b32.xlu1 %v748_v52, %s3828_s13  ;;  %759 = vrot.lane.b32.xlu0 %v750_v53, %s3828_s13  ;;  %v994_v52 = vrot.slane %v982_v43, 2  ;;  %v1047_v43 = vrot.slane %v1033_v27, 2 }
 0x126   :  { %v4112_v57 = vpop.permute.xlu1 %252  ;;  %v4114_v58 = vpop.permute.xlu0 %254  ;;  %v996_v56 = vsel %vm837_vm4, %v994_v52, %v995_v49  ;;  %v1079_v52 = vmul.f32 %v1077_v46, %v3930_v22 }
 0x128   :  { %761 = vrot.lane.b32.xlu1 %v749_v47, %s3828_s13  ;;  %799 = vrot.lane.b32.xlu0 %v791_v60, %s3828_s13  ;;  %v953_v47 = vsel %vm837_vm4, %v951_v32, %v952_v38  ;;  %v986_v60 = vmul.f32 %v981_v35, %v3944_v31  ;;  %v1035_v38 = vmul.f32 %v1029_v3, %v3950_v36 }
 0x12a   :  { %v4122_v0 = vpop.permute.xlu1 %256  ;;  %v4124_v1 = vpop.permute.xlu0 %258  ;;  %v1000_v6 = vrot.slane %v986_v60, 2  ;;  %v1050_v49 = vrot.slane %v1035_v38, 2  ;;  %v1080_v60 = vmul.f32 %v1077_v46, %v3932_v25 }
 0x12b   :  { %7332 = vst [vmem:[#allocation13_spill] sm:$0xff] %v4122_v0  ;;  %7333 = vst [vmem:[#allocation14_spill] sm:$0xff] %v4124_v1 }
 0x12c   :  { %801 = vrot.lane.b32.xlu1 %v793_v5, %s3828_s13  ;;  %803 = vrot.lane.b32.xlu0 %v792_v61, %s3828_s13  ;;  %v987_v61 = vmul.f32 %v981_v35, %v3950_v36  ;;  %v999_v5 = vrot.slane %v985_v59, 2  ;;  %v1045_v35 = vrot.slane %v1032_v20, 2  ;;  %v1093_v8 = vrot.slane %v1080_v60, 2 }
 0x12d   :  { %v1125_v20 = vstv %s3659_s25  ;;  %s3652_s25 = sld [smem:[#allocation8 + $0x6]] }
 0x12e   :  { %v4131_v10 = vpop.permute.xlu1 %260  ;;  %v4133_v11 = vpop.permute.xlu0 %288  ;;  %v1001_v14 = vsel %vm837_vm4, %v999_v5, %v1000_v6  ;;  %v1128_v60 = vmul.f32 %v1125_v20, %v3932_v25 }
 0x12f   :  { %7334 = vst [vmem:[#allocation15_spill] sm:$0xff] %v4131_v10  ;;  %7335 = vst [vmem:[#allocation16_spill] sm:$0xff] %v4133_v11  ;;  %v4967_v11 = vld [vmem:[#allocation2 + $0x88] sm:$0x3f] }
 0x130   :  { %805 = vrot.lane.b32.xlu1 %v796_v12, %s3828_s13  ;;  %807 = vrot.lane.b32.xlu0 %v798_v13, %s3828_s13 }
 0x132   :  { %v4140_v17 = vpop.permute.xlu1 %290  ;;  %v4142_v19 = vpop.permute.xlu0 %292 }
 0x133   :  { %7336 = vst [vmem:[#allocation17_spill] sm:$0xff] %v4140_v17  ;;  %7337 = vst [vmem:[#allocation18_spill] sm:$0xff] %v4142_v19 }
 0x134   :  { %809 = vrot.lane.b32.xlu1 %v797_v7, %s3828_s13  ;;  %956 = vrot.lane.b32.xlu0 %v948_v21, %s3827_s8  ;;  %v1002_v7 = vrot.slane %v987_v61, 2  ;;  %v1042_v21 = vrot.slane %v1030_v9, 2 }
 0x136   :  { %v4150_v28 = vpop.permute.xlu1 %294  ;;  %v4152_v29 = vpop.permute.xlu0 %296  ;;  %v1003_v15 = vsel %vm837_vm4, %v1000_v6, %v1002_v7  ;;  %v1044_v32 = vsel %vm837_vm4, %v1042_v21, %v1043_v16 }
 0x137   :  { %7338 = vst [vmem:[#allocation19_spill] sm:$0xff] %v4150_v28  ;;  %7339 = vst [vmem:[#allocation20_spill] sm:$0xff] %v4152_v29  ;;  %v4934_v29 = vld [vmem:[#allocation2 + $0x80] sm:$0xff] }
 0x138   :  { %958 = vrot.lane.b32.xlu1 %v950_v37, %s3827_s8  ;;  %960 = vrot.lane.b32.xlu0 %v949_v24, %s3827_s8  ;;  %v1034_v37 = vmul.f32 %v1029_v3, %v3944_v31  ;;  %v1091_v3 = vrot.slane %v1079_v52, 2 }
 0x13a   :  { %v4159_v44 = vpop.permute.xlu1 %298  ;;  %v4161_v45 = vpop.permute.xlu0 %326 }
 0x13b   :  { %7340 = vst [vmem:[#allocation21_spill] sm:$0xff] %v4159_v44  ;;  %7341 = vst [vmem:[#allocation22_spill] sm:$0xff] %v4161_v45 }
 0x13c   :  { %962 = vrot.lane.b32.xlu1 %v953_v47, %s3827_s8  ;;  %964 = vrot.lane.b32.xlu0 %v955_v48, %s3827_s8  ;;  %v1046_v47 = vsel %vm837_vm4, %v1043_v16, %v1045_v35  ;;  %v1048_v48 = vrot.slane %v1034_v37, 2  ;;  %v1083_v16 = vmul.f32 %v1077_v46, %v3950_v36 }
 0x13e   :  { %v4168_v53 = vpop.permute.xlu1 %328  ;;  %v4170_v54 = vpop.permute.xlu0 %330  ;;  %v1049_v61 = vsel %vm837_vm4, %v1047_v43, %v1048_v48  ;;  %v1098_v43 = vrot.slane %v1083_v16, 2  ;;  %v1173_v16 = vstv %s3660_s26  ;;  %s3653_s26 = sld [smem:[#allocation8 + $0x21]] }
 0x13f   :  { %7342 = vst [vmem:[#allocation23_spill] sm:$0xff] %v4168_v53  ;;  %7343 = vst [vmem:[#allocation24_spill] sm:$0xff] %v4170_v54 }
 0x140   :  { %966 = vrot.lane.b32.xlu1 %v954_v39, %s3827_s8  ;;  %1004 = vrot.lane.b32.xlu0 %v996_v56, %s3827_s8 }
 0x142   :  { %v4178_v62 = vpop.permute.xlu1 %332  ;;  %v4180_v63 = vpop.permute.xlu0 %334 }
 0x143   :  { %7344 = vst [vmem:[#allocation25_spill] sm:$0xff] %v4178_v62  ;;  %7345 = vst [vmem:[#allocation26_spill] sm:$0xff] %v4180_v63 }
 0x144   :  { %1006 = vrot.lane.b32.xlu1 %v998_v2, %s3827_s8  ;;  %1008 = vrot.lane.b32.xlu0 %v997_v55, %s3827_s8  ;;  %v1078_v55 = vmul.f32 %v1077_v46, %v3924_v18  ;;  %v1051_v2 = vsel %vm837_vm4, %v1048_v48, %v1050_v49 }
 0x146   :  { %v4187_v12 = vpop.permute.xlu1 %336  ;;  %v4189_v13 = vpop.permute.xlu0 %364  ;;  %v1090_v5 = vrot.slane %v1078_v55, 2 }
 0x147   :  { %7346 = vst [vmem:[#allocation27_spill] sm:$0xff] %v4187_v12  ;;  %7347 = vst [vmem:[#allocation28_spill] sm:$0xff] %v4189_v13 }
 0x148   :  { %1010 = vrot.lane.b32.xlu1 %v1001_v14, %s3827_s8  ;;  %1012 = vrot.lane.b32.xlu0 %v1003_v15, %s3827_s8  ;;  %v1092_v9 = vsel %vm837_vm4, %v1090_v5, %v1091_v3  ;;  %v1081_v14 = vmul.f32 %v1077_v46, %v3942_v30  ;;  %v1082_v15 = vmul.f32 %v1077_v46, %v3944_v31 }
 0x149   :  { %v1126_v46 = vmul.f32 %v1125_v20, %v3924_v18 }
 0x14a   :  { %v4196_v24 = vpop.permute.xlu1 %366  ;;  %v4198_v26 = vpop.permute.xlu0 %368  ;;  %v1095_v37 = vrot.slane %v1081_v14, 2  ;;  %v1096_v38 = vrot.slane %v1082_v15, 2  ;;  %v1130_v14 = vmul.f32 %v1125_v20, %v3944_v31  ;;  %v1131_v15 = vmul.f32 %v1125_v20, %v3950_v36 }
 0x14b   :  { %7348 = vst [vmem:[#allocation29_spill] sm:$0xff] %v4196_v24  ;;  %7349 = vst [vmem:[#allocation30_spill] sm:$0xff] %v4198_v26 }
 0x14c   :  { %1014 = vrot.lane.b32.xlu1 %v1002_v7, %s3827_s8  ;;  %1052 = vrot.lane.b32.xlu0 %v1044_v32, %s3827_s8  ;;  %v1127_v32 = vmul.f32 %v1125_v20, %v3930_v22  ;;  %v1097_v52 = vsel %vm837_vm4, %v1095_v37, %v1096_v38  ;;  %v1099_v55 = vsel %vm837_vm4, %v1096_v38, %v1098_v43 }
 0x14d   :  { %v1175_v37 = vmul.f32 %v1173_v16, %v3930_v22 }
 0x14e   :  { %v4206_v39 = vpop.permute.xlu1 %370  ;;  %v4208_v40 = vpop.permute.xlu0 %372 }
 0x14f   :  { %7350 = vst [vmem:[#allocation31_spill] sm:$0xff] %v4206_v39  ;;  %7351 = vst [vmem:[#allocation32_spill] sm:$0xff] %v4208_v40 }
 0x150   :  { %1054 = vrot.lane.b32.xlu1 %v1046_v47, %s3827_s8  ;;  %1056 = vrot.lane.b32.xlu0 %v1045_v35, %s3827_s8  ;;  %v1094_v35 = vsel %vm837_vm4, %v1091_v3, %v1093_v8 }
 0x152   :  { %v4215_v56 = vpop.permute.xlu1 %374  ;;  %v4217_v59 = vpop.permute.xlu0 %402 }
 0x153   :  { %7352 = vst [vmem:[#allocation33_spill] sm:$0xff] %v4215_v56  ;;  %7353 = vst [vmem:[#allocation34_spill] sm:$0xff] %v4217_v59  ;;  %v4874_v59 = vld [vmem:[#allocation2 + $0x78] sm:$0xff] }
 0x154   :  { %1058 = vrot.lane.b32.xlu1 %v1049_v61, %s3827_s8  ;;  %1060 = vrot.lane.b32.xlu0 %v1051_v2, %s3827_s8  ;;  %v1138_v61 = vrot.slane %v1126_v46, 2 }
 0x156   :  { %v4224_v6 = vpop.permute.xlu1 %404  ;;  %v4226_v7 = vpop.permute.xlu0 %406 }
 0x157   :  { %7354 = vst [vmem:[#allocation35_spill] sm:$0xff] %v4224_v6  ;;  %7355 = vst [vmem:[#allocation36_spill] sm:$0xff] %v4226_v7  ;;  %v4872_v7 = vld [vmem:[#allocation2 + $0x38] sm:$0xff] }
 0x158   :  { %1062 = vrot.lane.b32.xlu1 %v1050_v49, %s3827_s8  ;;  %1100 = vrot.lane.b32.xlu0 %v1092_v9, %s3828_s13  ;;  %v1139_v49 = vrot.slane %v1127_v32, 2  ;;  %v1129_v9 = vmul.f32 %v1125_v20, %v3942_v30  ;;  %v1174_v20 = vmul.f32 %v1173_v16, %v3924_v18 }
 0x15a   :  { %v4234_v21 = vpop.permute.xlu1 %408  ;;  %v4236_v27 = vpop.permute.xlu0 %410  ;;  %v1140_v5 = vsel %vm837_vm4, %v1138_v61, %v1139_v49  ;;  %v1143_v46 = vrot.slane %v1129_v9, 2  ;;  %v1187_v61 = vrot.slane %v1175_v37, 2  ;;  %v1186_v9 = vrot.slane %v1174_v20, 2 }
 0x15b   :  { %7356 = vst [vmem:[#allocation37_spill] sm:$0xff] %v4234_v21  ;;  %7357 = vst [vmem:[#allocation38_spill] sm:$0xff] %v4236_v27  ;;  %v1177_v37 = vmul.f32 %v1173_v16, %v3942_v30 }
 0x15c   :  { %1102 = vrot.lane.b32.xlu1 %v1094_v35, %s3828_s13  ;;  %1104 = vrot.lane.b32.xlu0 %v1093_v8, %s3828_s13  ;;  %v1141_v8 = vrot.slane %v1128_v60, 2  ;;  %v1188_v18 = vsel %vm837_vm4, %v1186_v9, %v1187_v61  ;;  %v1263_v9 = vstv %s3664_s27  ;;  %s3691_s27 = sld [smem:[#allocation8 + $0x13]] }
 0x15e   :  { %v4243_v47 = vpop.permute.xlu1 %412  ;;  %v4245_v48 = vpop.permute.xlu0 %563  ;;  %v1142_v38 = vsel %vm837_vm4, %v1139_v49, %v1141_v8  ;;  %v1176_v49 = vmul.f32 %v1173_v16, %v3932_v25 }
 0x15f   :  { %7358 = vst [vmem:[#allocation39_spill] sm:$0xff] %v4243_v47  ;;  %7359 = vst [vmem:[#allocation40_spill] sm:$0xff] %v4245_v48 }
 0x160   :  { %1106 = vrot.lane.b32.xlu1 %v1097_v52, %s3828_s13  ;;  %1108 = vrot.lane.b32.xlu0 %v1099_v55, %s3828_s13  ;;  %v1144_v52 = vrot.slane %v1130_v14, 2  ;;  %v1146_v55 = vrot.slane %v1131_v15, 2  ;;  %v1189_v15 = vrot.slane %v1176_v49, 2 }
 0x162   :  { %v4252_v2 = vpop.permute.xlu1 %569  ;;  %v4254_v3 = vpop.permute.xlu0 %611  ;;  %v1147_v22 = vsel %vm837_vm4, %v1144_v52, %v1146_v55  ;;  %v1190_v20 = vsel %vm837_vm4, %v1187_v61, %v1189_v15 }
 0x163   :  { %7360 = vst [vmem:[#allocation41_spill] sm:$0xff] %v4252_v2  ;;  %7361 = vst [vmem:[#allocation42_spill] sm:$0xff] %v4254_v3 }
 0x164   :  { %1110 = vrot.lane.b32.xlu1 %v1098_v43, %s3828_s13  ;;  %1148 = vrot.lane.b32.xlu0 %v1140_v5, %s3828_s13  ;;  %v1145_v5 = vsel %vm837_vm4, %v1143_v46, %v1144_v52  ;;  %v1179_v46 = vmul.f32 %v1173_v16, %v3950_v36  ;;  %v4301_v36 = vld [vmem:[#allocation2 + $0x18] sm:$0xff] }
 0x166   :  { %v4262_v32 = vpop.permute.xlu1 %617  ;;  %v4264_v35 = vpop.permute.xlu0 %659  ;;  %v1194_v49 = vrot.slane %v1179_v46, 2 }
 0x167   :  { %7362 = vst [vmem:[#allocation43_spill] sm:$0xff] %v4262_v32  ;;  %7363 = vst [vmem:[#allocation44_spill] sm:$0xff] %v4264_v35 }
 0x168   :  { %1150 = vrot.lane.b32.xlu1 %v1142_v38, %s3828_s13  ;;  %1152 = vrot.lane.b32.xlu0 %v1141_v8, %s3828_s13  ;;  %v1178_v38 = vmul.f32 %v1173_v16, %v3944_v31 }
 0x16a   :  { %v4271_v43 = vpop.permute.xlu1 %665  ;;  %v4273_v60 = vpop.permute.xlu0 %559 }
 0x16b   :  { %7364 = vst [vmem:[#allocation45_spill] sm:$0xff] %v4271_v43  ;;  %7365 = vst [vmem:[#allocation46_spill] sm:$0xff] %v4273_v60  ;;  %v1647_v60 = vstv %s3674_s7  ;;  %s5114_s7 = sld [smem:[#allocation8 + $0x3f]] }
 0x16c   :  { %1154 = vrot.lane.b32.xlu1 %v1145_v5, %s3828_s13  ;;  %1156 = vrot.lane.b32.xlu0 %v1147_v22, %s3828_s13  ;;  %v1191_v5 = vrot.slane %v1177_v37, 2  ;;  %v1192_v22 = vrot.slane %v1178_v38, 2  ;;  %v4312_v37 = vld [vmem:[#allocation2 + $0x20] sm:$0xff]  ;;  %v4316_v38 = vld [vmem:[#allocation2 + $0x28] sm:$0x3f] }
 0x16e   :  { %v4280_v14 = vpop.permute.xlu1 %561  ;;  %v4282_v8 = vpop.permute.xlu0 %567  ;;  %v1193_v16 = vsel %vm837_vm4, %v1191_v5, %v1192_v22  ;;  %v1265_v5 = vmul.f32 %v1263_v9, %v4312_v37 }
 0x16f   :  { %7366 = vst [vmem:[#allocation47_spill] sm:$0xff] %v4280_v14  ;;  %7367 = vst [vmem:[#allocation48_spill] sm:$0xff] %v4282_v8 }
 0x170   :  { %1158 = vrot.lane.b32.xlu1 %v1146_v55, %s3828_s13  ;;  %1196 = vrot.lane.b32.xlu0 %v1188_v18, %s3828_s13  ;;  %v1195_v55 = vsel %vm837_vm4, %v1192_v22, %v1194_v49  ;;  %v1266_v22 = vmul.f32 %v1263_v9, %v4316_v38 }
 0x172   :  { %v4290_v25 = vpop.permute.xlu1 %565  ;;  %v4292_v52 = vpop.permute.xlu0 %607 }
 0x173   :  { %7368 = vst [vmem:[#allocation49_spill] sm:$0xff] %v4290_v25  ;;  %7369 = vst [vmem:[#allocation50_spill] sm:$0xff] %v4292_v52 }
 0x174   :  { %1198 = vrot.lane.b32.xlu1 %v1190_v20, %s3828_s13  ;;  %1200 = vrot.lane.b32.xlu0 %v1189_v15, %s3828_s13  ;;  %v1264_v15 = vmul.f32 %v1263_v9, %v4301_v36 }
 0x176   :  { %v4297_v30 = vpop.permute.xlu1 %609  ;;  %v4299_v31 = vpop.permute.xlu0 %615 }
 0x177   :  { %7370 = vst [vmem:[#allocation51_spill] sm:$0xff] %v4297_v30  ;;  %7371 = vst [vmem:[#allocation52_spill] sm:$0xff] %v4299_v31  ;;  %v1377_v30 = vstv %s3667_s29  ;;  %s4890_s29 = sld [smem:[#allocation8 + $0x2e]] }
 0x178   :  { %1202 = vrot.lane.b32.xlu1 %v1193_v16, %s3828_s13  ;;  %1204 = vrot.lane.b32.xlu0 %v1195_v55, %s3828_s13  ;;  %v4324_v16 = vld [vmem:[#allocation2 + $0x60] sm:$0xff]  ;;  %v4326_v55 = vld [vmem:[#allocation2 + $0x68] sm:$0xff] }
 0x179   :  { %v1267_v4 = vmul.f32 %v1263_v9, %v4324_v16 }
 0x17a   :  { %v4307_v61 = vpop.permute.xlu1 %613  ;;  %v4309_v18 = vpop.permute.xlu0 %655 }
 0x17b   :  { %7372 = vst [vmem:[#allocation53_spill] sm:$0xff] %v4307_v61  ;;  %7373 = vst [vmem:[#allocation54_spill] sm:$0xff] %v4309_v18  ;;  %v1301_v18 = vstv %s3665_s1  ;;  %s4780_s1 = sld [smem:[#allocation8 + $0x3c]] }
 0x17c   :  { %1206 = vrot.lane.b32.xlu1 %v1194_v49, %s3828_s13  ;;  %1276 = vrot.lane.b32.xlu0 %v1264_v15, %s3827_s8 }
 0x17e   :  { %v4318_v46 = vpop.permute.xlu1 %657  ;;  %v4320_v20 = vpop.permute.xlu0 %663 }
 0x17f   :  { %7374 = vst [vmem:[#allocation55_spill] sm:$0xff] %v4318_v46  ;;  %7375 = vst [vmem:[#allocation56_spill] sm:$0xff] %v4320_v20  ;;  %v1268_v20 = vmul.f32 %v1263_v9, %v4326_v55  ;;  %v4336_v46 = vld [vmem:[#allocation2 + $0x70] sm:$0x3f] }
 0x180   :  { %1278 = vrot.lane.b32.xlu1 %v1265_v5, %s3827_s8  ;;  %1280 = vrot.lane.b32.xlu0 %v1266_v22, %s3827_s8  ;;  %v1269_v22 = vmul.f32 %v1263_v9, %v4336_v46 }
 0x182   :  { %v4330_v49 = vpop.permute.xlu1 %661  ;;  %v4332_v15 = vpop.permute.xlu0 %703 }
 0x183   :  { %7376 = vst [vmem:[#allocation57_spill] sm:$0xff] %v4330_v49  ;;  %7377 = vst [vmem:[#allocation58_spill] sm:$0xff] %v4332_v15  ;;  %v1302_v49 = vmul.f32 %v1301_v18, %v4301_v36 }
 0x184   :  { %1282 = vrot.lane.b32.xlu1 %v1267_v4, %s3827_s8  ;;  %1284 = vrot.lane.b32.xlu0 %v1268_v20, %s3827_s8  ;;  %v1303_v4 = vmul.f32 %v1301_v18, %v4312_v37  ;;  %v1304_v20 = vmul.f32 %v1301_v18, %v4316_v38 }
 0x186   :  { %v4340_v61 = vpop.permute.xlu1 %705  ;;  %v4342_v5 = vpop.permute.xlu0 %707 }
 0x187   :  { %7378 = vst [vmem:[#allocation59_spill] sm:$0xff] %v4340_v61  ;;  %7379 = vst [vmem:[#allocation60_spill] sm:$0xff] %v4342_v5  ;;  %v1339_v61 = vstv %s3666_s28  ;;  %s4790_s28 = sld [smem:[#allocation8 + $0x9]] }
 0x188   :  { %1286 = vrot.lane.b32.xlu1 %v1269_v22, %s3827_s8  ;;  %1314 = vrot.lane.b32.xlu0 %v1302_v49, %s3827_s8  ;;  %v1305_v22 = vmul.f32 %v1301_v18, %v4324_v16  ;;  %v1306_v49 = vmul.f32 %v1301_v18, %v4326_v55 }
 0x18a   :  { %v4348_v15 = vpop.permute.xlu1 %709  ;;  %v4350_v31 = vpop.permute.xlu0 %711 }
 0x18b   :  { %7380 = vst [vmem:[#allocation61_spill] sm:$0xff] %v4348_v15  ;;  %7381 = vst [vmem:[#allocation62_spill] sm:$0xff] %v4350_v31 }
 0x18c   :  { %1316 = vrot.lane.b32.xlu1 %v1303_v4, %s3827_s8  ;;  %1318 = vrot.lane.b32.xlu0 %v1304_v20, %s3827_s8  ;;  %v1307_v4 = vmul.f32 %v1301_v18, %v4336_v46  ;;  %v1340_v20 = vmul.f32 %v1339_v61, %v4301_v36 }
 0x18d   :  { %v4904_v24 = vstv %s4790_s28  ;;  %s6149_s28 = sld [smem:[#allocation8 + $0x1a]] }
 0x18e   :  { %v4356_v9 = vpop.permute.xlu1 %713  ;;  %v4358_v5 = vpop.permute.xlu0 %751 }
 0x18f   :  { %7382 = vst [vmem:[#allocation63_spill] sm:$0xff] %v4356_v9  ;;  %7383 = vst [vmem:[#allocation64_spill] sm:$0xff] %v4358_v5 }
 0x190   :  { %1320 = vrot.lane.b32.xlu1 %v1305_v22, %s3827_s8  ;;  %1322 = vrot.lane.b32.xlu0 %v1306_v49, %s3827_s8  ;;  %v1341_v22 = vmul.f32 %v1339_v61, %v4312_v37  ;;  %v1343_v49 = vmul.f32 %v1339_v61, %v4324_v16 }
 0x192   :  { %v4364_v31 = vpop.permute.xlu1 %753  ;;  %v4366_v15 = vpop.permute.xlu0 %755 }
 0x193   :  { %7384 = vst [vmem:[#allocation65_spill] sm:$0xff] %v4364_v31  ;;  %7385 = vst [vmem:[#allocation66_spill] sm:$0xff] %v4366_v15  ;;  %v1415_v31 = vstv %s3668_s30  ;;  %s4980_s30 = sld [smem:[#allocation8 + $0x24]] }
 0x194   :  { %1324 = vrot.lane.b32.xlu1 %v1307_v4, %s3827_s8  ;;  %1352 = vrot.lane.b32.xlu0 %v1340_v20, %s3827_s8  ;;  %v1344_v4 = vmul.f32 %v1339_v61, %v4326_v55  ;;  %v1378_v20 = vmul.f32 %v1377_v30, %v4301_v36 }
 0x196   :  { %v4372_v5 = vpop.permute.xlu1 %757  ;;  %v4374_v9 = vpop.permute.xlu0 %759 }
 0x197   :  { %7386 = vst [vmem:[#allocation67_spill] sm:$0xff] %v4372_v5  ;;  %7387 = vst [vmem:[#allocation68_spill] sm:$0xff] %v4374_v9 }
 0x198   :  { %1354 = vrot.lane.b32.xlu1 %v1341_v22, %s3827_s8  ;;  %1358 = vrot.lane.b32.xlu0 %v1343_v49, %s3827_s8  ;;  %v1379_v22 = vmul.f32 %v1377_v30, %v4312_v37  ;;  %v1381_v49 = vmul.f32 %v1377_v30, %v4324_v16 }
 0x19a   :  { %v4380_v18 = vpop.permute.xlu1 %761  ;;  %v4382_v15 = vpop.permute.xlu0 %799 }
 0x19b   :  { %7388 = vst [vmem:[#allocation69_spill] sm:$0xff] %v4380_v18  ;;  %7389 = vst [vmem:[#allocation70_spill] sm:$0xff] %v4382_v15 }
 0x19c   :  { %1360 = vrot.lane.b32.xlu1 %v1344_v4, %s3827_s8  ;;  %1390 = vrot.lane.b32.xlu0 %v1378_v20, %s3828_s13  ;;  %v1382_v4 = vmul.f32 %v1377_v30, %v4326_v55  ;;  %v1342_v20 = vmul.f32 %v1339_v61, %v4316_v38 }
 0x19e   :  { %v4388_v9 = vpop.permute.xlu1 %801  ;;  %v4390_v5 = vpop.permute.xlu0 %803 }
 0x19f   :  { %7390 = vst [vmem:[#allocation71_spill] sm:$0xff] %v4388_v9  ;;  %7391 = vst [vmem:[#allocation72_spill] sm:$0xff] %v4390_v5 }
 0x1a0   :  { %1392 = vrot.lane.b32.xlu1 %v1379_v22, %s3828_s13  ;;  %1396 = vrot.lane.b32.xlu0 %v1381_v49, %s3828_s13  ;;  %v1345_v22 = vmul.f32 %v1339_v61, %v4336_v46  ;;  %v1380_v49 = vmul.f32 %v1377_v30, %v4316_v38 }
 0x1a2   :  { %v4396_v15 = vpop.permute.xlu1 %805  ;;  %v4398_v18 = vpop.permute.xlu0 %807 }
 0x1a3   :  { %7392 = vst [vmem:[#allocation73_spill] sm:$0xff] %v4396_v15  ;;  %7393 = vst [vmem:[#allocation74_spill] sm:$0xff] %v4398_v18 }
 0x1a4   :  { %1398 = vrot.lane.b32.xlu1 %v1382_v4, %s3828_s13  ;;  %1356 = vrot.lane.b32.xlu0 %v1342_v20, %s3827_s8  ;;  %v1383_v4 = vmul.f32 %v1377_v30, %v4336_v46  ;;  %v1416_v20 = vmul.f32 %v1415_v31, %v4301_v36 }
 0x1a6   :  { %v4404_v5 = vpop.permute.xlu1 %809  ;;  %v4406_v9 = vpop.permute.xlu0 %956 }
 0x1a7   :  { %7394 = vst [vmem:[#allocation75_spill] sm:$0xff] %v4404_v5  ;;  %7395 = vst [vmem:[#allocation76_spill] sm:$0xff] %v4406_v9 }
 0x1a8   :  { %1362 = vrot.lane.b32.xlu1 %v1345_v22, %s3827_s8  ;;  %1394 = vrot.lane.b32.xlu0 %v1380_v49, %s3828_s13  ;;  %v1417_v22 = vmul.f32 %v1415_v31, %v4312_v37  ;;  %v1419_v49 = vmul.f32 %v1415_v31, %v4324_v16 }
 0x1aa   :  { %v4412_v18 = vpop.permute.xlu1 %958  ;;  %v4414_v15 = vpop.permute.xlu0 %960 }
 0x1ab   :  { %7396 = vst [vmem:[#allocation77_spill] sm:$0xff] %v4412_v18  ;;  %7397 = vst [vmem:[#allocation78_spill] sm:$0xff] %v4414_v15 }
 0x1ac   :  { %1400 = vrot.lane.b32.xlu1 %v1383_v4, %s3828_s13  ;;  %1428 = vrot.lane.b32.xlu0 %v1416_v20, %s3828_s13  ;;  %v1420_v4 = vmul.f32 %v1415_v31, %v4326_v55  ;;  %v1418_v20 = vmul.f32 %v1415_v31, %v4316_v38 }
 0x1ae   :  { %v4420_v61 = vpop.permute.xlu1 %962  ;;  %v4422_v9 = vpop.permute.xlu0 %964 }
 0x1af   :  { %7398 = vst [vmem:[#allocation79_spill] sm:$0xff] %v4420_v61  ;;  %7399 = vst [vmem:[#allocation80_spill] sm:$0xff] %v4422_v9  ;;  %v1453_v61 = vstv %s3669_s5  ;;  %s5011_s5 = sld [smem:[#allocation8 + $0x49]] }
 0x1b0   :  { %1430 = vrot.lane.b32.xlu1 %v1417_v22, %s3828_s13  ;;  %1434 = vrot.lane.b32.xlu0 %v1419_v49, %s3828_s13  ;;  %v1421_v22 = vmul.f32 %v1415_v31, %v4336_v46  ;;  %v1454_v49 = vmul.f32 %v1453_v61, %v4301_v36 }
 0x1b2   :  { %v4428_v30 = vpop.permute.xlu1 %966  ;;  %v4430_v15 = vpop.permute.xlu0 %1004 }
 0x1b3   :  { %7400 = vst [vmem:[#allocation81_spill] sm:$0xff] %v4428_v30  ;;  %7401 = vst [vmem:[#allocation82_spill] sm:$0xff] %v4430_v15  ;;  %v1599_v15 = vstv %s3673_s6  ;;  %s5102_s6 = sld [smem:[#allocation8 + $0x14]] }
 0x1b4   :  { %1436 = vrot.lane.b32.xlu1 %v1420_v4, %s3828_s13  ;;  %1432 = vrot.lane.b32.xlu0 %v1418_v20, %s3828_s13  ;;  %v1455_v4 = vmul.f32 %v1453_v61, %v4312_v37  ;;  %v1457_v20 = vmul.f32 %v1453_v61, %v4324_v16  ;;  %v1601_v31 = vmul.f32 %v1599_v15, %v4312_v37 }
 0x1b5   :  { %v1603_v8 = vmul.f32 %v1599_v15, %v4324_v16  ;;  %v1604_v14 = vmul.f32 %v1599_v15, %v4326_v55  ;;  %v1605_v35 = vmul.f32 %v1599_v15, %v4336_v46 }
 0x1b6   :  { %v4436_v9 = vpop.permute.xlu1 %1006  ;;  %v4438_v18 = vpop.permute.xlu0 %1008  ;;  %v1613_v25 = vrot.slane %v1601_v31, 1 }
 0x1b7   :  { %7402 = vst [vmem:[#allocation83_spill] sm:$0xff] %v4436_v9  ;;  %7403 = vst [vmem:[#allocation84_spill] sm:$0xff] %v4438_v18  ;;  %v1600_v18 = vmul.f32 %v1599_v15, %v4301_v36  ;;  %v1602_v9 = vmul.f32 %v1599_v15, %v4316_v38  ;;  %v1618_v31 = vrot.slane %v1604_v14, 1  ;;  %v1649_v14 = vmul.f32 %v1647_v60, %v4312_v37 }
 0x1b8   :  { %1438 = vrot.lane.b32.xlu1 %v1421_v22, %s3828_s13  ;;  %1466 = vrot.lane.b32.xlu0 %v1454_v49, %s3828_s13 }
 0x1b9   :  { %v1612_v52 = vrot.slane %v1600_v18, 1  ;;  %v1617_v18 = vrot.slane %v1603_v8, 1 }
 0x1ba   :  { %v4444_v30 = vpop.permute.xlu1 %1010  ;;  %v4446_v5 = vpop.permute.xlu0 %1012 }
 0x1bb   :  { %7404 = vst [vmem:[#allocation85_spill] sm:$0xff] %v4444_v30  ;;  %7405 = vst [vmem:[#allocation86_spill] sm:$0xff] %v4446_v5  ;;  %v1458_v30 = vmul.f32 %v1453_v61, %v4326_v55  ;;  %v1456_v5 = vmul.f32 %v1453_v61, %v4316_v38  ;;  %v1614_v43 = vsel %vm440_vm3, %v1612_v52, %v1613_v25  ;;  %v1620_v52 = vrot.slane %v1605_v35, 1 }
 0x1bc   :  { %1468 = vrot.lane.b32.xlu1 %v1455_v4, %s3828_s13  ;;  %1472 = vrot.lane.b32.xlu0 %v1457_v20, %s3828_s13  ;;  %v1652_v35 = vmul.f32 %v1647_v60, %v4326_v55 }
 0x1be   :  { %v4454_v22 = vpop.permute.xlu1 %1014  ;;  %v4456_v49 = vpop.permute.xlu0 %1052 }
 0x1bf   :  { %7406 = vst [vmem:[#allocation87_spill] sm:$0xff] %v4454_v22  ;;  %7407 = vst [vmem:[#allocation88_spill] sm:$0xff] %v4456_v49  ;;  %v1459_v49 = vmul.f32 %v1453_v61, %v4336_v46  ;;  %v1615_v22 = vrot.slane %v1602_v9, 1  ;;  %v1619_v61 = vsel %vm440_vm3, %v1617_v18, %v1618_v31 }
 0x1c0   :  { %1474 = vrot.lane.b32.xlu1 %v1458_v30, %s3828_s13  ;;  %1470 = vrot.lane.b32.xlu0 %v1456_v5, %s3828_s13 }
 0x1c1   :  { %v1616_v9 = vsel %vm440_vm3, %v1613_v25, %v1615_v22  ;;  %v1651_v25 = vmul.f32 %v1647_v60, %v4324_v16 }
 0x1c2   :  { %v4465_v4 = vpop.permute.xlu1 %1054  ;;  %v4467_v20 = vpop.permute.xlu0 %1056 }
 0x1c3   :  { %7408 = vst [vmem:[#allocation89_spill] sm:$0xff] %v4465_v4  ;;  %7409 = vst [vmem:[#allocation90_spill] sm:$0xff] %v4467_v20  ;;  %v1648_v20 = vmul.f32 %v1647_v60, %v4301_v36  ;;  %v1666_v4 = vrot.slane %v1652_v35, 1  ;;  %v1743_v35 = vstv %s3676_s9  ;;  %s5228_s9 = sld [smem:[#allocation8 + $0x27]] }
 0x1c4   :  { %1476 = vrot.lane.b32.xlu1 %v1459_v49, %s3828_s13  ;;  %1622 = vrot.lane.b32.xlu0 %v1614_v43, %s3827_s8  ;;  %v1650_v49 = vmul.f32 %v1647_v60, %v4316_v38  ;;  %v1745_v32 = vmul.f32 %v1743_v35, %v4312_v37  ;;  %v1748_v3 = vmul.f32 %v1743_v35, %v4326_v55 }
 0x1c5   :  { %v1660_v15 = vrot.slane %v1648_v20, 1  ;;  %v1695_v20 = vstv %s3675_s0  ;;  %s5148_s0 = sld [smem:[#allocation8 + $0xc]] }
 0x1c6   :  { %v4474_v30 = vpop.permute.xlu1 %1058  ;;  %v4476_v5 = vpop.permute.xlu0 %1060 }
 0x1c7   :  { %7410 = vst [vmem:[#allocation91_spill] sm:$0xff] %v4474_v30  ;;  %7411 = vst [vmem:[#allocation92_spill] sm:$0xff] %v4476_v5  ;;  %v1621_v5 = vsel %vm440_vm3, %v1618_v31, %v1620_v52  ;;  %v1661_v30 = vrot.slane %v1649_v14, 1  ;;  %v1663_v31 = vrot.slane %v1650_v49, 1  ;;  %v1665_v14 = vrot.slane %v1651_v25, 1 }
 0x1c8   :  { %1624 = vrot.lane.b32.xlu1 %v1616_v9, %s3827_s8  ;;  %1628 = vrot.lane.b32.xlu0 %v1619_v61, %s3827_s8  ;;  %v1653_v61 = vmul.f32 %v1647_v60, %v4336_v46  ;;  %v1698_v25 = vmul.f32 %v1695_v20, %v4316_v38 }
 0x1c9   :  { %v1667_v60 = vsel %vm440_vm3, %v1665_v14, %v1666_v4  ;;  %v1699_v14 = vmul.f32 %v1695_v20, %v4324_v16 }
 0x1ca   :  { %v4484_v8 = vpop.permute.xlu1 %1062  ;;  %v4486_v43 = vpop.permute.xlu0 %1100 }
 0x1cb   :  { %7412 = vst [vmem:[#allocation93_spill] sm:$0xff] %v4484_v8  ;;  %7413 = vst [vmem:[#allocation94_spill] sm:$0xff] %v4486_v43  ;;  %v1662_v8 = vsel %vm440_vm3, %v1660_v15, %v1661_v30  ;;  %v1668_v43 = vrot.slane %v1653_v61, 1  ;;  %v1697_v15 = vmul.f32 %v1695_v20, %v4312_v37  ;;  %v1700_v61 = vmul.f32 %v1695_v20, %v4326_v55 }
 0x1cc   :  { %1630 = vrot.lane.b32.xlu1 %v1621_v5, %s3827_s8  ;;  %1626 = vrot.lane.b32.xlu0 %v1615_v22, %s3827_s8 }
 0x1ce   :  { %v4494_v18 = vpop.permute.xlu1 %1102  ;;  %v4496_v9 = vpop.permute.xlu0 %1104 }
 0x1cf   :  { %7414 = vst [vmem:[#allocation95_spill] sm:$0xff] %v4494_v18  ;;  %7415 = vst [vmem:[#allocation96_spill] sm:$0xff] %v4496_v9  ;;  %v1696_v18 = vmul.f32 %v1695_v20, %v4301_v36  ;;  %v1664_v9 = vsel %vm440_vm3, %v1661_v30, %v1663_v31  ;;  %v1709_v30 = vrot.slane %v1697_v15, 1  ;;  %v1713_v15 = vrot.slane %v1699_v14, 1 }
 0x1d0   :  { %1632 = vrot.lane.b32.xlu1 %v1620_v52, %s3827_s8  ;;  %1670 = vrot.lane.b32.xlu0 %v1662_v8, %s3827_s8  ;;  %v1757_v14 = vrot.slane %v1745_v32, 1 }
 0x1d1   :  { %v1708_v49 = vrot.slane %v1696_v18, 1  ;;  %v1701_v18 = vmul.f32 %v1695_v20, %v4336_v46 }
 0x1d2   :  { %v4502_v5 = vpop.permute.xlu1 %1106  ;;  %v4504_v22 = vpop.permute.xlu0 %1108 }
 0x1d3   :  { %7416 = vst [vmem:[#allocation97_spill] sm:$0xff] %v4502_v5  ;;  %7417 = vst [vmem:[#allocation98_spill] sm:$0xff] %v4504_v22  ;;  %v1669_v22 = vsel %vm440_vm3, %v1666_v4, %v1668_v43  ;;  %v1710_v4 = vsel %vm440_vm3, %v1708_v49, %v1709_v30  ;;  %v1714_v5 = vrot.slane %v1700_v61, 1  ;;  %v1747_v61 = vmul.f32 %v1743_v35, %v4324_v16 }
 0x1d4   :  { %1672 = vrot.lane.b32.xlu1 %v1664_v9, %s3827_s8  ;;  %1676 = vrot.lane.b32.xlu0 %v1667_v60, %s3827_s8 }
 0x1d5   :  { %v1715_v49 = vsel %vm440_vm3, %v1713_v15, %v1714_v5  ;;  %v1761_v15 = vrot.slane %v1747_v61, 1 }
 0x1d6   :  { %v4512_v52 = vpop.permute.xlu1 %1110  ;;  %v4514_v8 = vpop.permute.xlu0 %1148 }
 0x1d7   :  { %7418 = vst [vmem:[#allocation99_spill] sm:$0xff] %v4512_v52  ;;  %7419 = vst [vmem:[#allocation100_spill] sm:$0xff] %v4514_v8  ;;  %v1711_v8 = vrot.slane %v1698_v25, 1  ;;  %v1744_v52 = vmul.f32 %v1743_v35, %v4301_v36 }
 0x1d8   :  { %1678 = vrot.lane.b32.xlu1 %v1669_v22, %s3827_s8  ;;  %1674 = vrot.lane.b32.xlu0 %v1663_v31, %s3827_s8 }
 0x1d9   :  { %v1712_v25 = vsel %vm440_vm3, %v1709_v30, %v1711_v8  ;;  %v1756_v20 = vrot.slane %v1744_v52, 1  ;;  %v1749_v52 = vmul.f32 %v1743_v35, %v4336_v46 }
 0x1da   :  { %v4522_v9 = vpop.permute.xlu1 %1150  ;;  %v4524_v60 = vpop.permute.xlu0 %1152 }
 0x1db   :  { %7420 = vst [vmem:[#allocation101_spill] sm:$0xff] %v4522_v9  ;;  %7421 = vst [vmem:[#allocation102_spill] sm:$0xff] %v4524_v60  ;;  %v1716_v60 = vrot.slane %v1701_v18, 1  ;;  %v1746_v9 = vmul.f32 %v1743_v35, %v4316_v38  ;;  %v1758_v32 = vsel %vm440_vm3, %v1756_v20, %v1757_v14 }
 0x1dc   :  { %1680 = vrot.lane.b32.xlu1 %v1668_v43, %s3827_s8  ;;  %1718 = vrot.lane.b32.xlu0 %v1710_v4, %s3827_s8 }
 0x1dd   :  { %v1759_v30 = vrot.slane %v1746_v9, 1  ;;  %v1717_v18 = vsel %vm440_vm3, %v1714_v5, %v1716_v60  ;;  %v1791_v5 = vstv %s3677_s10  ;;  %s5315_s10 = sld [smem:[#allocation8 + $0x2f]] }
 0x1de   :  { %v4532_v31 = vpop.permute.xlu1 %1154  ;;  %v4534_v22 = vpop.permute.xlu0 %1156  ;;  %v1792_v61 = vmul.f32 %v1791_v5, %v4301_v36 }
 0x1df   :  { %7422 = vst [vmem:[#allocation103_spill] sm:$0xff] %v4532_v31  ;;  %7423 = vst [vmem:[#allocation104_spill] sm:$0xff] %v4534_v22  ;;  %v1762_v22 = vrot.slane %v1748_v3, 1 }
 0x1e0   :  { %1720 = vrot.lane.b32.xlu1 %v1712_v25, %s3827_s8  ;;  %1724 = vrot.lane.b32.xlu0 %v1715_v49, %s3827_s8 }
 0x1e1   :  { %v1763_v9 = vsel %vm440_vm3, %v1761_v15, %v1762_v22 }
 0x1e2   :  { %v4543_v43 = vpop.permute.xlu1 %1158  ;;  %v4545_v4 = vpop.permute.xlu0 %1196 }
 0x1e3   :  { %7424 = vst [vmem:[#allocation105_spill] sm:$0xff] %v4543_v43  ;;  %7425 = vst [vmem:[#allocation106_spill] sm:$0xff] %v4545_v4  ;;  %v1760_v43 = vsel %vm440_vm3, %v1757_v14, %v1759_v30  ;;  %v1764_v4 = vrot.slane %v1749_v52, 1  ;;  %v1794_v52 = vmul.f32 %v1791_v5, %v4316_v38 }
 0x1e4   :  { %1726 = vrot.lane.b32.xlu1 %v1717_v18, %s3827_s8  ;;  %1766 = vrot.lane.b32.xlu0 %v1758_v32, %s3828_s13  ;;  %v1793_v18 = vmul.f32 %v1791_v5, %v4312_v37  ;;  %v1804_v32 = vrot.slane %v1792_v61, 1 }
 0x1e5   :  { %v1765_v20 = vsel %vm440_vm3, %v1762_v22, %v1764_v4  ;;  %v1796_v22 = vmul.f32 %v1791_v5, %v4326_v55 }
 0x1e6   :  { %v4552_v25 = vpop.permute.xlu1 %1198  ;;  %v4554_v49 = vpop.permute.xlu0 %1200  ;;  %v1805_v15 = vrot.slane %v1793_v18, 1 }
 0x1e7   :  { %7426 = vst [vmem:[#allocation107_spill] sm:$0xff] %v4552_v25  ;;  %7427 = vst [vmem:[#allocation108_spill] sm:$0xff] %v4554_v49  ;;  %v1810_v18 = vrot.slane %v1796_v22, 1 }
 0x1e8   :  { %1768 = vrot.lane.b32.xlu1 %v1760_v43, %s3828_s13  ;;  %1772 = vrot.lane.b32.xlu0 %v1763_v9, %s3828_s13  ;;  %v1795_v9 = vmul.f32 %v1791_v5, %v4324_v16 }
 0x1ea   :  { %v4560_v35 = vpop.permute.xlu1 %1202  ;;  %v4562_v3 = vpop.permute.xlu0 %1204  ;;  %v1809_v61 = vrot.slane %v1795_v9, 1 }
 0x1eb   :  { %7428 = vst [vmem:[#allocation109_spill] sm:$0xff] %v4560_v35  ;;  %7429 = vst [vmem:[#allocation110_spill] sm:$0xff] %v4562_v3  ;;  %v1807_v35 = vrot.slane %v1794_v52, 1 }
 0x1ec   :  { %1774 = vrot.lane.b32.xlu1 %v1765_v20, %s3828_s13  ;;  %1722 = vrot.lane.b32.xlu0 %v1711_v8, %s3827_s8  ;;  %v1797_v8 = vmul.f32 %v1791_v5, %v4336_v46  ;;  %v1811_v5 = vsel %vm440_vm3, %v1809_v61, %v1810_v18 }
 0x1ee   :  { %v4569_v14 = vpop.permute.xlu1 %1206  ;;  %v4571_v43 = vpop.permute.xlu0 %1276 }
 0x1ef   :  { %7430 = vst [vmem:[#allocation111_spill] sm:$0xff] %v4569_v14  ;;  %7431 = vst [vmem:[#allocation112_spill] sm:$0xff] %v4571_v43  ;;  %v1839_v14 = vstv %s3678_s11  ;;  %v1806_v43 = vsel %vm440_vm3, %v1804_v32, %v1805_v15  ;;  %s5334_s11 = sld [smem:[#allocation8 + $0x42]] }
 0x1f0   :  { %1728 = vrot.lane.b32.xlu1 %v1716_v60, %s3827_s8  ;;  %1770 = vrot.lane.b32.xlu0 %v1759_v30, %s3828_s13  ;;  %v1812_v30 = vrot.slane %v1797_v8, 1  ;;  %v1841_v32 = vmul.f32 %v1839_v14, %v4312_v37  ;;  %v1842_v8 = vmul.f32 %v1839_v14, %v4316_v38  ;;  %v1844_v61 = vmul.f32 %v1839_v14, %v4326_v55 }
 0x1f2   :  { %v4578_v3 = vpop.permute.xlu1 %1278  ;;  %v4580_v20 = vpop.permute.xlu0 %1280  ;;  %v1813_v52 = vsel %vm440_vm3, %v1810_v18, %v1812_v30  ;;  %v1853_v22 = vrot.slane %v1841_v32, 1 }
 0x1f3   :  { %7432 = vst [vmem:[#allocation113_spill] sm:$0xff] %v4578_v3  ;;  %7433 = vst [vmem:[#allocation114_spill] sm:$0xff] %v4580_v20  ;;  %v1840_v3 = vmul.f32 %v1839_v14, %v4301_v36  ;;  %v1808_v20 = vsel %vm440_vm3, %v1805_v15, %v1807_v35  ;;  %v1843_v15 = vmul.f32 %v1839_v14, %v4324_v16 }
 0x1f4   :  { %1776 = vrot.lane.b32.xlu1 %v1764_v4, %s3828_s13  ;;  %1814 = vrot.lane.b32.xlu0 %v1806_v43, %s3828_s13 }
 0x1f5   :  { %v1852_v9 = vrot.slane %v1840_v3, 1  ;;  %v1855_v3 = vrot.slane %v1842_v8, 1  ;;  %v1857_v32 = vrot.slane %v1843_v15, 1 }
 0x1f6   :  { %v4586_v49 = vpop.permute.xlu1 %1282  ;;  %v4588_v60 = vpop.permute.xlu0 %1284 }
 0x1f7   :  { %7434 = vst [vmem:[#allocation115_spill] sm:$0xff] %v4586_v49  ;;  %7435 = vst [vmem:[#allocation116_spill] sm:$0xff] %v4588_v60  ;;  %v1854_v18 = vsel %vm440_vm3, %v1852_v9, %v1853_v22  ;;  %v1995_v60 = vstv %s3682_s12  ;;  %s5436_s12 = sld [smem:[#allocation8 + $0x4a]] }
 0x1f8   :  { %1816 = vrot.lane.b32.xlu1 %v1808_v20, %s3828_s13  ;;  %1820 = vrot.lane.b32.xlu0 %v1811_v5, %s3828_s13  ;;  %v1996_v9 = vmul.f32 %v1995_v60, %v4301_v36  ;;  %v1997_v8 = vmul.f32 %v1995_v60, %v4312_v37 }
 0x1fa   :  { %v4596_v4 = vpop.permute.xlu1 %1286  ;;  %v4598_v43 = vpop.permute.xlu0 %1314 }
 0x1fb   :  { %7436 = vst [vmem:[#allocation117_spill] sm:$0xff] %v4596_v4  ;;  %7437 = vst [vmem:[#allocation118_spill] sm:$0xff] %v4598_v43  ;;  %v1845_v43 = vmul.f32 %v1839_v14, %v4336_v46  ;;  %v1858_v4 = vrot.slane %v1844_v61, 1 }
 0x1fc   :  { %1822 = vrot.lane.b32.xlu1 %v1813_v52, %s3828_s13  ;;  %1818 = vrot.lane.b32.xlu0 %v1807_v35, %s3828_s13 }
 0x1fd   :  { %v1860_v35 = vrot.slane %v1845_v43, 1  ;;  %v1859_v14 = vsel %vm440_vm3, %v1857_v32, %v1858_v4  ;;  %v1998_v43 = vmul.f32 %v1995_v60, %v4316_v38  ;;  %v1999_v32 = vmul.f32 %v1995_v60, %v4324_v16 }
 0x1fe   :  { %v4606_v20 = vpop.permute.xlu1 %1316  ;;  %v4608_v5 = vpop.permute.xlu0 %1318 }
 0x1ff   :  { %7438 = vst [vmem:[#allocation119_spill] sm:$0xff] %v4606_v20  ;;  %7439 = vst [vmem:[#allocation120_spill] sm:$0xff] %v4608_v5  ;;  %v1856_v5 = vsel %vm440_vm3, %v1853_v22, %v1855_v3  ;;  %v1861_v61 = vsel %vm440_vm3, %v1858_v4, %v1860_v35  ;;  %v2009_v22 = vrot.slane %v1997_v8, 2 }
 0x200   :  { %1824 = vrot.lane.b32.xlu1 %v1812_v30, %s3828_s13  ;;  %1862 = vrot.lane.b32.xlu0 %v1854_v18, %s3828_s13  ;;  %v2008_v18 = vrot.slane %v1996_v9, 2  ;;  %v2013_v9 = vrot.slane %v1999_v32, 2 }
 0x202   :  { %v4614_v49 = vpop.permute.xlu1 %1320  ;;  %v4616_v52 = vpop.permute.xlu0 %1322  ;;  %v2010_v4 = vsel %vm837_vm4, %v2008_v18, %v2009_v22 }
 0x203   :  { %7440 = vst [vmem:[#allocation121_spill] sm:$0xff] %v4614_v49  ;;  %7441 = vst [vmem:[#allocation122_spill] sm:$0xff] %v4616_v52  ;;  %v2000_v52 = vmul.f32 %v1995_v60, %v4326_v55  ;;  %v2011_v49 = vrot.slane %v1998_v43, 2 }
 0x204   :  { %1864 = vrot.lane.b32.xlu1 %v1856_v5, %s3828_s13  ;;  %1868 = vrot.lane.b32.xlu0 %v1859_v14, %s3828_s13 }
 0x205   :  { %v2014_v8 = vrot.slane %v2000_v52, 2 }
 0x206   :  { %v4624_v30 = vpop.permute.xlu1 %1324  ;;  %v4626_v15 = vpop.permute.xlu0 %1352 }
 0x207   :  { %7442 = vst [vmem:[#allocation123_spill] sm:$0xff] %v4624_v30  ;;  %7443 = vst [vmem:[#allocation124_spill] sm:$0xff] %v4626_v15  ;;  %v2001_v15 = vmul.f32 %v1995_v60, %v4336_v46  ;;  %v2043_v30 = vstv %s3683_s14  ;;  %v2015_v60 = vsel %vm837_vm4, %v2013_v9, %v2014_v8  ;;  %s5445_s14 = sld [smem:[#allocation8 + $0xf]] }
 0x208   :  { %1870 = vrot.lane.b32.xlu1 %v1861_v61, %s3828_s13  ;;  %1866 = vrot.lane.b32.xlu0 %v1855_v3, %s3828_s13  ;;  %v2044_v3 = vmul.f32 %v2043_v30, %v4301_v36  ;;  %v2045_v43 = vmul.f32 %v2043_v30, %v4312_v37  ;;  %v2046_v32 = vmul.f32 %v2043_v30, %v4316_v38 }
 0x20a   :  { %v4634_v5 = vpop.permute.xlu1 %1354  ;;  %v4636_v14 = vpop.permute.xlu0 %1358  ;;  %v2056_v18 = vrot.slane %v2044_v3, 2 }
 0x20b   :  { %7444 = vst [vmem:[#allocation125_spill] sm:$0xff] %v4634_v5  ;;  %7445 = vst [vmem:[#allocation126_spill] sm:$0xff] %v4636_v14  ;;  %v2012_v14 = vsel %vm837_vm4, %v2009_v22, %v2011_v49  ;;  %v2016_v5 = vrot.slane %v2001_v15, 2  ;;  %v2047_v22 = vmul.f32 %v2043_v30, %v4324_v16  ;;  %v2048_v15 = vmul.f32 %v2043_v30, %v4326_v55 }
 0x20c   :  { %1872 = vrot.lane.b32.xlu1 %v1860_v35, %s3828_s13  ;;  %2018 = vrot.lane.b32.xlu0 %v2010_v4, %s3827_s8 }
 0x20d   :  { %v2017_v4 = vsel %vm837_vm4, %v2014_v8, %v2016_v5  ;;  %v2062_v8 = vrot.slane %v2048_v15, 2 }
 0x20e   :  { %v4642_v20 = vpop.permute.xlu1 %1360  ;;  %v4644_v61 = vpop.permute.xlu0 %1390 }
 0x20f   :  { %7446 = vst [vmem:[#allocation127_spill] sm:$0xff] %v4642_v20  ;;  %7447 = vst [vmem:[#allocation128_spill] sm:$0xff] %v4644_v61  ;;  %v2057_v20 = vrot.slane %v2045_v43, 2  ;;  %v2049_v43 = vmul.f32 %v2043_v30, %v4336_v46 }
 0x210   :  { %2020 = vrot.lane.b32.xlu1 %v2012_v14, %s3827_s8  ;;  %2024 = vrot.lane.b32.xlu0 %v2015_v60, %s3827_s8  ;;  %v2059_v60 = vrot.slane %v2046_v32, 2 }
 0x211   :  { %v2058_v3 = vsel %vm837_vm4, %v2056_v18, %v2057_v20  ;;  %v2064_v61 = vrot.slane %v2049_v43, 2 }
 0x212   :  { %v4652_v52 = vpop.permute.xlu1 %1392  ;;  %v4654_v35 = vpop.permute.xlu0 %1396  ;;  %v2060_v32 = vsel %vm837_vm4, %v2057_v20, %v2059_v60 }
 0x213   :  { %7448 = vst [vmem:[#allocation129_spill] sm:$0xff] %v4652_v52  ;;  %7449 = vst [vmem:[#allocation130_spill] sm:$0xff] %v4654_v35  ;;  %v2091_v35 = vstv %s3684_s15  ;;  %v2061_v52 = vrot.slane %v2047_v22, 2  ;;  %s5490_s15 = sld [smem:[#allocation8 + $0x16]] }
 0x214   :  { %2026 = vrot.lane.b32.xlu1 %v2017_v4, %s3827_s8  ;;  %2022 = vrot.lane.b32.xlu0 %v2011_v49, %s3827_s8  ;;  %v2093_v18 = vmul.f32 %v2091_v35, %v4312_v37  ;;  %v2094_v15 = vmul.f32 %v2091_v35, %v4316_v38  ;;  %v2096_v43 = vmul.f32 %v2091_v35, %v4326_v55 }
 0x216   :  { %v4662_v14 = vpop.permute.xlu1 %1398  ;;  %v4664_v9 = vpop.permute.xlu0 %1356  ;;  %v2105_v20 = vrot.slane %v2093_v18, 2 }
 0x217   :  { %7450 = vst [vmem:[#allocation131_spill] sm:$0xff] %v4662_v14  ;;  %7451 = vst [vmem:[#allocation132_spill] sm:$0xff] %v4664_v9  ;;  %v2092_v14 = vmul.f32 %v2091_v35, %v4301_v36  ;;  %v2063_v9 = vsel %vm837_vm4, %v2061_v52, %v2062_v8  ;;  %v2095_v52 = vmul.f32 %v2091_v35, %v4324_v16 }
 0x218   :  { %2028 = vrot.lane.b32.xlu1 %v2016_v5, %s3827_s8  ;;  %2066 = vrot.lane.b32.xlu0 %v2058_v3, %s3827_s8  ;;  %v2139_v3 = vstv %s3685_s16  ;;  %s5552_s16 = sld [smem:[#allocation8 + $0x2a]] }
 0x219   :  { %v2104_v22 = vrot.slane %v2092_v14, 2  ;;  %v2097_v14 = vmul.f32 %v2091_v35, %v4336_v46  ;;  %v2109_v18 = vrot.slane %v2095_v52, 2  ;;  %v2141_v25 = vmul.f32 %v2139_v3, %v4312_v37 }
 0x21a   :  { %v4670_v4 = vpop.permute.xlu1 %1362  ;;  %v4672_v49 = vpop.permute.xlu0 %1394  ;;  %v2144_v31 = vmul.f32 %v2139_v3, %v4326_v55 }
 0x21b   :  { %7452 = vst [vmem:[#allocation133_spill] sm:$0xff] %v4670_v4  ;;  %7453 = vst [vmem:[#allocation134_spill] sm:$0xff] %v4672_v49  ;;  %v2065_v49 = vsel %vm837_vm4, %v2062_v8, %v2064_v61  ;;  %v2106_v8 = vsel %vm837_vm4, %v2104_v22, %v2105_v20  ;;  %v2110_v4 = vrot.slane %v2096_v43, 2  ;;  %v2153_v52 = vrot.slane %v2141_v25, 2 }
 0x21c   :  { %2068 = vrot.lane.b32.xlu1 %v2060_v32, %s3827_s8  ;;  %2072 = vrot.lane.b32.xlu0 %v2063_v9, %s3827_s8  ;;  %v2143_v43 = vmul.f32 %v2139_v3, %v4324_v16  ;;  %v2158_v25 = vrot.slane %v2144_v31, 2 }
 0x21d   :  { %v2111_v22 = vsel %vm837_vm4, %v2109_v18, %v2110_v4 }
 0x21e   :  { %v4680_v30 = vpop.permute.xlu1 %1400  ;;  %v4682_v5 = vpop.permute.xlu0 %1428  ;;  %v2157_v18 = vrot.slane %v2143_v43, 2 }
 0x21f   :  { %7454 = vst [vmem:[#allocation135_spill] sm:$0xff] %v4680_v30  ;;  %7455 = vst [vmem:[#allocation136_spill] sm:$0xff] %v4682_v5  ;;  %v2107_v5 = vrot.slane %v2094_v15, 2  ;;  %v2140_v30 = vmul.f32 %v2139_v3, %v4301_v36 }
 0x220   :  { %2074 = vrot.lane.b32.xlu1 %v2065_v49, %s3827_s8  ;;  %2070 = vrot.lane.b32.xlu0 %v2059_v60, %s3827_s8 }
 0x221   :  { %v2108_v15 = vsel %vm837_vm4, %v2105_v20, %v2107_v5  ;;  %v2152_v35 = vrot.slane %v2140_v30, 2 }
 0x222   :  { %v4690_v9 = vpop.permute.xlu1 %1430  ;;  %v4692_v32 = vpop.permute.xlu0 %1434 }
 0x223   :  { %7456 = vst [vmem:[#allocation137_spill] sm:$0xff] %v4690_v9  ;;  %7457 = vst [vmem:[#allocation138_spill] sm:$0xff] %v4692_v32  ;;  %v2112_v32 = vrot.slane %v2097_v14, 2  ;;  %v2142_v9 = vmul.f32 %v2139_v3, %v4316_v38  ;;  %v2154_v14 = vsel %vm837_vm4, %v2152_v35, %v2153_v52 }
 0x224   :  { %2076 = vrot.lane.b32.xlu1 %v2064_v61, %s3827_s8  ;;  %2114 = vrot.lane.b32.xlu0 %v2106_v8, %s3827_s8 }
 0x225   :  { %v2113_v30 = vsel %vm837_vm4, %v2110_v4, %v2112_v32  ;;  %v2155_v20 = vrot.slane %v2142_v9, 2  ;;  %v2187_v9 = vstv %s3686_s17  ;;  %s5622_s17 = sld [smem:[#allocation8 + $0x31]] }
 0x226   :  { %v4700_v60 = vpop.permute.xlu1 %1436  ;;  %v4702_v49 = vpop.permute.xlu0 %1432  ;;  %v2188_v35 = vmul.f32 %v2187_v9, %v4301_v36 }
 0x227   :  { %7458 = vst [vmem:[#allocation139_spill] sm:$0xff] %v4700_v60  ;;  %7459 = vst [vmem:[#allocation140_spill] sm:$0xff] %v4702_v49  ;;  %v2145_v49 = vmul.f32 %v2139_v3, %v4336_v46  ;;  %v4846_v60 = vld [vmem:[#allocation2 + $0x58] sm:$0x3f] }
 0x228   :  { %2116 = vrot.lane.b32.xlu1 %v2108_v15, %s3827_s8  ;;  %2120 = vrot.lane.b32.xlu0 %v2111_v22, %s3827_s8 }
 0x229   :  { %v2160_v4 = vrot.slane %v2145_v49, 2 }
 0x22a   :  { %v4711_v61 = vpop.permute.xlu1 %1438  ;;  %v4713_v8 = vpop.permute.xlu0 %1466 }
 0x22b   :  { %7460 = vst [vmem:[#allocation141_spill] sm:$0xff] %v4711_v61  ;;  %7461 = vst [vmem:[#allocation142_spill] sm:$0xff] %v4713_v8  ;;  %v2156_v61 = vsel %vm837_vm4, %v2153_v52, %v2155_v20  ;;  %v2159_v8 = vsel %vm837_vm4, %v2157_v18, %v2158_v25  ;;  %v2161_v43 = vsel %vm837_vm4, %v2158_v25, %v2160_v4 }
 0x22c   :  { %2122 = vrot.lane.b32.xlu1 %v2113_v30, %s3827_s8  ;;  %2162 = vrot.lane.b32.xlu0 %v2154_v14, %s3828_s13  ;;  %v2189_v30 = vmul.f32 %v2187_v9, %v4312_v37  ;;  %v2190_v14 = vmul.f32 %v2187_v9, %v4316_v38  ;;  %v2191_v18 = vmul.f32 %v2187_v9, %v4324_v16 }
 0x22e   :  { %v4720_v15 = vpop.permute.xlu1 %1468  ;;  %v4722_v22 = vpop.permute.xlu0 %1472 }
 0x22f   :  { %7462 = vst [vmem:[#allocation143_spill] sm:$0xff] %v4720_v15  ;;  %7463 = vst [vmem:[#allocation144_spill] sm:$0xff] %v4722_v22 }
 0x230   :  { %2164 = vrot.lane.b32.xlu1 %v2156_v61, %s3828_s13  ;;  %2168 = vrot.lane.b32.xlu0 %v2159_v8, %s3828_s13  ;;  %v2200_v61 = vrot.slane %v2188_v35, 2  ;;  %v2201_v8 = vrot.slane %v2189_v30, 2  ;;  %v2203_v35 = vrot.slane %v2190_v14, 2  ;;  %v2205_v30 = vrot.slane %v2191_v18, 2 }
 0x232   :  { %v4728_v31 = vpop.permute.xlu1 %1474  ;;  %v4730_v3 = vpop.permute.xlu0 %1470 }
 0x233   :  { %7464 = vst [vmem:[#allocation145_spill] sm:$0xff] %v4728_v31  ;;  %7465 = vst [vmem:[#allocation146_spill] sm:$0xff] %v4730_v3  ;;  %v2192_v3 = vmul.f32 %v2187_v9, %v4326_v55  ;;  %v2235_v31 = vstv %s3687_s18  ;;  %s5632_s18 = sld [smem:[#allocation8 + $0x45]] }
 0x234   :  { %2170 = vrot.lane.b32.xlu1 %v2161_v43, %s3828_s13  ;;  %2118 = vrot.lane.b32.xlu0 %v2107_v5, %s3827_s8  ;;  %v2193_v43 = vmul.f32 %v2187_v9, %v4336_v46  ;;  %v2236_v9 = vmul.f32 %v2235_v31, %v4301_v36  ;;  %v2238_v14 = vmul.f32 %v2235_v31, %v4316_v38 }
 0x235   :  { %v2239_v36 = vmul.f32 %v2235_v31, %v4324_v16 }
 0x236   :  { %v4737_v49 = vpop.permute.xlu1 %1476  ;;  %v4739_v52 = vpop.permute.xlu0 %1622 }
 0x237   :  { %7466 = vst [vmem:[#allocation147_spill] sm:$0xff] %v4737_v49  ;;  %7467 = vst [vmem:[#allocation148_spill] sm:$0xff] %v4739_v52  ;;  %v2202_v52 = vsel %vm837_vm4, %v2200_v61, %v2201_v8  ;;  %v2206_v49 = vrot.slane %v2192_v3, 2  ;;  %v2237_v61 = vmul.f32 %v2235_v31, %v4312_v37  ;;  %v2240_v37 = vmul.f32 %v2235_v31, %v4326_v55 }
 0x238   :  { %2124 = vrot.lane.b32.xlu1 %v2112_v32, %s3827_s8  ;;  %2166 = vrot.lane.b32.xlu0 %v2155_v20, %s3828_s13  ;;  %v2208_v20 = vrot.slane %v2193_v43, 2  ;;  %v2253_v16 = vrot.slane %v2239_v36, 2  ;;  %v2241_v55 = vmul.f32 %v2235_v31, %v4336_v46  ;;  %v185_v46 = vstv %s3636_s21  ;;  %s5822_s21 = sld [smem:[#allocation8 + $0x32]] }
 0x239   :  { %v2249_v18 = vrot.slane %v2237_v61, 2  ;;  %v2254_v43 = vrot.slane %v2240_v37, 2  ;;  %v4794_v31 = vstv %s3643_s22  ;;  %v4798_v36 = vstv %s3645_s24  ;;  %s5844_s22 = sld [smem:[#allocation8 + $0x12]]  ;;  %s5902_s24 = sld [smem:[#allocation8 + $0x2d]] }
 0x23a   :  { %v4746_v25 = vpop.permute.xlu1 %1624  ;;  %v4748_v5 = vpop.permute.xlu0 %1628  ;;  %v4800_v37 = vstv %s3652_s25  ;;  %v4914_v12 = vmul.f32 %v4846_v60, %v4798_v36  ;;  %v4937_v28 = vmul.f32 %v4846_v60, %v185_v46  ;;  %s5971_s25 = sld [smem:[#allocation8 + $0x48]] }
 0x23b   :  { %7468 = vst [vmem:[#allocation149_spill] sm:$0xff] %v4746_v25  ;;  %7469 = vst [vmem:[#allocation150_spill] sm:$0xff] %v4748_v5  ;;  %v2204_v25 = vsel %vm837_vm4, %v2201_v8, %v2203_v35  ;;  %v2207_v5 = vsel %vm837_vm4, %v2205_v30, %v2206_v49  ;;  %v2248_v8 = vrot.slane %v2236_v9, 2  ;;  %v2255_v61 = vsel %vm837_vm4, %v2253_v16, %v2254_v43 }
 0x23c   :  { %2172 = vrot.lane.b32.xlu1 %v2160_v4, %s3828_s13  ;;  %2210 = vrot.lane.b32.xlu0 %v2202_v52, %s3828_s13  ;;  %v2209_v52 = vsel %vm837_vm4, %v2206_v49, %v2208_v20  ;;  %7490 = vst [vmem:[#allocation171_spill] sm:$0xff] %v4914_v12  ;;  %7495 = vst [vmem:[#allocation176_spill] sm:$0xff] %v4937_v28 }
 0x23e   :  { %v4754_v22 = vpop.permute.xlu1 %1630  ;;  %v4756_v32 = vpop.permute.xlu0 %1626 }
 0x23f   :  { %7470 = vst [vmem:[#allocation151_spill] sm:$0xff] %v4754_v22  ;;  %7471 = vst [vmem:[#allocation152_spill] sm:$0xff] %v4756_v32  ;;  %v4837_v22 = vstv %s4780_s1  ;;  %s6122_s1 = sld [smem:[#allocation8 + $0x4f]] }
 0x240   :  { %2212 = vrot.lane.b32.xlu1 %v2204_v25, %s3828_s13  ;;  %2216 = vrot.lane.b32.xlu0 %v2207_v5, %s3828_s13  ;;  %v2251_v25 = vrot.slane %v2238_v14, 2  ;;  %v2250_v5 = vsel %vm837_vm4, %v2248_v8, %v2249_v18  ;;  %v157_v14 = vstv %s156_s19  ;;  %v171_v8 = vstv %s3635_s20  ;;  %s5708_s19 = sld [smem:[#allocation8 + $0x4c]]  ;;  %s5757_s20 = sld [smem:[#allocation8 + $0x17]] }
 0x241   :  { %v4849_v2 = vmul.f32 %v4846_v60, %v157_v14  ;;  %v4864_v27 = vmul.f32 %v4846_v60, %v171_v8 }
 0x242   :  { %v4764_v4 = vpop.permute.xlu1 %1632  ;;  %v4766_v3 = vpop.permute.xlu0 %1670  ;;  %v2252_v9 = vsel %vm837_vm4, %v2249_v18, %v2251_v25  ;;  %v4802_v18 = vstv %s3653_s26  ;;  %s5977_s26 = sld [smem:[#allocation8 + $0x19]] }
 0x243   :  { %7472 = vst [vmem:[#allocation153_spill] sm:$0xff] %v4764_v4  ;;  %7473 = vst [vmem:[#allocation154_spill] sm:$0xff] %v4766_v3  ;;  %v4831_v4 = vld [vmem:[#allocation2 + $0x48] sm:$0xff] }
 0x244   :  { %2218 = vrot.lane.b32.xlu1 %v2209_v52, %s3828_s13  ;;  %2214 = vrot.lane.b32.xlu0 %v2203_v35, %s3828_s13  ;;  %v2256_v52 = vrot.slane %v2241_v55, 2  ;;  %v4808_v55 = vld [vmem:[#allocation2 + $0x30] sm:$0xff]  ;;  %v4834_v32 = vmul.f32 %v4831_v4, %v157_v14  ;;  %7482 = vst [vmem:[#allocation163_spill] sm:$0xff] %v4864_v27  ;;  %v4921_v62 = vmul.f32 %v4831_v4, %v185_v46 }
 0x245   :  { %v504_v27 = vmul.f32 %v4831_v4, %v4798_v36 }
 0x246   :  { %v4774_v49 = vpop.permute.xlu1 %1672  ;;  %v4776_v38 = vpop.permute.xlu0 %1676  ;;  %7491 = vst [vmem:[#allocation172_spill] sm:$0xff] %v4921_v62 }
 0x247   :  { %7474 = vst [vmem:[#allocation155_spill] sm:$0xff] %v4774_v49  ;;  %7475 = vst [vmem:[#allocation156_spill] sm:$0xff] %v4776_v38  ;;  %v4819_v38 = vstv %s3691_s27  ;;  %v4821_v49 = vld [vmem:[#allocation2 + $0x8] sm:$0xff]  ;;  %s6021_s27 = sld [smem:[#allocation8 + $0x34]] }
 0x248   :  { %2220 = vrot.lane.b32.xlu1 %v2208_v20, %s3828_s13  ;;  %2258 = vrot.lane.b32.xlu0 %v2250_v5, %s3828_s13  ;;  %v4796_v20 = vstv %s3644_s23  ;;  %v4852_v48 = vmul.f32 %v4821_v49, %v171_v8  ;;  %v2326_v6 = vmul.f32 %v4819_v38, %v4808_v55  ;;  %v4880_v40 = vmul.f32 %v4821_v49, %v185_v46  ;;  %s5886_s23 = sld [smem:[#allocation8 + $0x4d]] }
 0x249   :  { %v4901_v26 = vmul.f32 %v4846_v60, %v4796_v20  ;;  %v429_v63 = vmul.f32 %v4821_v49, %v4794_v31  ;;  %v2327_v53 = vmul.f32 %v4819_v38, %v4872_v7  ;;  %v2329_v45 = vmul.f32 %v4819_v38, %v4874_v59 }
 0x24a   :  { %v4784_v35 = vpop.permute.xlu1 %1678  ;;  %v4786_v30 = vpop.permute.xlu0 %1674  ;;  %7486 = vst [vmem:[#allocation167_spill] sm:$0xff] %v4880_v40  ;;  %v466_v17 = vmul.f32 %v4821_v49, %v4796_v20  ;;  %v502_v62 = vmul.f32 %v4821_v49, %v4798_v36  ;;  %v826_v1 = vmul.f32 %v4821_v49, %v4800_v37 }
 0x24b   :  { %7476 = vst [vmem:[#allocation157_spill] sm:$0xff] %v4784_v35  ;;  %7477 = vst [vmem:[#allocation158_spill] sm:$0xff] %v4786_v30  ;;  %v2257_v35 = vsel %vm837_vm4, %v2254_v43, %v2256_v52  ;;  %v4841_v43 = vld [vmem:[#allocation2 + $0x50] sm:$0xff]  ;;  %v442_v28 = vrot.slane %v429_v63, 1  ;;  %v468_v63 = vmul.f32 %v4831_v4, %v4796_v20 }
 0x24c   :  { %2260 = vrot.lane.b32.xlu1 %v2252_v9, %s3828_s13  ;;  %2264 = vrot.lane.b32.xlu0 %v2255_v61, %s3828_s13  ;;  %v4810_v9 = vld [vmem:[#allocation2] sm:$0xff]  ;;  %v4844_v15 = vmul.f32 %v4841_v43, %v157_v14  ;;  %7489 = vst [vmem:[#allocation170_spill] sm:$0xff] %v4901_v26  ;;  %v478_v10 = vrot.slane %v466_v17, 1 }
 0x24d   :  { %v4813_v61 = vmul.f32 %v4810_v9, %v157_v14  ;;  %v4816_v30 = vmul.f32 %v4810_v9, %v171_v8  ;;  %v4877_v56 = vmul.f32 %v4810_v9, %v185_v46  ;;  %v428_v44 = vmul.f32 %v4810_v9, %v4794_v31 }
 0x24e   :  { %v4804_v5 = vpop.permute.xlu1 %1680  ;;  %v4806_v16 = vpop.permute.xlu0 %1718  ;;  %v501_v17 = vmul.f32 %v4810_v9, %v4798_v36 }
 0x24f   :  { %7478 = vst [vmem:[#allocation159_spill] sm:$0xff] %v4804_v5  ;;  %7479 = vst [vmem:[#allocation160_spill] sm:$0xff] %v4806_v16  ;;  %v4824_v5 = vmul.f32 %v4821_v49, %v157_v14  ;;  %v4826_v16 = vld [vmem:[#allocation2 + $0x10] sm:$0x3f] }
 0x250   :  { %v4829_v3 = vmul.f32 %v4826_v16, %v157_v14  ;;  %2266 = vrot.lane.b32.xlu1 %v2257_v35, %s3828_s13  ;;  %2262 = vrot.lane.b32.xlu0 %v2251_v25, %s3828_s13  ;;  %v4855_v47 = vmul.f32 %v4826_v16, %v171_v8  ;;  %v4858_v35 = vmul.f32 %v4831_v4, %v171_v8 }
 0x251   :  { %v4861_v25 = vmul.f32 %v4841_v43, %v171_v8  ;;  %7485 = vst [vmem:[#allocation166_spill] sm:$0xff] %v4877_v56  ;;  %v4884_v8 = vmul.f32 %v4826_v16, %v4794_v31  ;;  %v4897_v39 = vmul.f32 %v4826_v16, %v4796_v20  ;;  %v4910_v13 = vmul.f32 %v4826_v16, %v4798_v36 }
 0x252   :  { %7480 = vst [vmem:[#allocation161_spill] sm:$0xff] %v4858_v35  ;;  %v4866_v21 = vpop.permute.xlu1 %1720  ;;  %v4868_v14 = vpop.permute.xlu0 %1724  ;;  %v4974_v56 = vstv %s4890_s29  ;;  %s6252_s29 = sld [smem:[#allocation8 + $0x15]] }
 0x253   :  { %7481 = vst [vmem:[#allocation162_spill] sm:$0xff] %v4861_v25  ;;  %7483 = vst [vmem:[#allocation164_spill] sm:$0xff] %v4866_v21  ;;  %v4893_v21 = vmul.f32 %v4826_v16, %v185_v46 }
 0x254   :  { %7484 = vst [vmem:[#allocation165_spill] sm:$0xff] %v4868_v14  ;;  %v4888_v14 = vmul.f32 %v4846_v60, %v4794_v31  ;;  %7488 = vst [vmem:[#allocation169_spill] sm:$0xff] %v4897_v39  ;;  %2268 = vrot.lane.b32.xlu1 %v2256_v52, %s3828_s13  ;;  %2338 = vrot.lane.b32.xlu0 %v2326_v6, %s3827_s8  ;;  %v4924_v52 = vmul.f32 %v4841_v43, %v185_v46  ;;  %v4951_v46 = vld [vmem:[#allocation2 + $0x40] sm:$0x3f] }
 0x255   :  { %7487 = vst [vmem:[#allocation168_spill] sm:$0xff] %v4893_v21  ;;  %v431_v21 = vmul.f32 %v4831_v4, %v4794_v31  ;;  %v2328_v19 = vmul.f32 %v4819_v38, %v4951_v46 }
 0x256   :  { %7492 = vst [vmem:[#allocation173_spill] sm:$0xff] %v4924_v52  ;;  %v4926_v6 = vpop.permute.xlu1 %1726  ;;  %v4928_v54 = vpop.permute.xlu0 %1766  ;;  %v465_v52 = vmul.f32 %v4810_v9, %v4796_v20 }
 0x257   :  { %7493 = vst [vmem:[#allocation174_spill] sm:$0xff] %v4926_v6  ;;  %7494 = vst [vmem:[#allocation175_spill] sm:$0xff] %v4928_v54  ;;  %v432_v6 = vmul.f32 %v4841_v43, %v4794_v31  ;;  %v441_v54 = vrot.slane %v428_v44, 1  ;;  %v469_v31 = vmul.f32 %v4841_v43, %v4796_v20 }
 0x258   :  { %2340 = vrot.lane.b32.xlu1 %v2327_v53, %s3827_s8  ;;  %2344 = vrot.lane.b32.xlu0 %v2329_v45, %s3827_s8  ;;  %v2330_v45 = vmul.f32 %v4819_v38, %v4934_v29  ;;  %v477_v25 = vrot.slane %v465_v52, 1  ;;  %v825_v52 = vmul.f32 %v4810_v9, %v4800_v37 }
 0x259   :  { %v447_v44 = vrot.slane %v432_v6, 1  ;;  %v4985_v20 = vsel %vm440_vm3, %v441_v54, %v442_v28  ;;  %v7498_v6 = vrot.slane %v4884_v8, 1  ;;  %v483_v0 = vrot.slane %v469_v31, 1 }
 0x25a   :  { %v4959_v40 = vpop.permute.xlu1 %1768  ;;  %v4961_v53 = vpop.permute.xlu0 %1772  ;;  %v2364_v54 = vmul.f32 %v4974_v56, %v4808_v55 }
 0x25b   :  { %7496 = vst [vmem:[#allocation177_spill] sm:$0xff] %v4959_v40  ;;  %7497 = vst [vmem:[#allocation178_spill] sm:$0xff] %v4961_v53  ;;  %v446_v40 = vrot.slane %v431_v21, 1  ;;  %v505_v53 = vmul.f32 %v4841_v43, %v4798_v36  ;;  %v4990_v21 = vsel %vm440_vm3, %v442_v28, %v7498_v6  ;;  %v7502_v28 = vrot.slane %v4888_v14, 1 }
 0x25c   :  { %2346 = vrot.lane.b32.xlu1 %v2330_v45, %s3827_s8  ;;  %2342 = vrot.lane.b32.xlu0 %v2328_v19, %s3827_s8  ;;  %7499 = vst [vmem:[#allocation179_spill] sm:$0xff] %v4990_v21  ;;  %v2331_v19 = vmul.f32 %v4819_v38, %v4967_v11  ;;  %v482_v36 = vrot.slane %v468_v63, 1  ;;  %v514_v21 = vrot.slane %v502_v62, 1  ;;  %v5017_v38 = vsel %vm440_vm3, %v477_v25, %v478_v10 }
 0x25d   :  { %v5007_v6 = vsel %vm440_vm3, %v447_v44, %v7502_v28  ;;  %v5014_v31 = vsel %vm440_vm3, %v446_v40, %v447_v44  ;;  %v513_v28 = vrot.slane %v501_v17, 1  ;;  %v839_v63 = vrot.slane %v826_v1, 2 }
 0x25e   :  { %v4996_v35 = vpop.permute.xlu1 %1774  ;;  %v4998_v45 = vpop.permute.xlu0 %1722  ;;  %v5023_v62 = vmul.f32 %v4826_v16, %v4800_v37  ;;  %v828_v40 = vmul.f32 %v4831_v4, %v4800_v37  ;;  %v7504_v44 = vrot.slane %v4897_v39, 1  ;;  %v5046_v39 = vsel %vm440_vm3, %v482_v36, %v483_v0 }
 0x25f   :  { %7500 = vst [vmem:[#allocation180_spill] sm:$0xff] %v4996_v35  ;;  %7501 = vst [vmem:[#allocation181_spill] sm:$0xff] %v4998_v45  ;;  %v519_v45 = vrot.slane %v505_v53, 1  ;;  %v518_v35 = vrot.slane %v504_v27, 1  ;;  %v7505_v27 = vrot.slane %v4901_v26, 1  ;;  %v5067_v36 = vstv %s4980_s30  ;;  %s6280_s30 = sld [smem:[#allocation8 + $0x35]] }
 0x260   :  { %2348 = vrot.lane.b32.xlu1 %v2331_v19, %s3827_s8  ;;  %2376 = vrot.lane.b32.xlu0 %v2364_v54, %s3827_s8  ;;  %7503 = vst [vmem:[#allocation182_spill] sm:$0xff] %v5023_v62  ;;  %v5030_v25 = vsel %vm440_vm3, %v478_v10, %v7504_v44  ;;  %v2365_v19 = vmul.f32 %v4974_v56, %v4872_v7  ;;  %v7509_v44 = vrot.slane %v4910_v13, 1 }
 0x261   :  { %v5035_v53 = vsel %vm440_vm3, %v483_v0, %v7505_v27  ;;  %v2367_v54 = vmul.f32 %v4974_v56, %v4874_v59  ;;  %v5049_v10 = vsel %vm440_vm3, %v513_v28, %v514_v21  ;;  %v829_v0 = vmul.f32 %v4841_v43, %v4800_v37 }
 0x262   :  { %7506 = vst [vmem:[#allocation183_spill] sm:$0xff] %v5035_v53  ;;  %v5037_v17 = vpop.permute.xlu1 %1728  ;;  %v5039_v1 = vpop.permute.xlu0 %1770  ;;  %v5054_v27 = vsel %vm440_vm3, %v514_v21, %v7509_v44  ;;  %v5062_v53 = vsel %vm440_vm3, %v518_v35, %v519_v45  ;;  %v843_v28 = vrot.slane %v828_v40, 2  ;;  %v5077_v35 = vmul.f32 %v4846_v60, %v4800_v37 }
 0x263   :  { %7507 = vst [vmem:[#allocation184_spill] sm:$0xff] %v5037_v17  ;;  %7508 = vst [vmem:[#allocation185_spill] sm:$0xff] %v5039_v1  ;;  %v838_v17 = vrot.slane %v825_v52, 2  ;;  %v7511_v1 = vrot.slane %v4914_v12, 1  ;;  %v2366_v40 = vmul.f32 %v4974_v56, %v4951_v46  ;;  %v5093_v37 = vmul.f32 %v4826_v16, %v4802_v18 }
 0x264   :  { %7510 = vst [vmem:[#allocation186_spill] sm:$0xff] %v5054_v27  ;;  %7513 = vst [vmem:[#allocation188_spill] sm:$0xff] %v5062_v53  ;;  %2378 = vrot.lane.b32.xlu1 %v2365_v19, %s3827_s8  ;;  %2382 = vrot.lane.b32.xlu0 %v2367_v54, %s3827_s8  ;;  %v865_v54 = vmul.f32 %v4831_v4, %v4802_v18  ;;  %v866_v52 = vmul.f32 %v4841_v43, %v4802_v18 }
 0x265   :  { %v5059_v26 = vsel %vm440_vm3, %v519_v45, %v7511_v1  ;;  %v5072_v21 = vsel %vm837_vm4, %v838_v17, %v839_v63  ;;  %v862_v45 = vmul.f32 %v4810_v9, %v4802_v18  ;;  %v863_v1 = vmul.f32 %v4821_v49, %v4802_v18  ;;  %7517 = vst [vmem:[#allocation192_spill] sm:$0xff] %v5093_v37 }
 0x266   :  { %7512 = vst [vmem:[#allocation187_spill] sm:$0xff] %v5059_v26  ;;  %7514 = vst [vmem:[#allocation189_spill] sm:$0xff] %v5072_v21  ;;  %v5083_v44 = vpop.permute.xlu1 %1776  ;;  %v5085_v19 = vpop.permute.xlu0 %1814  ;;  %v2368_v17 = vmul.f32 %v4974_v56, %v4934_v29  ;;  %v5100_v21 = vstv %s5011_s5  ;;  %v899_v12 = vmul.f32 %v4821_v49, %v4837_v22  ;;  %v5112_v53 = vmul.f32 %v4826_v16, %v4837_v22  ;;  %s6340_s5 = sld [smem:[#allocation8 + $0x30]] }
 0x267   :  { %7515 = vst [vmem:[#allocation190_spill] sm:$0xff] %v5083_v44  ;;  %7516 = vst [vmem:[#allocation191_spill] sm:$0xff] %v5085_v19  ;;  %v844_v19 = vrot.slane %v829_v0, 2  ;;  %v5106_v44 = vmul.f32 %v4846_v60, %v4802_v18  ;;  %v7520_v26 = vrot.slane %v5023_v62, 2  ;;  %v901_v18 = vmul.f32 %v4831_v4, %v4837_v22 }
 0x268   :  { %7519 = vst [vmem:[#allocation194_spill] sm:$0xff] %v5112_v53  ;;  %2384 = vrot.lane.b32.xlu1 %v2368_v17, %s3827_s8  ;;  %2380 = vrot.lane.b32.xlu0 %v2366_v40, %s3827_s8  ;;  %v902_v49 = vmul.f32 %v4841_v43, %v4837_v22  ;;  %v5129_v16 = vmul.f32 %v4846_v60, %v4837_v22  ;;  %v875_v43 = vrot.slane %v863_v1, 2  ;;  %v879_v60 = vrot.slane %v865_v54, 2 }
 0x269   :  { %7518 = vst [vmem:[#allocation193_spill] sm:$0xff] %v5106_v44  ;;  %v5121_v0 = vsel %vm837_vm4, %v839_v63, %v7520_v26  ;;  %v898_v17 = vmul.f32 %v4810_v9, %v4837_v22  ;;  %v2369_v26 = vmul.f32 %v4974_v56, %v4967_v11  ;;  %v2402_v4 = vmul.f32 %v5100_v21, %v4808_v55 }
 0x26a   :  { %7521 = vst [vmem:[#allocation195_spill] sm:$0xff] %v5121_v0  ;;  %7522 = vst [vmem:[#allocation196_spill] sm:$0xff] %v5129_v16  ;;  %v5134_v40 = vpop.permute.xlu1 %1816  ;;  %v5136_v62 = vpop.permute.xlu0 %1820  ;;  %v880_v0 = vrot.slane %v866_v52, 2  ;;  %v5144_v27 = vsel %vm837_vm4, %v843_v28, %v844_v19  ;;  %v911_v9 = vrot.slane %v899_v12, 2  ;;  %v874_v56 = vrot.slane %v862_v45, 2 }
 0x26b   :  { %7523 = vst [vmem:[#allocation197_spill] sm:$0xff] %v5134_v40  ;;  %7524 = vst [vmem:[#allocation198_spill] sm:$0xff] %v5136_v62  ;;  %v915_v1 = vrot.slane %v901_v18, 2  ;;  %v916_v54 = vrot.slane %v902_v49, 2  ;;  %v7525_v28 = vrot.slane %v5077_v35, 2  ;;  %v910_v12 = vrot.slane %v898_v17, 2 }
 0x26c   :  { %2386 = vrot.lane.b32.xlu1 %v2369_v26, %s3827_s8  ;;  %2414 = vrot.lane.b32.xlu0 %v2402_v4, %s3827_s8  ;;  %v2403_v26 = vmul.f32 %v5100_v21, %v4872_v7  ;;  %v2405_v45 = vmul.f32 %v5100_v21, %v4874_v59  ;;  %v5167_v18 = vsel %vm837_vm4, %v874_v56, %v875_v43  ;;  %v7529_v49 = vrot.slane %v5093_v37, 2 }
 0x26d   :  { %v5156_v22 = vsel %vm837_vm4, %v844_v19, %v7525_v28  ;;  %7528 = vst [vmem:[#allocation201_spill] sm:$0xff] %v5167_v18  ;;  %v5175_v19 = vsel %vm837_vm4, %v879_v60, %v880_v0  ;;  %v5178_v17 = vstv %s5102_s6  ;;  %v7532_v28 = vrot.slane %v5106_v44, 2  ;;  %v7576_v44 = vld [vmem:[#allocation16_spill] sm:$0xff]  ;;  %s6388_s6 = sld [smem:[#allocation8 + $0x50]] }
 0x26e   :  { %v5158_v40 = vpop.permute.xlu1 %1822  ;;  %v5160_v63 = vpop.permute.xlu0 %1818  ;;  %v5172_v4 = vsel %vm837_vm4, %v875_v43, %v7529_v49  ;;  %7531 = vst [vmem:[#allocation203_spill] sm:$0xff] %v5175_v19  ;;  %v7535_v56 = vrot.slane %v5112_v53, 2  ;;  %v1249_v43 = vstv %s5114_s7  ;;  %v5197_v60 = vsel %vm837_vm4, %v915_v1, %v916_v54  ;;  %s6407_s7 = sld [smem:[#allocation8 + $0x4b]] }
 0x26f   :  { %7526 = vst [vmem:[#allocation199_spill] sm:$0xff] %v5158_v40  ;;  %7527 = vst [vmem:[#allocation200_spill] sm:$0xff] %v5160_v63  ;;  %v5183_v52 = vsel %vm837_vm4, %v880_v0, %v7532_v28  ;;  %v5186_v63 = vsel %vm837_vm4, %v910_v12, %v911_v9  ;;  %v7538_v49 = vrot.slane %v5129_v16, 2  ;;  %v5204_v12 = vld [vmem:[#allocation2 + $0x18] sm:$0xff]  ;;  %v1887_v18 = vstv %s5445_s14 }
 0x270   :  { %7530 = vst [vmem:[#allocation202_spill] sm:$0xff] %v5172_v4  ;;  %7533 = vst [vmem:[#allocation204_spill] sm:$0xff] %v5183_v52  ;;  %v5191_v40 = vsel %vm837_vm4, %v911_v9, %v7535_v56  ;;  %2416 = vrot.lane.b32.xlu1 %v2403_v26, %s3827_s8  ;;  %2420 = vrot.lane.b32.xlu0 %v2405_v45, %s3827_s8  ;;  %v5208_v28 = vmul.f32 %v5204_v12, %v4904_v24  ;;  %v5210_v9 = vld [vmem:[#allocation2 + $0x20] sm:$0xff]  ;;  %v5216_v45 = vld [vmem:[#allocation2 + $0x28] sm:$0x3f] }
 0x271   :  { %7534 = vst [vmem:[#allocation205_spill] sm:$0xff] %v5186_v63  ;;  %7536 = vst [vmem:[#allocation206_spill] sm:$0xff] %v5191_v40  ;;  %v5202_v0 = vsel %vm837_vm4, %v916_v54, %v7538_v49  ;;  %v5214_v26 = vmul.f32 %v5210_v9, %v4904_v24  ;;  %v5220_v1 = vmul.f32 %v5216_v45, %v4904_v24  ;;  %v5222_v54 = vld [vmem:[#allocation2 + $0x60] sm:$0xff]  ;;  %v5395_v40 = vstv %s5315_s10 }
 0x272   :  { %7537 = vst [vmem:[#allocation207_spill] sm:$0xff] %v5197_v60  ;;  %7539 = vst [vmem:[#allocation208_spill] sm:$0xff] %v5202_v0  ;;  %v5226_v56 = vmul.f32 %v5222_v54, %v4904_v24  ;;  %v5230_v49 = vpop.permute.xlu1 %1824  ;;  %v5232_v62 = vpop.permute.xlu0 %1862  ;;  %v5244_v0 = vld [vmem:[#allocation2 + $0x70] sm:$0x3f]  ;;  %v5260_v60 = vadd.f32 %v4074_v23, %v4813_v61  ;;  %v5282_v61 = vmul.f32 %v5204_v12, %v1249_v43  ;;  %v7581_v4 = vld [vmem:[#allocation167_spill] sm:$0xff] }
 0x273   :  { %7540 = vst [vmem:[#allocation209_spill] sm:$0xff] %v5208_v28  ;;  %7541 = vst [vmem:[#allocation210_spill] sm:$0xff] %v5214_v26  ;;  %v2406_v26 = vmul.f32 %v5100_v21, %v4934_v29  ;;  %v2440_v28 = vmul.f32 %v5178_v17, %v4808_v55  ;;  %v5279_v23 = vmul.f32 %v5244_v0, %v5067_v36 }
 0x274   :  { %7542 = vst [vmem:[#allocation211_spill] sm:$0xff] %v5220_v1  ;;  %7543 = vst [vmem:[#allocation212_spill] sm:$0xff] %v5226_v56  ;;  %v5238_v1 = vld [vmem:[#allocation2 + $0x68] sm:$0xff]  ;;  %v5248_v56 = vmul.f32 %v5244_v0, %v4904_v24 }
 0x275   :  { %7544 = vst [vmem:[#allocation213_spill] sm:$0xff] %v5230_v49  ;;  %7545 = vst [vmem:[#allocation214_spill] sm:$0xff] %v5232_v62  ;;  %v5242_v16 = vmul.f32 %v5238_v1, %v4904_v24  ;;  %v5252_v62 = vmul.f32 %v5204_v12, %v5067_v36  ;;  %v5256_v49 = vmul.f32 %v5210_v9, %v5067_v36  ;;  %2422 = vrot.lane.b32.xlu1 %v2406_v26, %s3827_s8 }
 0x276   :  { %7547 = vst [vmem:[#allocation216_spill] sm:$0xff] %v5248_v56  ;;  %v5268_v24 = vmul.f32 %v5222_v54, %v5067_v36  ;;  %v1491_v56 = vstv %s5148_s0  ;;  %2452 = vrot.lane.b32.xlu0 %v2440_v28, %s3828_s13  ;;  %7553 = vst [vmem:[#allocation222_spill] sm:$0xff] %v5279_v23  ;;  %v5293_v28 = vadd.f32 %v4086_v34, %v4829_v3  ;;  %v5295_v26 = vpop.permute.xlu1 %1864  ;;  %s3708_s0 = sld [smem:[#allocation8 + $0x4e]] }
 0x277   :  { %7546 = vst [vmem:[#allocation215_spill] sm:$0xff] %v5242_v16  ;;  %7548 = vst [vmem:[#allocation217_spill] sm:$0xff] %v5252_v62  ;;  %v5264_v16 = vmul.f32 %v5216_v45, %v5067_v36  ;;  %v5310_v34 = vmul.f32 %v5216_v45, %v1249_v43  ;;  %v5313_v3 = vmul.f32 %v5244_v0, %v1249_v43 }
 0x278   :  { %7549 = vst [vmem:[#allocation218_spill] sm:$0xff] %v5256_v49  ;;  %7551 = vst [vmem:[#allocation220_spill] sm:$0xff] %v5268_v24  ;;  %v5275_v49 = vmul.f32 %v5238_v1, %v5067_v36  ;;  %v5289_v24 = vadd.f32 %v4084_v33, %v4824_v5  ;;  %v2441_v36 = vmul.f32 %v5178_v17, %v4872_v7 }
 0x279   :  { %7550 = vst [vmem:[#allocation219_spill] sm:$0xff] %v5264_v16  ;;  %7554 = vst [vmem:[#allocation223_spill] sm:$0xff] %v5282_v61  ;;  %v5285_v16 = vmul.f32 %v5210_v9, %v1249_v43  ;;  %v2443_v61 = vmul.f32 %v5178_v17, %v4874_v59  ;;  %v5307_v33 = vmul.f32 %v5238_v1, %v1249_v43 }
 0x27a   :  { %7552 = vst [vmem:[#allocation221_spill] sm:$0xff] %v5275_v49  ;;  %7556 = vst [vmem:[#allocation225_spill] sm:$0xff] %v5295_v26  ;;  %v5297_v49 = vpop.permute.xlu0 %1868  ;;  %v1492_v5 = vmul.f32 %v5204_v12, %v1491_v56  ;;  %v5320_v26 = vmul.f32 %v5216_v45, %v1491_v56  ;;  %2454 = vrot.lane.b32.xlu1 %v2441_v36, %s3828_s13  ;;  %v1527_v36 = vstv %s5228_s9 }
 0x27b   :  { %7555 = vst [vmem:[#allocation224_spill] sm:$0xff] %v5285_v16  ;;  %7557 = vst [vmem:[#allocation226_spill] sm:$0xff] %v5297_v49  ;;  %v5304_v16 = vmul.f32 %v5222_v54, %v1249_v43  ;;  %v1493_v49 = vmul.f32 %v5210_v9, %v1491_v56  ;;  %2458 = vrot.lane.b32.xlu0 %v2443_v61, %s3828_s13  ;;  %v5330_v43 = vadd.f32 %v4096_v42, %v4844_v15  ;;  %v5341_v61 = vpop.permute.xlu1 %1870 }
 0x27c   :  { %7559 = vst [vmem:[#allocation228_spill] sm:$0xff] %v5307_v33  ;;  %7560 = vst [vmem:[#allocation229_spill] sm:$0xff] %v5310_v34  ;;  %v5326_v33 = vadd.f32 %v4094_v41, %v4834_v32  ;;  %v5338_v34 = vadd.f32 %v4103_v50, %v4849_v2  ;;  %v2444_v41 = vmul.f32 %v5178_v17, %v4934_v29  ;;  %v7565_v2 = vld [vmem:[#allocation161_spill] sm:$0xff]  ;;  %v1504_v62 = vrot.slane %v1492_v5, 1 }
 0x27d   :  { %7558 = vst [vmem:[#allocation227_spill] sm:$0xff] %v5304_v16  ;;  %7561 = vst [vmem:[#allocation230_spill] sm:$0xff] %v5313_v3  ;;  %v1495_v3 = vmul.f32 %v5222_v54, %v1491_v56  ;;  %v1496_v16 = vmul.f32 %v5238_v1, %v1491_v56  ;;  %v2404_v42 = vmul.f32 %v5100_v21, %v4951_v46  ;;  %v1505_v53 = vrot.slane %v1493_v49, 1 }
 0x27e   :  { %7562 = vst [vmem:[#allocation231_spill] sm:$0xff] %v5320_v26  ;;  %7563 = vst [vmem:[#allocation232_spill] sm:$0xff] %v5341_v61  ;;  %v5343_v23 = vpop.permute.xlu0 %1866  ;;  %v5351_v15 = vadd.f32 %v4105_v51, %v4816_v30  ;;  %v5355_v32 = vadd.f32 %v4112_v57, %v4852_v48  ;;  %v5359_v50 = vadd.f32 %v4114_v58, %v4855_v47  ;;  %2460 = vrot.lane.b32.xlu1 %v2444_v41, %s3828_s13  ;;  %v7568_v48 = vld [vmem:[#allocation162_spill] sm:$0xff]  ;;  %v7573_v41 = vld [vmem:[#allocation163_spill] sm:$0xff] }
 0x27f   :  { %7564 = vst [vmem:[#allocation233_spill] sm:$0xff] %v5343_v23  ;;  %v7566_v23 = vld [vmem:[#allocation13_spill] sm:$0xff]  ;;  %v5367_v63 = vmul.f32 %v5244_v0, %v1491_v56  ;;  %2418 = vrot.lane.b32.xlu0 %v2404_v42, %s3827_s8  ;;  %v1509_v51 = vrot.slane %v1495_v3, 1  ;;  %v1510_v57 = vrot.slane %v1496_v16, 1  ;;  %v1528_v58 = vmul.f32 %v5204_v12, %v1527_v36  ;;  %v7569_v30 = vld [vmem:[#allocation14_spill] sm:$0xff]  ;;  %v5380_v56 = vpop.permute.xlu1 %1872  ;;  %v7574_v42 = vld [vmem:[#allocation15_spill] sm:$0xff] }
 0x280   :  { %v5363_v61 = vadd.f32 %v7566_v23, %v7565_v2  ;;  %v1529_v47 = vmul.f32 %v5210_v9, %v1527_v36  ;;  %v5375_v23 = vadd.f32 %v7569_v30, %v7568_v48  ;;  %v5378_v49 = vmul.f32 %v5216_v45, %v1527_v36  ;;  %7571 = vst [vmem:[#allocation162_spill] sm:$0xff] %v5380_v56  ;;  %v7575_v56 = vld [vmem:[#allocation166_spill] sm:$0xff] }
 0x281   :  { %7567 = vst [vmem:[#allocation161_spill] sm:$0xff] %v5367_v63  ;;  %v2407_v3 = vmul.f32 %v5100_v21, %v4967_v11  ;;  %v2442_v16 = vmul.f32 %v5178_v17, %v4951_v46  ;;  %v5390_v2 = vadd.f32 %v7574_v42, %v7573_v41  ;;  %v1531_v48 = vmul.f32 %v5222_v54, %v1527_v36 }
 0x282   :  { %7570 = vst [vmem:[#allocation13_spill] sm:$0xff] %v5378_v49  ;;  %v5382_v5 = vpop.permute.xlu0 %2018  ;;  %v1532_v30 = vmul.f32 %v5238_v1, %v1527_v36  ;;  %v5402_v52 = vsel %vm440_vm3, %v1504_v62, %v1505_v53  ;;  %v7578_v21 = vrot.slane %v5320_v26, 1  ;;  %v5413_v42 = vsel %vm440_vm3, %v1509_v51, %v1510_v57  ;;  %v7582_v62 = vld [vmem:[#allocation17_spill] sm:$0xff] }
 0x283   :  { %7572 = vst [vmem:[#allocation14_spill] sm:$0xff] %v5382_v5  ;;  %v5399_v5 = vadd.f32 %v7576_v44, %v7575_v56  ;;  %7577 = vst [vmem:[#allocation163_spill] sm:$0xff] %v5402_v52  ;;  %2424 = vrot.lane.b32.xlu1 %v2407_v3, %s3827_s8  ;;  %2456 = vrot.lane.b32.xlu0 %v2442_v16, %s3828_s13  ;;  %v1540_v37 = vrot.slane %v1528_v58, 1  ;;  %v1541_v44 = vrot.slane %v1529_v47, 1  ;;  %v1563_v56 = vstv %s5334_s11  ;;  %v7585_v16 = vld [vmem:[#allocation168_spill] sm:$0xff]  ;;  %v7586_v58 = vld [vmem:[#allocation18_spill] sm:$0xff] }
 0x284   :  { %v5407_v19 = vsel %vm440_vm3, %v1505_v53, %v7578_v21  ;;  %7580 = vst [vmem:[#allocation166_spill] sm:$0xff] %v5413_v42  ;;  %v5418_v52 = vadd.f32 %v7582_v62, %v7581_v4  ;;  %v5421_v53 = vpop.permute.xlu1 %2020  ;;  %v2445_v3 = vmul.f32 %v5178_v17, %v4967_v11  ;;  %v2478_v51 = vmul.f32 %v5395_v40, %v4808_v55 }
 0x285   :  { %7579 = vst [vmem:[#allocation15_spill] sm:$0xff] %v5407_v19  ;;  %7583 = vst [vmem:[#allocation16_spill] sm:$0xff] %v5421_v53  ;;  %v5431_v47 = vadd.f32 %v7586_v58, %v7585_v16  ;;  %v1545_v41 = vrot.slane %v1531_v48, 1  ;;  %v1546_v42 = vrot.slane %v1532_v30, 1  ;;  %v5434_v4 = vmul.f32 %v5244_v0, %v1527_v36  ;;  %v7590_v48 = vld [vmem:[#allocation172_spill] sm:$0xff]  ;;  %v7591_v36 = vld [vmem:[#allocation19_spill] sm:$0xff] }
 0x286   :  { %v5423_v21 = vpop.permute.xlu0 %2024  ;;  %v7588_v62 = vrot.slane %v5367_v63, 1  ;;  %v1564_v17 = vmul.f32 %v5204_v12, %v1563_v56  ;;  %v5451_v30 = vadd.f32 %v7591_v36, %v7590_v48  ;;  %v7592_v16 = vld [vmem:[#allocation173_spill] sm:$0xff]  ;;  %v7593_v58 = vld [vmem:[#allocation20_spill] sm:$0xff]  ;;  %v7596_v63 = vld [vmem:[#allocation22_spill] sm:$0xff] }
 0x287   :  { %7584 = vst [vmem:[#allocation167_spill] sm:$0xff] %v5423_v21  ;;  %7587 = vst [vmem:[#allocation17_spill] sm:$0xff] %v5434_v4  ;;  %v1565_v21 = vmul.f32 %v5210_v9, %v1563_v56  ;;  %2462 = vrot.lane.b32.xlu1 %v2445_v3, %s3828_s13  ;;  %2490 = vrot.lane.b32.xlu0 %v2478_v51, %s3828_s13  ;;  %v5455_v53 = vadd.f32 %v7593_v58, %v7592_v16  ;;  %v7597_v3 = vrot.slane %v5378_v49, 1 }
 0x288   :  { %v5441_v26 = vsel %vm440_vm3, %v1510_v57, %v7588_v62  ;;  %v5458_v57 = vsel %vm440_vm3, %v1540_v37, %v1541_v44  ;;  %v5461_v62 = vmul.f32 %v5216_v45, %v1563_v56  ;;  %v5470_v48 = vpop.permute.xlu1 %2026  ;;  %v2479_v16 = vmul.f32 %v5395_v40, %v4872_v7 }
 0x289   :  { %7589 = vst [vmem:[#allocation168_spill] sm:$0xff] %v5441_v26  ;;  %7594 = vst [vmem:[#allocation18_spill] sm:$0xff] %v5458_v57  ;;  %v344_v26 = vadd.f32 %v7596_v63, %v5260_v60  ;;  %v5468_v51 = vsel %vm440_vm3, %v1541_v44, %v7597_v3  ;;  %v2481_v37 = vmul.f32 %v5395_v40, %v4874_v59  ;;  %v7602_v3 = vld [vmem:[#allocation23_spill] sm:$0xff]  ;;  %v1577_v57 = vrot.slane %v1565_v21, 1  ;;  %v7607_v21 = vld [vmem:[#allocation176_spill] sm:$0xff] }
 0x28a   :  { %7595 = vst [vmem:[#allocation172_spill] sm:$0xff] %v5461_v62  ;;  %7598 = vst [vmem:[#allocation19_spill] sm:$0xff] %v5468_v51  ;;  %v5472_v36 = vpop.permute.xlu0 %2022  ;;  %v5479_v58 = vsel %vm440_vm3, %v1545_v41, %v1546_v42  ;;  %v1567_v60 = vmul.f32 %v5222_v54, %v1563_v56  ;;  %v1568_v44 = vmul.f32 %v5238_v1, %v1563_v56  ;;  %v1576_v51 = vrot.slane %v1564_v17, 1  ;;  %v7604_v41 = vld [vmem:[#allocation25_spill] sm:$0xff] }
 0x28b   :  { %7599 = vst [vmem:[#allocation173_spill] sm:$0xff] %v5470_v48  ;;  %7600 = vst [vmem:[#allocation20_spill] sm:$0xff] %v5472_v36  ;;  %v345_v48 = vadd.f32 %v7602_v3, %v5289_v24  ;;  %v7603_v36 = vld [vmem:[#allocation24_spill] sm:$0xff]  ;;  %2492 = vrot.lane.b32.xlu1 %v2479_v16, %s3828_s13  ;;  %2496 = vrot.lane.b32.xlu0 %v2481_v37, %s3828_s13  ;;  %v347_v63 = vadd.f32 %v7604_v41, %v5326_v33  ;;  %v7608_v17 = vld [vmem:[#allocation21_spill] sm:$0xff] }
 0x28c   :  { %7601 = vst [vmem:[#allocation22_spill] sm:$0xff] %v5479_v58  ;;  %v346_v49 = vadd.f32 %v7603_v36, %v5293_v28  ;;  %v7605_v58 = vld [vmem:[#allocation26_spill] sm:$0xff]  ;;  %v5498_v28 = vmul.f32 %v5244_v0, %v1563_v56  ;;  %v5502_v36 = vadd.f32 %v7608_v17, %v7607_v21  ;;  %v5505_v16 = vadd.f32 %v4985_v20, %v344_v26  ;;  %v5507_v37 = vpop.permute.xlu1 %2028  ;;  %v7614_v24 = vld [vmem:[#allocation179_spill] sm:$0xff] }
 0x28d   :  { %v348_v19 = vadd.f32 %v7605_v58, %v5330_v43  ;;  %7609 = vst [vmem:[#allocation24_spill] sm:$0xff] %v5507_v37  ;;  %v2482_v33 = vmul.f32 %v5395_v40, %v4934_v29  ;;  %v2480_v43 = vmul.f32 %v5395_v40, %v4951_v46  ;;  %v7611_v56 = vrot.slane %v5434_v4, 1 }
 0x28e   :  { %7606 = vst [vmem:[#allocation23_spill] sm:$0xff] %v5498_v28  ;;  %v5509_v3 = vpop.permute.xlu0 %2066  ;;  %v1581_v41 = vrot.slane %v1567_v60, 1  ;;  %v1582_v21 = vrot.slane %v1568_v44, 1  ;;  %v5521_v17 = vstv %s5436_s12  ;;  %v7613_v20 = vrot.slane %v4884_v8, 1 }
 0x28f   :  { %7610 = vst [vmem:[#allocation25_spill] sm:$0xff] %v5509_v3  ;;  %v5518_v58 = vsel %vm440_vm3, %v1546_v42, %v7611_v56  ;;  %v5528_v3 = vadd.f32 %v7614_v24, %v345_v48  ;;  %v5531_v37 = vsel %vm440_vm3, %v1576_v51, %v1577_v57  ;;  %2498 = vrot.lane.b32.xlu1 %v2482_v33, %s3828_s13  ;;  %v7616_v8 = vrot.slane %v5461_v62, 1  ;;  %v7618_v51 = vld [vmem:[#allocation27_spill] sm:$0xff]  ;;  %v7619_v24 = vld [vmem:[#allocation28_spill] sm:$0xff] }
 0x290   :  { %7612 = vst [vmem:[#allocation26_spill] sm:$0xff] %v5518_v58  ;;  %v5525_v26 = vadd.f32 %v7613_v20, %v346_v49  ;;  %7615 = vst [vmem:[#allocation176_spill] sm:$0xff] %v5531_v37  ;;  %2494 = vrot.lane.b32.xlu0 %v2480_v43, %s3828_s13  ;;  %v5537_v42 = vadd.f32 %v5007_v6, %v348_v19  ;;  %v5540_v60 = vadd.f32 %v5014_v31, %v347_v63  ;;  %v5554_v6 = vpop.permute.xlu1 %2068  ;;  %v7622_v63 = vld [vmem:[#allocation29_spill] sm:$0xff] }
 0x291   :  { %v5545_v49 = vsel %vm440_vm3, %v1577_v57, %v7616_v8  ;;  %v349_v44 = vadd.f32 %v7618_v51, %v5338_v34  ;;  %v382_v33 = vadd.f32 %v7619_v24, %v5351_v15  ;;  %7620 = vst [vmem:[#allocation179_spill] sm:$0xff] %v5554_v6  ;;  %v2483_v19 = vmul.f32 %v5395_v40, %v4967_v11  ;;  %v7623_v34 = vld [vmem:[#allocation30_spill] sm:$0xff]  ;;  %v7625_v8 = vld [vmem:[#allocation31_spill] sm:$0xff]  ;;  %v7626_v24 = vld [vmem:[#allocation32_spill] sm:$0xff] }
 0x292   :  { %7617 = vst [vmem:[#allocation21_spill] sm:$0xff] %v5545_v49  ;;  %v5556_v31 = vpop.permute.xlu0 %2072  ;;  %v2516_v57 = vmul.f32 %v5521_v17, %v4808_v55  ;;  %v383_v43 = vadd.f32 %v7622_v63, %v5355_v32  ;;  %v384_v56 = vadd.f32 %v7623_v34, %v5359_v50  ;;  %v5567_v15 = vsel %vm440_vm3, %v1581_v41, %v1582_v21 }
 0x293   :  { %7621 = vst [vmem:[#allocation27_spill] sm:$0xff] %v5556_v31  ;;  %7624 = vst [vmem:[#allocation28_spill] sm:$0xff] %v5567_v15  ;;  %v1888_v20 = vmul.f32 %v5204_v12, %v1887_v18  ;;  %v385_v51 = vadd.f32 %v7625_v8, %v5363_v61  ;;  %v386_v40 = vadd.f32 %v7626_v24, %v5375_v23  ;;  %2500 = vrot.lane.b32.xlu1 %v2483_v19, %s3828_s13  ;;  %v7633_v31 = vld [vmem:[#allocation169_spill] sm:$0xff] }
 0x294   :  { %v1889_v48 = vmul.f32 %v5210_v9, %v1887_v18  ;;  %2528 = vrot.lane.b32.xlu0 %v2516_v57, %s3828_s13  ;;  %v2661_v32 = vstv %s5490_s15  ;;  %v7627_v50 = vrot.slane %v5498_v28, 1  ;;  %v5584_v63 = vmul.f32 %v5216_v45, %v1887_v18  ;;  %v5597_v57 = vpop.permute.xlu1 %2074 }
 0x295   :  { %v1891_v61 = vmul.f32 %v5222_v54, %v1887_v18  ;;  %v5588_v34 = vmul.f32 %v5238_v1, %v1887_v18  ;;  %v7630_v23 = vrot.slane %v4888_v14, 1  ;;  %v5595_v19 = vadd.f32 %v5017_v38, %v382_v33  ;;  %7631 = vst [vmem:[#allocation31_spill] sm:$0xff] %v5597_v57  ;;  %v7635_v33 = vld [vmem:[#allocation183_spill] sm:$0xff] }
 0x296   :  { %v5581_v41 = vsel %vm440_vm3, %v1582_v21, %v7627_v50  ;;  %7629 = vst [vmem:[#allocation30_spill] sm:$0xff] %v5584_v63  ;;  %v5599_v24 = vpop.permute.xlu0 %2070  ;;  %v2517_v21 = vmul.f32 %v5521_v17, %v4872_v7  ;;  %v2519_v50 = vmul.f32 %v5521_v17, %v4874_v59  ;;  %v7634_v6 = vrot.slane %v7633_v31, 1 }
 0x297   :  { %7628 = vst [vmem:[#allocation29_spill] sm:$0xff] %v5581_v41  ;;  %v5592_v8 = vadd.f32 %v7630_v23, %v349_v44  ;;  %7632 = vst [vmem:[#allocation32_spill] sm:$0xff] %v5599_v24  ;;  %v5610_v14 = vadd.f32 %v5030_v25, %v383_v43  ;;  %v2662_v38 = vmul.f32 %v2661_v32, %v4808_v55  ;;  %v1900_v57 = vrot.slane %v1888_v20, 2  ;;  %v7640_v25 = vld [vmem:[#allocation34_spill] sm:$0xff] }
 0x298   :  { %v5607_v28 = vadd.f32 %v7634_v6, %v384_v56  ;;  %v2663_v44 = vmul.f32 %v2661_v32, %v4872_v7  ;;  %v5615_v23 = vadd.f32 %v7635_v33, %v386_v40  ;;  %v5618_v24 = vadd.f32 %v5046_v39, %v385_v51  ;;  %2530 = vrot.lane.b32.xlu1 %v2517_v21, %s3828_s13  ;;  %v5630_v40 = vpop.permute.xlu1 %2076 }
 0x299   :  { %v1901_v62 = vrot.slane %v1889_v48, 2  ;;  %2534 = vrot.lane.b32.xlu0 %v2519_v50, %s3828_s13  ;;  %v1905_v6 = vrot.slane %v1891_v61, 2  ;;  %v1906_v31 = vrot.slane %v5588_v34, 2  ;;  %v5627_v43 = vmul.f32 %v5244_v0, %v1887_v18  ;;  %7637 = vst [vmem:[#allocation183_spill] sm:$0xff] %v5630_v40  ;;  %v7639_v50 = vld [vmem:[#allocation33_spill] sm:$0xff] }
 0x29a   :  { %v1923_v56 = vstv %s5552_s16  ;;  %v5634_v39 = vpop.permute.xlu0 %2114  ;;  %v2520_v48 = vmul.f32 %v5521_v17, %v4934_v29  ;;  %v2518_v20 = vmul.f32 %v5521_v17, %v4951_v46  ;;  %v5641_v51 = vmul.f32 %v2661_v32, %v4951_v46 }
 0x29b   :  { %7636 = vst [vmem:[#allocation169_spill] sm:$0xff] %v5627_v43  ;;  %7638 = vst [vmem:[#allocation234_spill] sm:$0xff] %v5634_v39  ;;  %v2674_v61 = vrot.slane %v2662_v38, 1  ;;  %v2675_v34 = vrot.slane %v2663_v44, 1  ;;  %v2665_v18 = vmul.f32 %v2661_v32, %v4874_v59  ;;  %v2666_v21 = vmul.f32 %v2661_v32, %v4934_v29 }
 0x29c   :  { %v387_v33 = vadd.f32 %v7639_v50, %v5390_v2  ;;  %v420_v39 = vadd.f32 %v7640_v25, %v5399_v5  ;;  %v5650_v40 = vsel %vm837_vm4, %v1900_v57, %v1901_v62  ;;  %2536 = vrot.lane.b32.xlu1 %v2520_v48, %s3828_s13  ;;  %v7642_v38 = vrot.slane %v5584_v63, 2  ;;  %v7645_v5 = vld [vmem:[#allocation36_spill] sm:$0xff]  ;;  %v5667_v48 = vpop.permute.xlu1 %2116 }
 0x29d   :  { %7641 = vst [vmem:[#allocation33_spill] sm:$0xff] %v5650_v40  ;;  %2532 = vrot.lane.b32.xlu0 %v2518_v20, %s3828_s13  ;;  %v5660_v41 = vsel %vm837_vm4, %v1905_v6, %v1906_v31  ;;  %v1924_v2 = vmul.f32 %v5204_v12, %v1923_v56  ;;  %v1925_v50 = vmul.f32 %v5210_v9, %v1923_v56  ;;  %7646 = vst [vmem:[#allocation36_spill] sm:$0xff] %v5667_v48 }
 0x29e   :  { %v5657_v44 = vsel %vm837_vm4, %v1901_v62, %v7642_v38  ;;  %7644 = vst [vmem:[#allocation235_spill] sm:$0xff] %v5660_v41  ;;  %v422_v57 = vadd.f32 %v7645_v5, %v5431_v47  ;;  %v5669_v20 = vpop.permute.xlu0 %2120  ;;  %v2521_v62 = vmul.f32 %v5521_v17, %v4967_v11  ;;  %v2677_v6 = vrot.slane %v5641_v51, 1  ;;  %v7649_v51 = vld [vmem:[#allocation35_spill] sm:$0xff] }
 0x29f   :  { %7643 = vst [vmem:[#allocation34_spill] sm:$0xff] %v5657_v44  ;;  %7647 = vst [vmem:[#allocation236_spill] sm:$0xff] %v5669_v20  ;;  %v2676_v38 = vsel %vm440_vm3, %v2674_v61, %v2675_v34  ;;  %v2679_v63 = vrot.slane %v2665_v18, 1  ;;  %v2680_v41 = vrot.slane %v2666_v21, 1  ;;  %v5676_v44 = vmul.f32 %v2661_v32, %v4967_v11  ;;  %v7650_v18 = vld [vmem:[#allocation170_spill] sm:$0xff] }
 0x2a0   :  { %v5679_v47 = vmul.f32 %v5216_v45, %v1923_v56  ;;  %v1927_v5 = vmul.f32 %v5222_v54, %v1923_v56  ;;  %v5683_v25 = vmul.f32 %v5238_v1, %v1923_v56  ;;  %2538 = vrot.lane.b32.xlu1 %v2521_v62, %s3828_s13  ;;  %v2709_v17 = vstv %s5622_s17 }
 0x2a1   :  { %2684 = vrot.lane.b32.xlu0 %v2676_v38, %s3827_s8  ;;  %v421_v61 = vadd.f32 %v7649_v51, %v5418_v52  ;;  %v7651_v21 = vrot.slane %v7650_v18, 1  ;;  %v1936_v20 = vrot.slane %v1924_v2, 2  ;;  %v1937_v48 = vrot.slane %v1925_v50, 2  ;;  %v5703_v38 = vpop.permute.xlu1 %2122 }
 0x2a2   :  { %7648 = vst [vmem:[#allocation237_spill] sm:$0xff] %v5679_v47  ;;  %v5695_v40 = vadd.f32 %v5049_v10, %v420_v39  ;;  %v7652_v15 = vrot.slane %v5627_v43, 2  ;;  %v1959_v62 = vstv %s5632_s18  ;;  %7654 = vst [vmem:[#allocation170_spill] sm:$0xff] %v5703_v38  ;;  %v5705_v37 = vpop.permute.xlu0 %2162  ;;  %v2678_v52 = vsel %vm440_vm3, %v2675_v34, %v2677_v6 }
 0x2a3   :  { %v5692_v32 = vadd.f32 %v7651_v21, %v387_v33  ;;  %7655 = vst [vmem:[#allocation238_spill] sm:$0xff] %v5705_v37  ;;  %v2681_v33 = vsel %vm440_vm3, %v2679_v63, %v2680_v41  ;;  %v2682_v2 = vrot.slane %v5676_v44, 1  ;;  %v2710_v10 = vmul.f32 %v2709_v17, %v4808_v55  ;;  %v7657_v63 = vld [vmem:[#allocation37_spill] sm:$0xff]  ;;  %v7658_v44 = vld [vmem:[#allocation186_spill] sm:$0xff] }
 0x2a4   :  { %v5700_v49 = vsel %vm837_vm4, %v1906_v31, %v7652_v15  ;;  %v2711_v39 = vmul.f32 %v2709_v17, %v4872_v7  ;;  %v7656_v15 = vrot.slane %v4910_v13, 1  ;;  %v7308_v50 = vrot.slane %v5679_v47, 2  ;;  %2686 = vrot.lane.b32.xlu1 %v2678_v52, %s3827_s8 }
 0x2a5   :  { %7653 = vst [vmem:[#allocation35_spill] sm:$0xff] %v5700_v49  ;;  %v1941_v51 = vrot.slane %v1927_v5, 2  ;;  %v1942_v18 = vrot.slane %v5683_v25, 2  ;;  %2690 = vrot.lane.b32.xlu0 %v2681_v33, %s3827_s8  ;;  %v423_v34 = vadd.f32 %v7657_v63, %v5451_v30  ;;  %v5725_v21 = vadd.f32 %v7658_v44, %v421_v61  ;;  %v5735_v5 = vpop.permute.xlu1 %2164  ;;  %v7663_v63 = vld [vmem:[#allocation38_spill] sm:$0xff] }
 0x2a6   :  { %v5716_v31 = vadd.f32 %v7656_v15, %v422_v57  ;;  %v5728_v37 = vsel %vm837_vm4, %v1936_v20, %v1937_v48  ;;  %v5731_v13 = vmul.f32 %v5244_v0, %v1923_v56  ;;  %v1960_v57 = vmul.f32 %v5204_v12, %v1959_v62  ;;  %7661 = vst [vmem:[#allocation239_spill] sm:$0xff] %v5735_v5  ;;  %v5737_v52 = vpop.permute.xlu0 %2168 }
 0x2a7   :  { %7659 = vst [vmem:[#allocation37_spill] sm:$0xff] %v5728_v37  ;;  %v1961_v25 = vmul.f32 %v5210_v9, %v1959_v62  ;;  %7662 = vst [vmem:[#allocation240_spill] sm:$0xff] %v5737_v52  ;;  %v5740_v33 = vmul.f32 %v2709_v17, %v4951_v46  ;;  %v2713_v30 = vmul.f32 %v2709_v17, %v4874_v59  ;;  %v2722_v20 = vrot.slane %v2710_v10, 1 }
 0x2a8   :  { %7660 = vst [vmem:[#allocation186_spill] sm:$0xff] %v5731_v13  ;;  %v2683_v61 = vsel %vm440_vm3, %v2680_v41, %v2682_v2  ;;  %v2723_v15 = vrot.slane %v2711_v39, 1  ;;  %v2714_v56 = vmul.f32 %v2709_v17, %v4934_v29  ;;  %v424_v12 = vadd.f32 %v7663_v63, %v5455_v53  ;;  %v7666_v41 = vld [vmem:[#allocation39_spill] sm:$0xff] }
 0x2a9   :  { %v5750_v9 = vsel %vm837_vm4, %v1937_v48, %v7308_v50  ;;  %v5753_v44 = vsel %vm837_vm4, %v1941_v51, %v1942_v18  ;;  %2692 = vrot.lane.b32.xlu1 %v2683_v61, %s3827_s8  ;;  %2688 = vrot.lane.b32.xlu0 %v2677_v6, %s3827_s8  ;;  %v425_v10 = vadd.f32 %v7666_v41, %v5502_v36  ;;  %v1972_v63 = vrot.slane %v1960_v57, 2  ;;  %v5766_v51 = vpop.permute.xlu1 %2170 }
 0x2aa   :  { %7664 = vst [vmem:[#allocation38_spill] sm:$0xff] %v5750_v9  ;;  %7665 = vst [vmem:[#allocation241_spill] sm:$0xff] %v5753_v44  ;;  %v5763_v53 = vmul.f32 %v5216_v45, %v1959_v62  ;;  %v1963_v48 = vmul.f32 %v5222_v54, %v1959_v62  ;;  %v1973_v50 = vrot.slane %v1961_v25, 2  ;;  %v5768_v52 = vpop.permute.xlu0 %2118  ;;  %v5771_v6 = vmul.f32 %v2709_v17, %v4967_v11  ;;  %v7670_v45 = vld [vmem:[#allocation187_spill] sm:$0xff]  ;;  %v7671_v54 = vld [vmem:[#allocation188_spill] sm:$0xff] }
 0x2ab   :  { %7668 = vst [vmem:[#allocation242_spill] sm:$0xff] %v5766_v51  ;;  %7669 = vst [vmem:[#allocation243_spill] sm:$0xff] %v5768_v52  ;;  %v2757_v61 = vstv %s5708_s19  ;;  %v2724_v5 = vsel %vm440_vm3, %v2722_v20, %v2723_v15  ;;  %v2725_v36 = vrot.slane %v5740_v33, 1  ;;  %v2727_v41 = vrot.slane %v2713_v30, 1  ;;  %v7672_v17 = vld [vmem:[#allocation40_spill] sm:$0xff]  ;;  %v7673_v20 = vld [vmem:[#allocation171_spill] sm:$0xff] }
 0x2ac   :  { %7667 = vst [vmem:[#allocation39_spill] sm:$0xff] %v5763_v53  ;;  %v2728_v39 = vrot.slane %v2714_v56, 1  ;;  %v5777_v47 = vadd.f32 %v7670_v45, %v424_v12  ;;  %v5780_v57 = vadd.f32 %v7671_v54, %v423_v34  ;;  %v1964_v25 = vmul.f32 %v5238_v1, %v1959_v62 }
 0x2ad   :  { %2694 = vrot.lane.b32.xlu1 %v2682_v2, %s3827_s8  ;;  %2732 = vrot.lane.b32.xlu0 %v2724_v5, %s3827_s8  ;;  %v5787_v52 = vadd.f32 %v7672_v17, %v5525_v26  ;;  %v7674_v33 = vrot.slane %v7673_v20, 1  ;;  %v7675_v56 = vrot.slane %v5731_v13, 2  ;;  %v5797_v34 = vmul.f32 %v5244_v0, %v1959_v62  ;;  %v5800_v5 = vpop.permute.xlu1 %2124  ;;  %v7681_v17 = vld [vmem:[#allocation41_spill] sm:$0xff] }
 0x2ae   :  { %v7311_v1 = vrot.slane %v5763_v53, 2  ;;  %v1977_v2 = vrot.slane %v1963_v48, 2  ;;  %7678 = vst [vmem:[#allocation40_spill] sm:$0xff] %v5800_v5  ;;  %v5802_v45 = vpop.permute.xlu0 %2166  ;;  %v2730_v26 = vrot.slane %v5771_v6, 1  ;;  %v5807_v54 = vsel %vm837_vm4, %v1972_v63, %v1973_v50 }
 0x2af   :  { %v534_v30 = vadd.f32 %v7674_v33, %v425_v10  ;;  %v5794_v12 = vsel %vm837_vm4, %v1942_v18, %v7675_v56  ;;  %7677 = vst [vmem:[#allocation188_spill] sm:$0xff] %v5797_v34  ;;  %7679 = vst [vmem:[#allocation171_spill] sm:$0xff] %v5802_v45  ;;  %v2758_v10 = vmul.f32 %v2757_v61, %v4808_v55  ;;  %v1978_v20 = vrot.slane %v1964_v25, 2 }
 0x2b0   :  { %7676 = vst [vmem:[#allocation187_spill] sm:$0xff] %v5794_v12  ;;  %7680 = vst [vmem:[#allocation244_spill] sm:$0xff] %v5807_v54  ;;  %v2726_v18 = vsel %vm440_vm3, %v2723_v15, %v2725_v36  ;;  %v2729_v0 = vsel %vm440_vm3, %v2727_v41, %v2728_v39  ;;  %v2759_v62 = vmul.f32 %v2757_v61, %v4872_v7  ;;  %v2805_v63 = vstv %s5757_s20  ;;  %v7682_v15 = vld [vmem:[#allocation42_spill] sm:$0xff] }
 0x2b1   :  { %v5814_v48 = vadd.f32 %v7681_v17, %v5592_v8  ;;  %2734 = vrot.lane.b32.xlu1 %v2726_v18, %s3827_s8  ;;  %2738 = vrot.lane.b32.xlu0 %v2729_v0, %s3827_s8  ;;  %v5819_v6 = vmul.f32 %v2757_v61, %v4951_v46  ;;  %v5826_v41 = vadd.f32 %v7682_v15, %v5607_v28  ;;  %v5836_v18 = vpop.permute.xlu1 %2172  ;;  %v2770_v54 = vrot.slane %v2758_v10, 1 }
 0x2b2   :  { %v2761_v8 = vmul.f32 %v2757_v61, %v4874_v59  ;;  %v2762_v25 = vmul.f32 %v2757_v61, %v4934_v29  ;;  %v5834_v56 = vsel %vm837_vm4, %v1973_v50, %v7311_v1  ;;  %7684 = vst [vmem:[#allocation42_spill] sm:$0xff] %v5836_v18  ;;  %v5838_v0 = vpop.permute.xlu0 %2210  ;;  %v2731_v17 = vsel %vm440_vm3, %v2728_v39, %v2730_v26  ;;  %v7686_v1 = vld [vmem:[#allocation43_spill] sm:$0xff]  ;;  %v7687_v39 = vld [vmem:[#allocation44_spill] sm:$0xff] }
 0x2b3   :  { %7683 = vst [vmem:[#allocation41_spill] sm:$0xff] %v5834_v56  ;;  %7685 = vst [vmem:[#allocation245_spill] sm:$0xff] %v5838_v0  ;;  %v5842_v28 = vmul.f32 %v2757_v61, %v4967_v11  ;;  %v2771_v15 = vrot.slane %v2759_v62, 1  ;;  %v2806_v33 = vmul.f32 %v2805_v63, %v4808_v55  ;;  %v2807_v13 = vmul.f32 %v2805_v63, %v4872_v7  ;;  %v7689_v55 = vld [vmem:[#allocation45_spill] sm:$0xff] }
 0x2b4   :  { %v5849_v50 = vmul.f32 %v2805_v63, %v4951_v46  ;;  %v5853_v18 = vadd.f32 %v7686_v1, %v5692_v32  ;;  %v5857_v10 = vadd.f32 %v7687_v39, %v5716_v31  ;;  %v5860_v61 = vsel %vm837_vm4, %v1977_v2, %v1978_v20  ;;  %v7692_v39 = vld [vmem:[#allocation46_spill] sm:$0xff] }
 0x2b5   :  { %7688 = vst [vmem:[#allocation43_spill] sm:$0xff] %v5860_v61  ;;  %2740 = vrot.lane.b32.xlu1 %v2731_v17, %s3827_s8  ;;  %2736 = vrot.lane.b32.xlu0 %v2725_v36, %s3827_s8  ;;  %v5866_v62 = vadd.f32 %v7689_v55, %v534_v30  ;;  %v7690_v0 = vrot.slane %v5797_v34, 2  ;;  %v2775_v1 = vrot.slane %v2761_v8, 1  ;;  %v2776_v31 = vrot.slane %v2762_v25, 1  ;;  %v5877_v17 = vpop.permute.xlu1 %2212 }
 0x2b6   :  { %v5875_v2 = vadd.f32 %v7692_v39, %v5505_v16  ;;  %7693 = vst [vmem:[#allocation45_spill] sm:$0xff] %v5877_v17  ;;  %v5879_v36 = vpop.permute.xlu0 %2216  ;;  %v2809_v30 = vmul.f32 %v2805_v63, %v4874_v59  ;;  %v2810_v55 = vmul.f32 %v2805_v63, %v4934_v29  ;;  %v2819_v8 = vrot.slane %v2807_v13, 1  ;;  %v7695_v16 = vld [vmem:[#allocation47_spill] sm:$0xff] }
 0x2b7   :  { %v5871_v32 = vsel %vm837_vm4, %v1978_v20, %v7690_v0  ;;  %7694 = vst [vmem:[#allocation46_spill] sm:$0xff] %v5879_v36  ;;  %v2772_v20 = vsel %vm440_vm3, %v2770_v54, %v2771_v15  ;;  %v2818_v0 = vrot.slane %v2806_v33, 1  ;;  %v5890_v39 = vadd.f32 %v7695_v16, %v5528_v3  ;;  %v7696_v36 = vld [vmem:[#allocation48_spill] sm:$0xff]  ;;  %v7698_v33 = vld [vmem:[#allocation49_spill] sm:$0xff]  ;;  %v7699_v16 = vld [vmem:[#allocation50_spill] sm:$0xff] }
 0x2b8   :  { %7691 = vst [vmem:[#allocation44_spill] sm:$0xff] %v5871_v32  ;;  %v5894_v7 = vadd.f32 %v7696_v36, %v5537_v42  ;;  %v7697_v59 = vrot.slane %v5819_v6, 1  ;;  %v2853_v54 = vstv %s5822_s21  ;;  %v5906_v3 = vadd.f32 %v7698_v33, %v5540_v60 }
 0x2b9   :  { %2742 = vrot.lane.b32.xlu1 %v2730_v26, %s3827_s8  ;;  %2780 = vrot.lane.b32.xlu0 %v2772_v20, %s3827_s8  ;;  %v5910_v25 = vadd.f32 %v7699_v16, %v5595_v19  ;;  %v2777_v42 = vsel %vm440_vm3, %v2775_v1, %v2776_v31  ;;  %v5914_v26 = vmul.f32 %v2805_v63, %v4967_v11  ;;  %v5916_v36 = vpop.permute.xlu1 %2218  ;;  %v2823_v17 = vrot.slane %v2809_v30, 1  ;;  %v5928_v16 = vld [vmem:[#allocation2 + $0x30] sm:$0xff]  ;;  %v5939_v30 = vld [vmem:[#allocation2 + $0x78] sm:$0xff] }
 0x2ba   :  { %v2774_v13 = vsel %vm440_vm3, %v2771_v15, %v7697_v59  ;;  %7700 = vst [vmem:[#allocation47_spill] sm:$0xff] %v5916_v36  ;;  %v5918_v20 = vpop.permute.xlu0 %2214  ;;  %v7702_v15 = vrot.slane %v5842_v28, 1  ;;  %v2824_v60 = vrot.slane %v2810_v55, 1  ;;  %v2283_v33 = vstv %s5844_s22  ;;  %v5931_v36 = vld [vmem:[#allocation2 + $0x38] sm:$0xff] }
 0x2bb   :  { %7701 = vst [vmem:[#allocation48_spill] sm:$0xff] %v5918_v20  ;;  %v2820_v45 = vsel %vm440_vm3, %v2818_v0, %v2819_v8  ;;  %v7703_v19 = vrot.slane %v5849_v50, 1  ;;  %v2854_v63 = vmul.f32 %v5928_v16, %v2853_v54  ;;  %v2855_v20 = vmul.f32 %v5931_v36, %v2853_v54 }
 0x2bc   :  { %v2779_v59 = vsel %vm440_vm3, %v2776_v31, %v7702_v15  ;;  %v5937_v31 = vmul.f32 %v2853_v54, %v4951_v46  ;;  %v2857_v55 = vmul.f32 %v5939_v30, %v2853_v54  ;;  %v2858_v0 = vmul.f32 %v2853_v54, %v4934_v29  ;;  %v7707_v46 = vld [vmem:[#allocation52_spill] sm:$0xff] }
 0x2bd   :  { %v2822_v1 = vsel %vm440_vm3, %v2819_v8, %v7703_v19  ;;  %2782 = vrot.lane.b32.xlu1 %v2774_v13, %s3827_s8  ;;  %2786 = vrot.lane.b32.xlu0 %v2777_v42, %s3827_s8  ;;  %v7704_v8 = vld [vmem:[#allocation51_spill] sm:$0xff]  ;;  %v5949_v13 = vmul.f32 %v5928_v16, %v2283_v33  ;;  %v5952_v42 = vmul.f32 %v5931_v36, %v2283_v33  ;;  %v5958_v51 = vpop.permute.xlu1 %2220  ;;  %v2297_v53 = vstv %s5902_s24 }
 0x2be   :  { %v5945_v15 = vadd.f32 %v7704_v8, %v5610_v14  ;;  %v5956_v5 = vadd.f32 %v7707_v46, %v5615_v23  ;;  %7708 = vst [vmem:[#allocation51_spill] sm:$0xff] %v5958_v51  ;;  %v5960_v29 = vpop.permute.xlu0 %2258  ;;  %v2825_v14 = vsel %vm440_vm3, %v2823_v17, %v2824_v60  ;;  %v5964_v8 = vmul.f32 %v5939_v30, %v2283_v33  ;;  %v5966_v19 = vld [vmem:[#allocation2 + $0x80] sm:$0xff] }
 0x2bf   :  { %7705 = vst [vmem:[#allocation49_spill] sm:$0xff] %v5949_v13  ;;  %7706 = vst [vmem:[#allocation50_spill] sm:$0xff] %v5952_v42  ;;  %v5969_v34 = vmul.f32 %v5966_v19, %v2283_v33  ;;  %v2866_v42 = vrot.slane %v2854_v63, 1  ;;  %v2867_v23 = vrot.slane %v2855_v20, 1  ;;  %v5974_v46 = vmul.f32 %v2853_v54, %v4967_v11  ;;  %v5990_v63 = vld [vmem:[#allocation2 + $0x40] sm:$0x3f] }
 0x2c0   :  { %7709 = vst [vmem:[#allocation52_spill] sm:$0xff] %v5960_v29  ;;  %7710 = vst [vmem:[#allocation246_spill] sm:$0xff] %v5964_v8  ;;  %v2901_v51 = vstv %s5886_s23  ;;  %v2871_v29 = vrot.slane %v2857_v55, 1  ;;  %v2872_v8 = vrot.slane %v2858_v0, 1  ;;  %v7713_v20 = vrot.slane %v5914_v26, 1 }
 0x2c1   :  { %7711 = vst [vmem:[#allocation247_spill] sm:$0xff] %v5969_v34  ;;  %2788 = vrot.lane.b32.xlu1 %v2779_v59, %s3827_s8  ;;  %2828 = vrot.lane.b32.xlu0 %v2820_v45, %s3828_s13  ;;  %v7712_v34 = vld [vmem:[#allocation53_spill] sm:$0xff]  ;;  %v5993_v38 = vmul.f32 %v5990_v63, %v2283_v33  ;;  %v5996_v45 = vmul.f32 %v2283_v33, %v4967_v11  ;;  %v7716_v59 = vld [vmem:[#allocation54_spill] sm:$0xff]  ;;  %v6002_v0 = vpop.permute.xlu1 %2260  ;;  %v7731_v44 = vrot.slane %v5819_v6, 1  ;;  %v7779_v56 = vrot.slane %v5974_v46, 1 }
 0x2c2   :  { %v5985_v13 = vadd.f32 %v7712_v34, %v5618_v24  ;;  %v2827_v54 = vsel %vm440_vm3, %v2824_v60, %v7713_v20  ;;  %v6000_v55 = vadd.f32 %v7716_v59, %v5695_v40  ;;  %7717 = vst [vmem:[#allocation54_spill] sm:$0xff] %v6002_v0  ;;  %v6004_v24 = vpop.permute.xlu0 %2264  ;;  %v2902_v34 = vmul.f32 %v5928_v16, %v2901_v51 }
 0x2c3   :  { %7714 = vst [vmem:[#allocation53_spill] sm:$0xff] %v5993_v38  ;;  %7715 = vst [vmem:[#allocation248_spill] sm:$0xff] %v5996_v45  ;;  %v2903_v60 = vmul.f32 %v5931_v36, %v2901_v51  ;;  %v6009_v20 = vmul.f32 %v5990_v63, %v2901_v51  ;;  %v6012_v17 = vsel %vm440_vm3, %v2866_v42, %v2867_v23  ;;  %v7721_v59 = vrot.slane %v5937_v31, 1 }
 0x2c4   :  { %7718 = vst [vmem:[#allocation249_spill] sm:$0xff] %v6004_v24  ;;  %v6015_v11 = vmul.f32 %v5928_v16, %v2297_v53  ;;  %v6019_v33 = vmul.f32 %v5931_v36, %v2297_v53  ;;  %v6034_v40 = vmul.f32 %v5939_v30, %v2297_v53  ;;  %v2906_v38 = vmul.f32 %v5966_v19, %v2901_v51 }
 0x2c5   :  { %2830 = vrot.lane.b32.xlu1 %v2822_v1, %s3828_s13  ;;  %2834 = vrot.lane.b32.xlu0 %v2825_v14, %s3828_s13  ;;  %v6028_v42 = vsel %vm440_vm3, %v2867_v23, %v7721_v59  ;;  %v6041_v1 = vmul.f32 %v5966_v19, %v2297_v53  ;;  %v2905_v14 = vmul.f32 %v5939_v30, %v2901_v51  ;;  %v6045_v23 = vpop.permute.xlu1 %2266  ;;  %v2915_v12 = vrot.slane %v2903_v60, 1 }
 0x2c6   :  { %7719 = vst [vmem:[#allocation250_spill] sm:$0xff] %v6015_v11  ;;  %7720 = vst [vmem:[#allocation251_spill] sm:$0xff] %v6019_v33  ;;  %v6031_v11 = vsel %vm440_vm3, %v2871_v29, %v2872_v8  ;;  %v7723_v33 = vld [vmem:[#allocation55_spill] sm:$0xff]  ;;  %v6047_v59 = vpop.permute.xlu0 %2262  ;;  %v2914_v29 = vrot.slane %v2902_v34, 1  ;;  %v6063_v37 = vmul.f32 %v5990_v63, %v2297_v53  ;;  %v7730_v34 = vld [vmem:[#allocation58_spill] sm:$0xff]  ;;  %v7741_v24 = vrot.slane %v5842_v28, 1 }
 0x2c7   :  { %7722 = vst [vmem:[#allocation252_spill] sm:$0xff] %v6034_v40  ;;  %v6038_v45 = vadd.f32 %v7723_v33, %v5725_v21  ;;  %7724 = vst [vmem:[#allocation55_spill] sm:$0xff] %v6041_v1  ;;  %v6051_v40 = vstv %s5971_s25  ;;  %v7727_v21 = vld [vmem:[#allocation56_spill] sm:$0xff]  ;;  %v7728_v1 = vrot.slane %v5974_v46, 1  ;;  %v721_v60 = vadd.f32 %v7730_v34, %v5875_v2 }
 0x2c8   :  { %7725 = vst [vmem:[#allocation253_spill] sm:$0xff] %v6045_v23  ;;  %7726 = vst [vmem:[#allocation254_spill] sm:$0xff] %v6047_v59  ;;  %v6055_v33 = vadd.f32 %v7727_v21, %v5777_v47  ;;  %v3057_v23 = vstv %s5977_s26  ;;  %v6072_v47 = vld [vmem:[#allocation2 + $0x88] sm:$0x3f]  ;;  %v2919_v2 = vrot.slane %v2905_v14, 1  ;;  %v2920_v34 = vrot.slane %v2906_v38, 1 }
 0x2c9   :  { %v6060_v9 = vsel %vm440_vm3, %v2872_v8, %v7728_v1  ;;  %7729 = vst [vmem:[#allocation56_spill] sm:$0xff] %v6063_v37  ;;  %2836 = vrot.lane.b32.xlu1 %v2827_v54, %s3828_s13  ;;  %2784 = vrot.lane.b32.xlu0 %v7731_v44, %s3827_s8  ;;  %v6075_v21 = vmul.f32 %v6072_v47, %v2297_v53  ;;  %v7733_v1 = vld [vmem:[#allocation57_spill] sm:$0xff]  ;;  %v6088_v44 = vpop.permute.xlu1 %2268  ;;  %v7742_v0 = vrot.slane %v5849_v50, 1 }
 0x2ca   :  { %v6078_v8 = vmul.f32 %v6072_v47, %v2901_v51  ;;  %v6082_v37 = vadd.f32 %v7733_v1, %v5780_v57  ;;  %v6086_v54 = vmul.f32 %v5928_v16, %v6051_v40  ;;  %7735 = vst [vmem:[#allocation255_spill] sm:$0xff] %v6088_v44  ;;  %v6090_v6 = vpop.permute.xlu0 %2338  ;;  %v6093_v53 = vsel %vm440_vm3, %v2914_v29, %v2915_v12  ;;  %v7738_v29 = vld [vmem:[#allocation59_spill] sm:$0xff] }
 0x2cb   :  { %7732 = vst [vmem:[#allocation58_spill] sm:$0xff] %v6075_v21  ;;  %7736 = vst [vmem:[#allocation256_spill] sm:$0xff] %v6090_v6  ;;  %v7737_v51 = vrot.slane %v6009_v20, 1  ;;  %v3058_v57 = vmul.f32 %v5928_v16, %v3057_v23  ;;  %v3059_v38 = vmul.f32 %v5931_v36, %v3057_v23  ;;  %v6103_v14 = vmul.f32 %v5990_v63, %v3057_v23  ;;  %v7739_v6 = vld [vmem:[#allocation60_spill] sm:$0xff] }
 0x2cc   :  { %7734 = vst [vmem:[#allocation57_spill] sm:$0xff] %v6086_v54  ;;  %v3061_v1 = vmul.f32 %v5939_v30, %v3057_v23  ;;  %v3062_v54 = vmul.f32 %v5966_v19, %v3057_v23  ;;  %v3105_v44 = vstv %s6021_s27  ;;  %v722_v59 = vadd.f32 %v7738_v29, %v5890_v39 }
 0x2cd   :  { %v6098_v21 = vsel %vm440_vm3, %v2915_v12, %v7737_v51  ;;  %v723_v43 = vadd.f32 %v7739_v6, %v5787_v52  ;;  %v7740_v12 = vld [vmem:[#allocation189_spill] sm:$0xff]  ;;  %2790 = vrot.lane.b32.xlu1 %v7741_v24, %s3827_s8  ;;  %2832 = vrot.lane.b32.xlu0 %v7742_v0, %s3828_s13  ;;  %v6125_v39 = vsel %vm440_vm3, %v2919_v2, %v2920_v34  ;;  %v6138_v50 = vpop.permute.xlu1 %2340  ;;  %v3070_v24 = vrot.slane %v3058_v57, 2 }
 0x2ce   :  { %v6113_v51 = vadd.f32 %v7740_v12, %v721_v60  ;;  %v6129_v52 = vmul.f32 %v5931_v36, %v6051_v40  ;;  %v6133_v60 = vmul.f32 %v5939_v30, %v6051_v40  ;;  %v6136_v28 = vmul.f32 %v6072_v47, %v3057_v23  ;;  %7745 = vst [vmem:[#allocation189_spill] sm:$0xff] %v6138_v50  ;;  %v6140_v0 = vpop.permute.xlu0 %2344  ;;  %v7748_v23 = vld [vmem:[#allocation195_spill] sm:$0xff] }
 0x2cf   :  { %7746 = vst [vmem:[#allocation257_spill] sm:$0xff] %v6140_v0  ;;  %v6144_v2 = vmul.f32 %v5966_v19, %v6051_v40  ;;  %v3106_v6 = vmul.f32 %v5928_v16, %v3105_v44  ;;  %v3107_v29 = vmul.f32 %v5931_v36, %v3105_v44  ;;  %v3071_v12 = vrot.slane %v3059_v38, 2  ;;  %v7749_v0 = vld [vmem:[#allocation182_spill] sm:$0xff] }
 0x2d0   :  { %7743 = vst [vmem:[#allocation59_spill] sm:$0xff] %v6129_v52  ;;  %7744 = vst [vmem:[#allocation60_spill] sm:$0xff] %v6133_v60  ;;  %v3075_v60 = vrot.slane %v3061_v1, 2  ;;  %v3076_v52 = vrot.slane %v3062_v54, 2  ;;  %v6152_v50 = vadd.f32 %v7748_v23, %v722_v59  ;;  %v7750_v57 = vrot.slane %v7749_v0, 2  ;;  %v7753_v1 = vld [vmem:[#allocation61_spill] sm:$0xff] }
 0x2d1   :  { %7747 = vst [vmem:[#allocation258_spill] sm:$0xff] %v6144_v2  ;;  %v7751_v2 = vrot.slane %v5914_v26, 1  ;;  %2876 = vrot.lane.b32.xlu0 %v6012_v17, %s3828_s13  ;;  %v7752_v38 = vrot.slane %v6078_v8, 1  ;;  %v724_v59 = vadd.f32 %v7753_v1, %v5906_v3  ;;  %v7754_v23 = vld [vmem:[#allocation62_spill] sm:$0xff]  ;;  %v6176_v26 = vpop.permute.xlu1 %2346  ;;  %v3119_v32 = vrot.slane %v3107_v29, 2 }
 0x2d2   :  { %v6156_v49 = vadd.f32 %v7750_v57, %v723_v43  ;;  %v725_v0 = vadd.f32 %v7754_v23, %v5894_v7  ;;  %v6174_v57 = vmul.f32 %v5990_v63, %v3105_v44  ;;  %7755 = vst [vmem:[#allocation195_spill] sm:$0xff] %v6176_v26  ;;  %v6178_v17 = vpop.permute.xlu0 %2342  ;;  %v6183_v3 = vsel %vm837_vm4, %v3070_v24, %v3071_v12 }
 0x2d3   :  { %2838 = vrot.lane.b32.xlu1 %v7751_v2, %s3828_s13  ;;  %v6166_v54 = vsel %vm440_vm3, %v2920_v34, %v7752_v38  ;;  %7756 = vst [vmem:[#allocation182_spill] sm:$0xff] %v6178_v17  ;;  %v3118_v2 = vrot.slane %v3106_v6, 2  ;;  %v3109_v34 = vmul.f32 %v5939_v30, %v3105_v44  ;;  %v3110_v38 = vmul.f32 %v5966_v19, %v3105_v44  ;;  %v7759_v6 = vld [vmem:[#allocation63_spill] sm:$0xff]  ;;  %v7760_v17 = vld [vmem:[#allocation64_spill] sm:$0xff] }
 0x2d4   :  { %v7757_v7 = vrot.slane %v6103_v14, 2  ;;  %v6191_v23 = vsel %vm837_vm4, %v3075_v60, %v3076_v52  ;;  %v6195_v43 = vmul.f32 %v5990_v63, %v6051_v40  ;;  %v726_v29 = vadd.f32 %v7759_v6, %v5814_v48 }
 0x2d5   :  { %v769_v26 = vadd.f32 %v7760_v17, %v5910_v25  ;;  %2882 = vrot.lane.b32.xlu0 %v6031_v11, %s3828_s13  ;;  %v6206_v60 = vmul.f32 %v6072_v47, %v3105_v44  ;;  %v3153_v24 = vstv %s6122_s1  ;;  %v6217_v48 = vmul.f32 %v6072_v47, %v6051_v40 }
 0x2d6   :  { %v6188_v1 = vsel %vm837_vm4, %v3071_v12, %v7757_v7  ;;  %7758 = vst [vmem:[#allocation61_spill] sm:$0xff] %v6195_v43  ;;  %v6210_v12 = vadd.f32 %v5144_v27, %v724_v59  ;;  %v6213_v7 = vadd.f32 %v5156_v22, %v725_v0  ;;  %v6222_v11 = vpop.permute.xlu0 %2376  ;;  %v7765_v44 = vrot.slane %v6136_v28, 2 }
 0x2d7   :  { %2878 = vrot.lane.b32.xlu1 %v6028_v42, %s3828_s13  ;;  %7761 = vst [vmem:[#allocation62_spill] sm:$0xff] %v6206_v60  ;;  %7762 = vst [vmem:[#allocation63_spill] sm:$0xff] %v6217_v48  ;;  %v6220_v42 = vpop.permute.xlu1 %2348  ;;  %v6230_v27 = vsel %vm837_vm4, %v3118_v2, %v3119_v32  ;;  %v3123_v22 = vrot.slane %v3109_v34, 2  ;;  %v3124_v59 = vrot.slane %v3110_v38, 2  ;;  %v3154_v0 = vmul.f32 %v5928_v16, %v3153_v24  ;;  %v7768_v48 = vld [vmem:[#allocation201_spill] sm:$0xff] }
 0x2d8   :  { %7763 = vst [vmem:[#allocation64_spill] sm:$0xff] %v6220_v42  ;;  %7764 = vst [vmem:[#allocation259_spill] sm:$0xff] %v6222_v11  ;;  %v6227_v17 = vsel %vm837_vm4, %v3076_v52, %v7765_v44  ;;  %v3155_v40 = vmul.f32 %v5931_v36, %v3153_v24  ;;  %v6235_v6 = vmul.f32 %v5990_v63, %v3153_v24  ;;  %v3201_v25 = vstv %s6149_s28 }
 0x2d9   :  { %v7767_v11 = vrot.slane %v5077_v35, 2  ;;  %v6243_v52 = vadd.f32 %v7768_v48, %v769_v26  ;;  %v7769_v2 = vrot.slane %v5937_v31, 1  ;;  %v3157_v38 = vmul.f32 %v5939_v30, %v3153_v24  ;;  %v7770_v35 = vld [vmem:[#allocation65_spill] sm:$0xff]  ;;  %v7773_v31 = vld [vmem:[#allocation66_spill] sm:$0xff] }
 0x2da   :  { %7766 = vst [vmem:[#allocation260_spill] sm:$0xff] %v6235_v6  ;;  %v6263_v48 = vmul.f32 %v6072_v47, %v3153_v24  ;;  %v771_v44 = vadd.f32 %v7773_v31, %v5826_v41  ;;  %v6269_v34 = vpop.permute.xlu0 %2382  ;;  %v3202_v43 = vmul.f32 %v5928_v16, %v3201_v25  ;;  %v7777_v41 = vld [vmem:[#allocation67_spill] sm:$0xff] }
 0x2db   :  { %v6240_v42 = vadd.f32 %v7767_v11, %v726_v29  ;;  %2884 = vrot.lane.b32.xlu1 %v6060_v9, %s3828_s13  ;;  %2880 = vrot.lane.b32.xlu0 %v7769_v2, %s3828_s13  ;;  %v770_v29 = vadd.f32 %v7770_v35, %v5945_v15  ;;  %v7771_v11 = vrot.slane %v6174_v57, 2  ;;  %v3158_v9 = vmul.f32 %v5966_v19, %v3153_v24  ;;  %v6267_v2 = vpop.permute.xlu1 %2378 }
 0x2dc   :  { %7772 = vst [vmem:[#allocation201_spill] sm:$0xff] %v6263_v48  ;;  %7774 = vst [vmem:[#allocation65_spill] sm:$0xff] %v6267_v2  ;;  %v3203_v15 = vmul.f32 %v5931_v36, %v3201_v25  ;;  %v6274_v35 = vmul.f32 %v5990_v63, %v3201_v25  ;;  %v3167_v24 = vrot.slane %v3155_v40, 2  ;;  %v772_v31 = vadd.f32 %v7777_v41, %v5985_v13 }
 0x2dd   :  { %v6259_v26 = vsel %vm837_vm4, %v3119_v32, %v7771_v11  ;;  %7775 = vst [vmem:[#allocation66_spill] sm:$0xff] %v6269_v34  ;;  %v6277_v32 = vsel %vm837_vm4, %v3123_v22, %v3124_v59  ;;  %v3166_v11 = vrot.slane %v3154_v0, 2  ;;  %v7778_v34 = vld [vmem:[#allocation68_spill] sm:$0xff]  ;;  %v7780_v22 = vrot.slane %v6206_v60, 2 }
 0x2de   :  { %7776 = vst [vmem:[#allocation261_spill] sm:$0xff] %v6274_v35  ;;  %v773_v2 = vadd.f32 %v7778_v34, %v5956_v5  ;;  %v3171_v40 = vrot.slane %v3157_v38, 2  ;;  %v3172_v61 = vrot.slane %v3158_v9, 2  ;;  %v3205_v13 = vmul.f32 %v5939_v30, %v3201_v25  ;;  %v7784_v38 = vld [vmem:[#allocation202_spill] sm:$0xff] }
 0x2df   :  { %2886 = vrot.lane.b32.xlu1 %v7779_v56, %s3828_s13  ;;  %2924 = vrot.lane.b32.xlu0 %v6093_v53, %s3828_s13  ;;  %v6294_v0 = vsel %vm837_vm4, %v3124_v59, %v7780_v22  ;;  %v3206_v5 = vmul.f32 %v5966_v19, %v3201_v25  ;;  %v6299_v34 = vpop.permute.xlu1 %2384  ;;  %v6301_v56 = vpop.permute.xlu0 %2380  ;;  %v3214_v46 = vrot.slane %v3202_v43, 2  ;;  %v3215_v53 = vrot.slane %v3203_v15, 2  ;;  %v7785_v22 = vld [vmem:[#allocation192_spill] sm:$0xff]  ;;  %v7788_v15 = vld [vmem:[#allocation69_spill] sm:$0xff] }
 0x2e0   :  { %7781 = vst [vmem:[#allocation67_spill] sm:$0xff] %v6299_v34  ;;  %7782 = vst [vmem:[#allocation68_spill] sm:$0xff] %v6301_v56  ;;  %v6305_v59 = vmul.f32 %v6072_v47, %v3201_v25  ;;  %v6308_v9 = vadd.f32 %v7784_v38, %v770_v29  ;;  %v7786_v4 = vrot.slane %v7785_v22, 2  ;;  %v6315_v60 = vsel %vm837_vm4, %v3166_v11, %v3167_v24  ;;  %v7789_v25 = vld [vmem:[#allocation203_spill] sm:$0xff]  ;;  %v7790_v29 = vld [vmem:[#allocation204_spill] sm:$0xff] }
 0x2e1   :  { %v7787_v34 = vrot.slane %v6235_v6, 2  ;;  %v774_v41 = vadd.f32 %v7788_v15, %v5853_v18  ;;  %v6325_v56 = vadd.f32 %v7789_v25, %v772_v31  ;;  %v6328_v38 = vadd.f32 %v7790_v29, %v773_v2 }
 0x2e2   :  { %7783 = vst [vmem:[#allocation262_spill] sm:$0xff] %v6305_v59  ;;  %v6312_v58 = vadd.f32 %v7786_v4, %v771_v44  ;;  %v2553_v4 = vstv %s6252_s29  ;;  %v7791_v44 = vld [vmem:[#allocation70_spill] sm:$0xff]  ;;  %v3219_v18 = vrot.slane %v3205_v13, 2  ;;  %v3220_v31 = vrot.slane %v3206_v5, 2  ;;  %v7801_v13 = vld [vmem:[#allocation71_spill] sm:$0xff] }
 0x2e3   :  { %v6320_v43 = vsel %vm837_vm4, %v3167_v24, %v7787_v34  ;;  %2926 = vrot.lane.b32.xlu1 %v6098_v21, %s3828_s13  ;;  %2930 = vrot.lane.b32.xlu0 %v6125_v39, %s3828_s13  ;;  %v817_v11 = vadd.f32 %v7791_v44, %v6000_v55  ;;  %v6338_v24 = vsel %vm837_vm4, %v3171_v40, %v3172_v61  ;;  %v6342_v2 = vpop.permute.xlu1 %2386  ;;  %v6344_v34 = vpop.permute.xlu0 %2414  ;;  %v7794_v21 = vrot.slane %v6263_v48, 2 }
 0x2e4   :  { %7792 = vst [vmem:[#allocation202_spill] sm:$0xff] %v6342_v2  ;;  %7793 = vst [vmem:[#allocation192_spill] sm:$0xff] %v6344_v34  ;;  %v6352_v22 = vsel %vm837_vm4, %v3214_v46, %v3215_v53  ;;  %v7795_v55 = vrot.slane %v6274_v35, 2  ;;  %v2554_v5 = vmul.f32 %v5928_v16, %v2553_v4  ;;  %v2555_v15 = vmul.f32 %v5931_v36, %v2553_v4  ;;  %v7802_v2 = vld [vmem:[#allocation205_spill] sm:$0xff] }
 0x2e5   :  { %v6349_v39 = vsel %vm837_vm4, %v3172_v61, %v7794_v21  ;;  %v6363_v25 = vmul.f32 %v5990_v63, %v2553_v4  ;;  %v3249_v29 = vstv %s6280_s30  ;;  %v7798_v61 = vld [vmem:[#allocation193_spill] sm:$0xff]  ;;  %v7800_v46 = vrot.slane %v6009_v20, 1  ;;  %v7805_v20 = vld [vmem:[#allocation72_spill] sm:$0xff] }
 0x2e6   :  { %v6357_v40 = vsel %vm837_vm4, %v3215_v53, %v7795_v55  ;;  %v7799_v44 = vrot.slane %v7798_v61, 2  ;;  %v2557_v53 = vmul.f32 %v5939_v30, %v2553_v4  ;;  %v2558_v55 = vmul.f32 %v5966_v19, %v2553_v4 }
 0x2e7   :  { %7796 = vst [vmem:[#allocation69_spill] sm:$0xff] %v6357_v40  ;;  %7797 = vst [vmem:[#allocation203_spill] sm:$0xff] %v6363_v25  ;;  %2932 = vrot.lane.b32.xlu1 %v6166_v54, %s3828_s13  ;;  %2928 = vrot.lane.b32.xlu0 %v7800_v46, %s3828_s13  ;;  %v818_v34 = vadd.f32 %v7801_v13, %v6038_v45  ;;  %v6380_v35 = vadd.f32 %v7802_v2, %v817_v11  ;;  %v6394_v46 = vpop.permute.xlu0 %2420  ;;  %v7808_v45 = vrot.slane %v6305_v59, 2 }
 0x2e8   :  { %v6368_v21 = vadd.f32 %v7799_v44, %v774_v41  ;;  %v6383_v41 = vsel %vm837_vm4, %v3219_v18, %v3220_v31  ;;  %v6386_v61 = vmul.f32 %v6072_v47, %v2553_v4  ;;  %v819_v54 = vadd.f32 %v7805_v20, %v5857_v10  ;;  %v6392_v44 = vpop.permute.xlu1 %2416  ;;  %7807 = vst [vmem:[#allocation71_spill] sm:$0xff] %v6394_v46 }
 0x2e9   :  { %7803 = vst [vmem:[#allocation204_spill] sm:$0xff] %v6383_v41  ;;  %7806 = vst [vmem:[#allocation193_spill] sm:$0xff] %v6392_v44  ;;  %v6399_v11 = vsel %vm837_vm4, %v3220_v31, %v7808_v45  ;;  %v3250_v18 = vmul.f32 %v5928_v16, %v3249_v29  ;;  %v3251_v4 = vmul.f32 %v5931_v36, %v3249_v29  ;;  %v2566_v2 = vrot.slane %v2554_v5, 1  ;;  %v7812_v44 = vld [vmem:[#allocation74_spill] sm:$0xff] }
 0x2ea   :  { %7804 = vst [vmem:[#allocation70_spill] sm:$0xff] %v6386_v61  ;;  %7809 = vst [vmem:[#allocation205_spill] sm:$0xff] %v6399_v11  ;;  %v2567_v13 = vrot.slane %v2555_v15, 1  ;;  %v6405_v10 = vmul.f32 %v5990_v63, %v3249_v29  ;;  %v7810_v20 = vrot.slane %v6078_v8, 1  ;;  %v2571_v31 = vrot.slane %v2557_v53, 1  ;;  %v7811_v15 = vld [vmem:[#allocation73_spill] sm:$0xff] }
 0x2eb   :  { %3080 = vrot.lane.b32.xlu0 %v6183_v3, %s3827_s8  ;;  %v2572_v45 = vrot.slane %v2558_v55, 1  ;;  %v3253_v46 = vmul.f32 %v5939_v30, %v3249_v29  ;;  %v6416_v5 = vmul.f32 %v5966_v19, %v3249_v29  ;;  %v820_v48 = vadd.f32 %v7811_v15, %v6082_v37  ;;  %v7814_v3 = vld [vmem:[#allocation194_spill] sm:$0xff]  ;;  %v6435_v40 = vpop.permute.xlu0 %2452 }
 0x2ec   :  { %2934 = vrot.lane.b32.xlu1 %v7810_v20, %s3828_s13  ;;  %v821_v59 = vadd.f32 %v7812_v44, %v6055_v33  ;;  %v6424_v8 = vstv %s6340_s5  ;;  %v7813_v20 = vld [vmem:[#allocation206_spill] sm:$0xff]  ;;  %v7815_v53 = vrot.slane %v7814_v3, 2  ;;  %v6433_v41 = vpop.permute.xlu1 %2422  ;;  %7816 = vst [vmem:[#allocation72_spill] sm:$0xff] %v6435_v40  ;;  %v3262_v37 = vrot.slane %v3250_v18, 2  ;;  %v7817_v33 = vld [vmem:[#allocation75_spill] sm:$0xff] }
 0x2ed   :  { %v6427_v11 = vadd.f32 %v7813_v20, %v818_v34  ;;  %v3263_v15 = vrot.slane %v3251_v4, 2  ;;  %v822_v44 = vadd.f32 %v7817_v33, %v5866_v62  ;;  %v6440_v6 = vsel %vm440_vm3, %v2566_v2, %v2567_v13 }
 0x2ee   :  { %v6431_v55 = vadd.f32 %v7815_v53, %v819_v54  ;;  %7818 = vst [vmem:[#allocation73_spill] sm:$0xff] %v6440_v6  ;;  %v7819_v34 = vrot.slane %v6363_v25, 1  ;;  %v6453_v18 = vsel %vm440_vm3, %v2571_v31, %v2572_v45  ;;  %v3267_v62 = vrot.slane %v3253_v46, 2  ;;  %v7823_v53 = vld [vmem:[#allocation208_spill] sm:$0xff] }
 0x2ef   :  { %3086 = vrot.lane.b32.xlu0 %v6191_v23, %s3827_s8  ;;  %7821 = vst [vmem:[#allocation206_spill] sm:$0xff] %v6453_v18  ;;  %v3268_v4 = vrot.slane %v6416_v5, 2  ;;  %v2590_v2 = vmul.f32 %v5928_v16, %v6424_v8  ;;  %v6462_v33 = vadd.f32 %v7823_v53, %v821_v59  ;;  %v3297_v31 = vstv %s6388_s6  ;;  %v7826_v46 = vld [vmem:[#allocation76_spill] sm:$0xff]  ;;  %v6476_v54 = vpop.permute.xlu0 %2458 }
 0x2f0   :  { %v6445_v20 = vsel %vm440_vm3, %v2567_v13, %v7819_v34  ;;  %3082 = vrot.lane.b32.xlu1 %v6188_v1, %s3827_s8  ;;  %v7822_v13 = vld [vmem:[#allocation207_spill] sm:$0xff]  ;;  %v7824_v1 = vrot.slane %v6386_v61, 1  ;;  %v6472_v34 = vadd.f32 %v7826_v46, %v6113_v51  ;;  %v6474_v5 = vpop.permute.xlu1 %2454  ;;  %v6483_v59 = vmul.f32 %v5931_v36, %v6424_v8 }
 0x2f1   :  { %7820 = vst [vmem:[#allocation74_spill] sm:$0xff] %v6445_v20  ;;  %v6459_v3 = vadd.f32 %v7822_v13, %v820_v48  ;;  %7827 = vst [vmem:[#allocation75_spill] sm:$0xff] %v6474_v5  ;;  %v6479_v48 = vsel %vm837_vm4, %v3262_v37, %v3263_v15  ;;  %v6486_v13 = vmul.f32 %v6072_v47, %v3249_v29  ;;  %v7832_v51 = vrot.slane %v6405_v10, 2 }
 0x2f2   :  { %v6467_v23 = vsel %vm440_vm3, %v2572_v45, %v7824_v1  ;;  %7828 = vst [vmem:[#allocation207_spill] sm:$0xff] %v6476_v54  ;;  %7829 = vst [vmem:[#allocation208_spill] sm:$0xff] %v6483_v59  ;;  %v7830_v45 = vld [vmem:[#allocation196_spill] sm:$0xff]  ;;  %v6499_v37 = vmul.f32 %v5990_v63, %v6424_v8  ;;  %v6502_v61 = vstv %s6407_s7  ;;  %v7834_v29 = vrot.slane %v6103_v14, 2 }
 0x2f3   :  { %7825 = vst [vmem:[#allocation194_spill] sm:$0xff] %v6467_v23  ;;  %v7831_v53 = vrot.slane %v7830_v45, 2  ;;  %v6495_v46 = vsel %vm837_vm4, %v3263_v15, %v7832_v51  ;;  %7833 = vst [vmem:[#allocation76_spill] sm:$0xff] %v6502_v61  ;;  %v2602_v45 = vrot.slane %v2590_v2, 1  ;;  %v6514_v15 = vmul.f32 %v5939_v30, %v6424_v8 }
 0x2f4   :  { %3088 = vrot.lane.b32.xlu1 %v6227_v17, %s3827_s8  ;;  %3084 = vrot.lane.b32.xlu0 %v7834_v29, %s3827_s8  ;;  %v3299_v51 = vmul.f32 %v5931_v36, %v3297_v31  ;;  %v6519_v25 = vmul.f32 %v5990_v63, %v3297_v31  ;;  %v3301_v17 = vmul.f32 %v5939_v30, %v3297_v31  ;;  %v6523_v29 = vpop.permute.xlu1 %2460 }
 0x2f5   :  { %v6490_v1 = vadd.f32 %v7831_v53, %v822_v44  ;;  %v6510_v44 = vsel %vm837_vm4, %v3267_v62, %v3268_v4  ;;  %v3298_v53 = vmul.f32 %v5928_v16, %v3297_v31  ;;  %v3302_v14 = vmul.f32 %v5966_v19, %v3297_v31  ;;  %7835 = vst [vmem:[#allocation196_spill] sm:$0xff] %v6523_v29  ;;  %v6525_v62 = vpop.permute.xlu0 %2418 }
 0x2f6   :  { %7836 = vst [vmem:[#allocation263_spill] sm:$0xff] %v6525_v62  ;;  %v6531_v16 = vmul.f32 %v5931_v36, %v6502_v61  ;;  %v6534_v18 = vmul.f32 %v6072_v47, %v3297_v31  ;;  %v6538_v20 = vmul.f32 %v5990_v63, %v6502_v61  ;;  %v2629_v29 = vmul.f32 %v5939_v30, %v6502_v61  ;;  %v7840_v36 = vld [vmem:[#allocation77_spill] sm:$0xff]  ;;  %v7841_v31 = vld [vmem:[#allocation78_spill] sm:$0xff] }
 0x2f7   :  { %v2630_v62 = vmul.f32 %v5966_v19, %v6502_v61  ;;  %v6546_v23 = vmul.f32 %v6072_v47, %v6502_v61  ;;  %v975_v2 = vadd.f32 %v7840_v36, %v6152_v50  ;;  %v976_v6 = vadd.f32 %v7841_v31, %v6156_v49 }
 0x2f8   :  { %7837 = vst [vmem:[#allocation264_spill] sm:$0xff] %v6531_v16  ;;  %7838 = vst [vmem:[#allocation265_spill] sm:$0xff] %v6538_v20  ;;  %v7842_v63 = vrot.slane %v6136_v28, 2  ;;  %3128 = vrot.lane.b32.xlu0 %v6230_v27, %s3827_s8  ;;  %v6559_v30 = vmul.f32 %v5966_v19, %v6424_v8  ;;  %v3310_v54 = vrot.slane %v3298_v53, 2  ;;  %v3311_v61 = vrot.slane %v3299_v51, 2  ;;  %v6562_v36 = vpop.permute.xlu1 %2424 }
 0x2f9   :  { %7839 = vst [vmem:[#allocation266_spill] sm:$0xff] %v6546_v23  ;;  %v3315_v40 = vrot.slane %v3301_v17, 2  ;;  %v3316_v50 = vrot.slane %v3302_v14, 2  ;;  %v6564_v49 = vpop.permute.xlu0 %2456  ;;  %v7844_v28 = vrot.slane %v6483_v59, 1  ;;  %v7846_v27 = vrot.slane %v6486_v13, 2  ;;  %v7847_v59 = vld [vmem:[#allocation79_spill] sm:$0xff] }
 0x2fa   :  { %3090 = vrot.lane.b32.xlu1 %v7842_v63, %s3827_s8  ;;  %7843 = vst [vmem:[#allocation77_spill] sm:$0xff] %v6564_v49  ;;  %v7325_v53 = vrot.slane %v6531_v16, 1  ;;  %v7328_v51 = vrot.slane %v6534_v18, 2  ;;  %v7326_v17 = vrot.slane %v6538_v20, 1  ;;  %v2643_v14 = vrot.slane %v2629_v29, 1  ;;  %v7850_v29 = vld [vmem:[#allocation81_spill] sm:$0xff] }
 0x2fb   :  { %v6569_v31 = vsel %vm440_vm3, %v2602_v45, %v7844_v28  ;;  %v6574_v19 = vsel %vm837_vm4, %v3268_v4, %v7846_v27  ;;  %v2644_v63 = vrot.slane %v2630_v62, 1  ;;  %v7327_v5 = vrot.slane %v6546_v23, 1  ;;  %v7848_v45 = vld [vmem:[#allocation80_spill] sm:$0xff] }
 0x2fc   :  { %7845 = vst [vmem:[#allocation78_spill] sm:$0xff] %v6569_v31  ;;  %v977_v49 = vadd.f32 %v7847_v59, %v6210_v12  ;;  %v978_v28 = vadd.f32 %v7848_v45, %v6213_v7  ;;  %3134 = vrot.lane.b32.xlu0 %v6277_v32, %s3827_s8  ;;  %v6590_v4 = vmul.f32 %v6072_v47, %v6424_v8  ;;  %v7851_v12 = vrot.slane %v6519_v25, 2  ;;  %v7852_v32 = vld [vmem:[#allocation82_spill] sm:$0xff]  ;;  %v7853_v47 = vld [vmem:[#allocation83_spill] sm:$0xff]  ;;  %v7854_v45 = vld [vmem:[#allocation84_spill] sm:$0xff] }
 0x2fd   :  { %v979_v62 = vadd.f32 %v7850_v29, %v6240_v42  ;;  %v6595_v27 = vsel %vm837_vm4, %v3310_v54, %v3311_v61  ;;  %v1022_v59 = vadd.f32 %v7852_v32, %v6243_v52  ;;  %v1023_v8 = vadd.f32 %v7853_v47, %v6308_v9  ;;  %v6611_v29 = vpop.permute.xlu1 %2462  ;;  %v6613_v54 = vpop.permute.xlu0 %2490  ;;  %v7859_v47 = vld [vmem:[#allocation95_spill] sm:$0xff]  ;;  %v7876_v31 = vld [vmem:[#allocation100_spill] sm:$0xff] }
 0x2fe   :  { %3130 = vrot.lane.b32.xlu1 %v6259_v26, %s3827_s8  ;;  %7849 = vst [vmem:[#allocation79_spill] sm:$0xff] %v6590_v4  ;;  %v6600_v7 = vsel %vm837_vm4, %v3311_v61, %v7851_v12  ;;  %v6603_v26 = vsel %vm837_vm4, %v3315_v40, %v3316_v50  ;;  %v1024_v42 = vadd.f32 %v7854_v45, %v6312_v58  ;;  %7855 = vst [vmem:[#allocation80_spill] sm:$0xff] %v6611_v29  ;;  %v7857_v40 = vld [vmem:[#allocation94_spill] sm:$0xff]  ;;  %v7860_v45 = vld [vmem:[#allocation96_spill] sm:$0xff] }
 0x2ff   :  { %7856 = vst [vmem:[#allocation81_spill] sm:$0xff] %v6613_v54  ;;  %v6618_v61 = vsel %vm837_vm4, %v3316_v50, %v7328_v51  ;;  %v1118_v12 = vadd.f32 %v7857_v40, %v6472_v34  ;;  %v6627_v52 = vsel %vm440_vm3, %v7325_v53, %v7326_v17  ;;  %v6630_v58 = vsel %vm440_vm3, %v2643_v14, %v2644_v63  ;;  %v7858_v50 = vld [vmem:[#allocation85_spill] sm:$0xff]  ;;  %v7862_v14 = vld [vmem:[#allocation86_spill] sm:$0xff]  ;;  %v7864_v51 = vld [vmem:[#allocation88_spill] sm:$0xff] }
 0x300   :  { %v6635_v9 = vsel %vm440_vm3, %v2644_v63, %v7327_v5  ;;  %v1025_v32 = vadd.f32 %v7858_v50, %v6325_v56  ;;  %v1119_v34 = vadd.f32 %v7859_v47, %v975_v2  ;;  %v1120_v40 = vadd.f32 %v7860_v45, %v976_v6  ;;  %v7863_v63 = vld [vmem:[#allocation87_spill] sm:$0xff]  ;;  %v7865_v2 = vld [vmem:[#allocation89_spill] sm:$0xff]  ;;  %v7866_v6 = vld [vmem:[#allocation90_spill] sm:$0xff] }
 0x301   :  { %v7861_v53 = vrot.slane %v6174_v57, 2  ;;  %v1026_v17 = vadd.f32 %v7862_v14, %v6328_v38  ;;  %v1027_v5 = vadd.f32 %v7863_v63, %v6368_v21  ;;  %v1070_v56 = vadd.f32 %v7864_v51, %v6380_v35  ;;  %v7868_v57 = vld [vmem:[#allocation92_spill] sm:$0xff]  ;;  %v7869_v38 = vld [vmem:[#allocation93_spill] sm:$0xff]  ;;  %v6662_v16 = vpop.permute.xlu1 %2492  ;;  %v6664_v21 = vpop.permute.xlu0 %2496  ;;  %v7873_v63 = vld [vmem:[#allocation98_spill] sm:$0xff] }
 0x302   :  { %3136 = vrot.lane.b32.xlu1 %v6294_v0, %s3827_s8  ;;  %v1071_v50 = vadd.f32 %v7865_v2, %v6427_v11  ;;  %v1072_v47 = vadd.f32 %v7866_v6, %v6431_v55  ;;  %v7867_v0 = vld [vmem:[#allocation91_spill] sm:$0xff]  ;;  %v1075_v14 = vadd.f32 %v7869_v38, %v6490_v1  ;;  %7870 = vst [vmem:[#allocation82_spill] sm:$0xff] %v6662_v16  ;;  %7871 = vst [vmem:[#allocation83_spill] sm:$0xff] %v6664_v21  ;;  %v7872_v35 = vld [vmem:[#allocation97_spill] sm:$0xff] }
 0x303   :  { %3132 = vrot.lane.b32.xlu0 %v7861_v53, %s3827_s8  ;;  %v1073_v45 = vadd.f32 %v7867_v0, %v6459_v3  ;;  %v1074_v53 = vadd.f32 %v7868_v57, %v6462_v33  ;;  %v1121_v51 = vadd.f32 %v7872_v35, %v977_v49  ;;  %v1122_v11 = vadd.f32 %v7873_v63, %v978_v28  ;;  %v7874_v2 = vld [vmem:[#allocation99_spill] sm:$0xff]  ;;  %v7875_v55 = vld [vmem:[#allocation209_spill] sm:$0xff]  ;;  %v7877_v0 = vld [vmem:[#allocation210_spill] sm:$0xff] }
 0x304   :  { %v1123_v4 = vadd.f32 %v7874_v2, %v979_v62  ;;  %v1228_v6 = vadd.f32 %v7875_v55, %v1118_v12  ;;  %v1166_v3 = vadd.f32 %v7876_v31, %v1022_v59  ;;  %v1229_v23 = vadd.f32 %v7877_v0, %v1119_v34  ;;  %v7878_v33 = vld [vmem:[#allocation211_spill] sm:$0xff]  ;;  %v7879_v1 = vld [vmem:[#allocation62_spill] sm:$0xff]  ;;  %v7881_v49 = vld [vmem:[#allocation101_spill] sm:$0xff] }
 0x305   :  { %v1230_v57 = vadd.f32 %v7878_v33, %v1120_v40  ;;  %v7880_v38 = vrot.slane %v7879_v1, 2  ;;  %v1167_v35 = vadd.f32 %v7881_v49, %v1023_v8  ;;  %v7882_v28 = vld [vmem:[#allocation102_spill] sm:$0xff]  ;;  %v7883_v62 = vld [vmem:[#allocation103_spill] sm:$0xff]  ;;  %v7884_v12 = vld [vmem:[#allocation104_spill] sm:$0xff]  ;;  %v6688_v16 = vpop.permute.xlu0 %2494 }
 0x306   :  { %v1168_v63 = vadd.f32 %v7882_v28, %v1024_v42  ;;  %v1169_v2 = vadd.f32 %v7883_v62, %v1025_v32  ;;  %v1170_v55 = vadd.f32 %v7884_v12, %v1026_v17  ;;  %v7885_v31 = vld [vmem:[#allocation105_spill] sm:$0xff]  ;;  %v7886_v34 = vld [vmem:[#allocation106_spill] sm:$0xff]  ;;  %v7887_v40 = vld [vmem:[#allocation107_spill] sm:$0xff]  ;;  %7890 = vst [vmem:[#allocation94_spill] sm:$0xff] %v6688_v16 }
 0x307   :  { %3138 = vrot.lane.b32.xlu1 %v7880_v38, %s3827_s8  ;;  %3176 = vrot.lane.b32.xlu0 %v6315_v60, %s3827_s8  ;;  %v1171_v59 = vadd.f32 %v7885_v31, %v1027_v5  ;;  %v1214_v0 = vadd.f32 %v7886_v34, %v1070_v56  ;;  %v1215_v33 = vadd.f32 %v7887_v40, %v1071_v50  ;;  %v7888_v21 = vld [vmem:[#allocation108_spill] sm:$0xff]  ;;  %v6686_v38 = vpop.permute.xlu1 %2498  ;;  %v7891_v60 = vld [vmem:[#allocation109_spill] sm:$0xff]  ;;  %v7893_v28 = vld [vmem:[#allocation215_spill] sm:$0xff] }
 0x308   :  { %v1216_v1 = vadd.f32 %v7888_v21, %v1072_v47  ;;  %7889 = vst [vmem:[#allocation84_spill] sm:$0xff] %v6686_v38  ;;  %v1217_v8 = vadd.f32 %v7891_v60, %v1073_v45  ;;  %v7892_v49 = vld [vmem:[#allocation212_spill] sm:$0xff]  ;;  %v1232_v32 = vadd.f32 %v7893_v28, %v1122_v11  ;;  %v7895_v12 = vld [vmem:[#allocation110_spill] sm:$0xff]  ;;  %v7896_v31 = vld [vmem:[#allocation111_spill] sm:$0xff] }
 0x309   :  { %v1231_v42 = vadd.f32 %v7892_v49, %v1121_v51  ;;  %v7894_v62 = vld [vmem:[#allocation216_spill] sm:$0xff]  ;;  %v1218_v5 = vadd.f32 %v7895_v12, %v1074_v53  ;;  %v1219_v56 = vadd.f32 %v7896_v31, %v1075_v14  ;;  %v7897_v34 = vld [vmem:[#allocation217_spill] sm:$0xff]  ;;  %v7898_v47 = vld [vmem:[#allocation218_spill] sm:$0xff] }
 0x30a   :  { %v1233_v17 = vadd.f32 %v7894_v62, %v1123_v4  ;;  %v1242_v50 = vadd.f32 %v7897_v34, %v1166_v3  ;;  %v1243_v45 = vadd.f32 %v7898_v47, %v1167_v35  ;;  %v7899_v21 = vld [vmem:[#allocation219_spill] sm:$0xff]  ;;  %v7900_v40 = vld [vmem:[#allocation220_spill] sm:$0xff]  ;;  %v7901_v60 = vld [vmem:[#allocation221_spill] sm:$0xff]  ;;  %v6711_v34 = vpop.permute.xlu0 %2528 }
 0x30b   :  { %3178 = vrot.lane.b32.xlu1 %v6320_v43, %s3827_s8  ;;  %3182 = vrot.lane.b32.xlu0 %v6338_v24, %s3827_s8  ;;  %v1244_v51 = vadd.f32 %v7899_v21, %v1168_v63  ;;  %v1245_v11 = vadd.f32 %v7900_v40, %v1169_v2  ;;  %v1246_v4 = vadd.f32 %v7901_v60, %v1170_v55  ;;  %v7902_v49 = vld [vmem:[#allocation222_spill] sm:$0xff]  ;;  %v7903_v28 = vld [vmem:[#allocation223_spill] sm:$0xff]  ;;  %v7904_v62 = vld [vmem:[#allocation224_spill] sm:$0xff]  ;;  %v6709_v43 = vpop.permute.xlu1 %2500 }
 0x30c   :  { %v1247_v53 = vadd.f32 %v7902_v49, %v1171_v59  ;;  %v1256_v14 = vadd.f32 %v7903_v28, %v1214_v0  ;;  %v1257_v3 = vadd.f32 %v7904_v62, %v1215_v33  ;;  %v7905_v12 = vld [vmem:[#allocation229_spill] sm:$0xff]  ;;  %7906 = vst [vmem:[#allocation85_spill] sm:$0xff] %v6709_v43  ;;  %7907 = vst [vmem:[#allocation95_spill] sm:$0xff] %v6711_v34  ;;  %v7908_v24 = vld [vmem:[#allocation112_spill] sm:$0xff] }
 0x30d   :  { %v1258_v31 = vadd.f32 %v7905_v12, %v1216_v1  ;;  %v1294_v35 = vadd.f32 %v7908_v24, %v1228_v6  ;;  %v7909_v47 = vld [vmem:[#allocation113_spill] sm:$0xff]  ;;  %v7910_v21 = vld [vmem:[#allocation115_spill] sm:$0xff]  ;;  %v7912_v60 = vld [vmem:[#allocation114_spill] sm:$0xff] }
 0x30e   :  { %v1295_v63 = vadd.f32 %v7909_v47, %v1229_v23  ;;  %v1297_v2 = vadd.f32 %v7910_v21, %v1231_v42  ;;  %v7911_v40 = vld [vmem:[#allocation227_spill] sm:$0xff]  ;;  %v1296_v59 = vadd.f32 %v7912_v60, %v1230_v57  ;;  %v7913_v49 = vld [vmem:[#allocation228_spill] sm:$0xff]  ;;  %v7914_v28 = vld [vmem:[#allocation230_spill] sm:$0xff] }
 0x30f   :  { %v1259_v55 = vadd.f32 %v7911_v40, %v1217_v8  ;;  %v1260_v0 = vadd.f32 %v7913_v49, %v1218_v5  ;;  %v1261_v33 = vadd.f32 %v7914_v28, %v1219_v56  ;;  %3184 = vrot.lane.b32.xlu1 %v6349_v39, %s3827_s8  ;;  %3224 = vrot.lane.b32.xlu0 %v6352_v22, %s3828_s13  ;;  %v7915_v1 = vld [vmem:[#allocation116_spill] sm:$0xff]  ;;  %v7917_v12 = vld [vmem:[#allocation129_spill] sm:$0xff]  ;;  %v7918_v24 = vld [vmem:[#allocation130_spill] sm:$0xff]  ;;  %v6732_v39 = vpop.permute.xlu1 %2530  ;;  %v6734_v28 = vpop.permute.xlu0 %2534 }
 0x310   :  { %v1298_v6 = vadd.f32 %v7915_v1, %v1232_v32  ;;  %v7916_v62 = vld [vmem:[#allocation128_spill] sm:$0xff]  ;;  %v1409_v42 = vadd.f32 %v7917_v12, %v1295_v63  ;;  %v1411_v8 = vadd.f32 %v7918_v24, %v1297_v2  ;;  %v7919_v47 = vld [vmem:[#allocation117_spill] sm:$0xff]  ;;  %v7920_v21 = vld [vmem:[#allocation118_spill] sm:$0xff] }
 0x311   :  { %v1408_v23 = vadd.f32 %v7916_v62, %v1294_v35  ;;  %v1299_v57 = vadd.f32 %v7919_v47, %v1233_v17  ;;  %v1332_v5 = vadd.f32 %v7920_v21, %v1242_v50  ;;  %v7921_v40 = vld [vmem:[#allocation119_spill] sm:$0xff]  ;;  %v7922_v60 = vld [vmem:[#allocation120_spill] sm:$0xff]  ;;  %v7923_v22 = vld [vmem:[#allocation121_spill] sm:$0xff] }
 0x312   :  { %v1333_v56 = vadd.f32 %v7921_v40, %v1243_v45  ;;  %v1334_v49 = vadd.f32 %v7922_v60, %v1244_v51  ;;  %v1335_v32 = vadd.f32 %v7923_v22, %v1245_v11  ;;  %v7924_v1 = vld [vmem:[#allocation122_spill] sm:$0xff]  ;;  %v7925_v62 = vld [vmem:[#allocation123_spill] sm:$0xff]  ;;  %v7926_v12 = vld [vmem:[#allocation124_spill] sm:$0xff] }
 0x313   :  { %v1336_v35 = vadd.f32 %v7924_v1, %v1246_v4  ;;  %v1337_v63 = vadd.f32 %v7925_v62, %v1247_v53  ;;  %v1370_v2 = vadd.f32 %v7926_v12, %v1256_v14  ;;  %v7927_v24 = vld [vmem:[#allocation125_spill] sm:$0xff]  ;;  %v7928_v47 = vld [vmem:[#allocation126_spill] sm:$0xff]  ;;  %v7929_v21 = vld [vmem:[#allocation127_spill] sm:$0xff]  ;;  %v6757_v43 = vpop.permute.xlu0 %2532 }
 0x314   :  { %v1371_v17 = vadd.f32 %v7927_v24, %v1257_v3  ;;  %v1373_v50 = vadd.f32 %v7928_v47, %v1259_v55  ;;  %v1374_v45 = vadd.f32 %v7929_v21, %v1260_v0  ;;  %v7930_v51 = vld [vmem:[#allocation69_spill] sm:$0xff]  ;;  %v7931_v40 = vld [vmem:[#allocation204_spill] sm:$0xff]  ;;  %v7932_v60 = vld [vmem:[#allocation131_spill] sm:$0xff] }
 0x315   :  { %3226 = vrot.lane.b32.xlu1 %v7930_v51, %s3828_s13  ;;  %3230 = vrot.lane.b32.xlu0 %v7931_v40, %s3828_s13  ;;  %v1412_v11 = vadd.f32 %v7932_v60, %v1298_v6  ;;  %v7933_v22 = vld [vmem:[#allocation163_spill] sm:$0xff]  ;;  %v7935_v62 = vld [vmem:[#allocation166_spill] sm:$0xff]  ;;  %v7936_v12 = vld [vmem:[#allocation132_spill] sm:$0xff]  ;;  %v6755_v51 = vpop.permute.xlu1 %2536 }
 0x316   :  { %v1520_v4 = vadd.f32 %v7933_v22, %v1408_v23  ;;  %v7934_v1 = vld [vmem:[#allocation15_spill] sm:$0xff]  ;;  %v1523_v14 = vadd.f32 %v7935_v62, %v1411_v8  ;;  %v1372_v3 = vadd.f32 %v7936_v12, %v1258_v31  ;;  %v7937_v24 = vld [vmem:[#allocation133_spill] sm:$0xff]  ;;  %v7938_v47 = vld [vmem:[#allocation134_spill] sm:$0xff] }
 0x317   :  { %v1521_v53 = vadd.f32 %v7934_v1, %v1409_v42  ;;  %v1375_v55 = vadd.f32 %v7937_v24, %v1261_v33  ;;  %v1410_v0 = vadd.f32 %v7938_v47, %v1296_v59  ;;  %v7939_v21 = vld [vmem:[#allocation135_spill] sm:$0xff]  ;;  %v7940_v40 = vld [vmem:[#allocation136_spill] sm:$0xff]  ;;  %v7941_v60 = vld [vmem:[#allocation137_spill] sm:$0xff] }
 0x318   :  { %v1413_v34 = vadd.f32 %v7939_v21, %v1299_v57  ;;  %v1446_v6 = vadd.f32 %v7940_v40, %v1332_v5  ;;  %v1447_v23 = vadd.f32 %v7941_v60, %v1333_v56  ;;  %v7942_v22 = vld [vmem:[#allocation138_spill] sm:$0xff]  ;;  %v7943_v1 = vld [vmem:[#allocation139_spill] sm:$0xff]  ;;  %v7944_v62 = vld [vmem:[#allocation140_spill] sm:$0xff] }
 0x319   :  { %v1449_v42 = vadd.f32 %v7942_v22, %v1335_v32  ;;  %v1450_v8 = vadd.f32 %v7943_v1, %v1336_v35  ;;  %v1448_v31 = vadd.f32 %v7944_v62, %v1334_v49  ;;  %v7945_v12 = vld [vmem:[#allocation141_spill] sm:$0xff]  ;;  %v7946_v24 = vld [vmem:[#allocation142_spill] sm:$0xff]  ;;  %v7948_v47 = vld [vmem:[#allocation260_spill] sm:$0xff] }
 0x31a   :  { %v1451_v33 = vadd.f32 %v7945_v12, %v1337_v63  ;;  %v1484_v59 = vadd.f32 %v7946_v24, %v1370_v2  ;;  %v7947_v57 = vld [vmem:[#allocation205_spill] sm:$0xff]  ;;  %v7949_v21 = vrot.slane %v7948_v47, 2  ;;  %v7950_v5 = vld [vmem:[#allocation143_spill] sm:$0xff]  ;;  %v7951_v56 = vld [vmem:[#allocation144_spill] sm:$0xff]  ;;  %v6781_v47 = vpop.permute.xlu1 %2538 }
 0x31b   :  { %3232 = vrot.lane.b32.xlu1 %v7947_v57, %s3828_s13  ;;  %v1485_v40 = vadd.f32 %v7950_v5, %v1371_v17  ;;  %v1487_v60 = vadd.f32 %v7951_v56, %v1373_v50  ;;  %v7952_v32 = vld [vmem:[#allocation145_spill] sm:$0xff]  ;;  %v7953_v35 = vld [vmem:[#allocation168_spill] sm:$0xff]  ;;  %v7954_v49 = vld [vmem:[#allocation146_spill] sm:$0xff] }
 0x31c   :  { %3180 = vrot.lane.b32.xlu0 %v7949_v21, %s3827_s8  ;;  %v1488_v22 = vadd.f32 %v7952_v32, %v1374_v45  ;;  %v1524_v1 = vadd.f32 %v7953_v35, %v1412_v11  ;;  %v1486_v62 = vadd.f32 %v7954_v49, %v1372_v3  ;;  %v7955_v63 = vld [vmem:[#allocation147_spill] sm:$0xff]  ;;  %v7958_v57 = vld [vmem:[#allocation161_spill] sm:$0xff]  ;;  %v6783_v21 = vpop.permute.xlu0 %2684  ;;  %v7960_v17 = vld [vmem:[#allocation18_spill] sm:$0xff] }
 0x31d   :  { %v1489_v12 = vadd.f32 %v7955_v63, %v1375_v55  ;;  %v7956_v2 = vld [vmem:[#allocation231_spill] sm:$0xff]  ;;  %v7959_v38 = vrot.slane %v7958_v57, 1  ;;  %v1556_v50 = vadd.f32 %v7960_v17, %v1446_v6  ;;  %v7962_v56 = vld [vmem:[#allocation22_spill] sm:$0xff]  ;;  %v7964_v35 = vld [vmem:[#allocation13_spill] sm:$0xff] }
 0x31e   :  { %v7957_v24 = vrot.slane %v7956_v2, 1  ;;  %v7961_v5 = vld [vmem:[#allocation19_spill] sm:$0xff]  ;;  %v1559_v11 = vadd.f32 %v7962_v56, %v1449_v42  ;;  %v7963_v32 = vld [vmem:[#allocation26_spill] sm:$0xff]  ;;  %v7965_v55 = vrot.slane %v7964_v35, 1  ;;  %v7966_v63 = vld [vmem:[#allocation17_spill] sm:$0xff] }
 0x31f   :  { %v1525_v54 = vadd.f32 %v7959_v38, %v1413_v34  ;;  %v1557_v45 = vadd.f32 %v7961_v5, %v1447_v23  ;;  %v1560_v3 = vadd.f32 %v7963_v32, %v1450_v8  ;;  %v7969_v34 = vld [vmem:[#allocation201_spill] sm:$0xff]  ;;  %v7973_v23 = vld [vmem:[#allocation148_spill] sm:$0xff] }
 0x320   :  { %v1522_v16 = vadd.f32 %v7957_v24, %v1410_v0  ;;  %v1558_v49 = vadd.f32 %v7965_v55, %v1448_v31  ;;  %v7967_v0 = vrot.slane %v7966_v63, 1  ;;  %v7968_v24 = vld [vmem:[#allocation176_spill] sm:$0xff]  ;;  %v7970_v57 = vrot.slane %v7969_v34, 2  ;;  %v7971_v6 = vld [vmem:[#allocation261_spill] sm:$0xff]  ;;  %v7978_v63 = vld [vmem:[#allocation150_spill] sm:$0xff] }
 0x321   :  { %v1592_v38 = vadd.f32 %v7968_v24, %v1484_v59  ;;  %v7972_v17 = vrot.slane %v7971_v6, 2  ;;  %v1640_v42 = vadd.f32 %v7973_v23, %v1520_v4  ;;  %v7974_v5 = vld [vmem:[#allocation21_spill] sm:$0xff]  ;;  %v7975_v56 = vld [vmem:[#allocation28_spill] sm:$0xff]  ;;  %v1643_v59 = vadd.f32 %v7978_v63, %v1523_v14  ;;  %v6810_v6 = vpop.permute.xlu1 %2686  ;;  %v7983_v4 = vld [vmem:[#allocation151_spill] sm:$0xff] }
 0x322   :  { %v1561_v2 = vadd.f32 %v7967_v0, %v1451_v33  ;;  %3186 = vrot.lane.b32.xlu1 %v7970_v57, %s3827_s8  ;;  %v1593_v8 = vadd.f32 %v7974_v5, %v1485_v40  ;;  %v1595_v32 = vadd.f32 %v7975_v56, %v1487_v60  ;;  %v7976_v31 = vld [vmem:[#allocation29_spill] sm:$0xff]  ;;  %v7979_v0 = vld [vmem:[#allocation172_spill] sm:$0xff]  ;;  %v7981_v57 = vld [vmem:[#allocation23_spill] sm:$0xff]  ;;  %v1644_v40 = vadd.f32 %v7983_v4, %v1524_v1  ;;  %s3706_s8 = sld [smem:[#allocation8 + $0x18]] }
 0x323   :  { %3228 = vrot.lane.b32.xlu0 %v7972_v17, %s3828_s13  ;;  %v1596_v35 = vadd.f32 %v7976_v31, %v1488_v22  ;;  %v7977_v55 = vld [vmem:[#allocation149_spill] sm:$0xff]  ;;  %v7980_v24 = vrot.slane %v7979_v0, 1  ;;  %v7982_v29 = vrot.slane %v7981_v57, 1  ;;  %v6812_v17 = vpop.permute.xlu0 %2690  ;;  %v7984_v23 = vld [vmem:[#allocation164_spill] sm:$0xff]  ;;  %v7986_v56 = vld [vmem:[#allocation175_spill] sm:$0xff] }
 0x324   :  { %v1641_v33 = vadd.f32 %v7977_v55, %v1521_v53  ;;  %v1737_v60 = vadd.f32 %v7984_v23, %v1593_v8  ;;  %v7985_v5 = vld [vmem:[#allocation165_spill] sm:$0xff]  ;;  %v1784_v53 = vadd.f32 %v7986_v56, %v1640_v42  ;;  %v7987_v31 = vld [vmem:[#allocation152_spill] sm:$0xff]  ;;  %v7992_v1 = vld [vmem:[#allocation154_spill] sm:$0xff] }
 0x325   :  { %v1594_v34 = vadd.f32 %v7980_v24, %v1486_v62  ;;  %v1597_v20 = vadd.f32 %v7982_v29, %v1489_v12  ;;  %v1739_v22 = vadd.f32 %v7985_v5, %v1595_v32  ;;  %v1642_v14 = vadd.f32 %v7987_v31, %v1522_v16  ;;  %v7988_v55 = vld [vmem:[#allocation153_spill] sm:$0xff]  ;;  %v7990_v29 = vld [vmem:[#allocation262_spill] sm:$0xff]  ;;  %v7996_v16 = vld [vmem:[#allocation155_spill] sm:$0xff] }
 0x326   :  { %v1645_v63 = vadd.f32 %v7988_v55, %v1525_v54  ;;  %v7989_v62 = vld [vmem:[#allocation177_spill] sm:$0xff]  ;;  %v7991_v12 = vrot.slane %v7990_v29, 2  ;;  %v1688_v24 = vadd.f32 %v7992_v1, %v1556_v50  ;;  %v7993_v8 = vld [vmem:[#allocation178_spill] sm:$0xff]  ;;  %v1689_v5 = vadd.f32 %v7996_v16, %v1557_v45  ;;  %v7997_v54 = vld [vmem:[#allocation156_spill] sm:$0xff]  ;;  %v6834_v29 = vpop.permute.xlu1 %2692 }
 0x327   :  { %v1785_v0 = vadd.f32 %v7989_v62, %v1641_v33  ;;  %3272 = vrot.lane.b32.xlu0 %v6479_v48, %s3828_s13  ;;  %v1787_v57 = vadd.f32 %v7993_v8, %v1643_v59  ;;  %v7994_v32 = vld [vmem:[#allocation225_spill] sm:$0xff]  ;;  %v7995_v42 = vld [vmem:[#allocation226_spill] sm:$0xff]  ;;  %v1691_v56 = vadd.f32 %v7997_v54, %v1559_v11  ;;  %v8000_v48 = vld [vmem:[#allocation159_spill] sm:$0xff] }
 0x328   :  { %3234 = vrot.lane.b32.xlu1 %v7991_v12, %s3828_s13  ;;  %v1881_v4 = vadd.f32 %v7994_v32, %v1737_v60  ;;  %v1883_v23 = vadd.f32 %v7995_v42, %v1739_v22  ;;  %v7998_v33 = vld [vmem:[#allocation157_spill] sm:$0xff]  ;;  %v7999_v55 = vld [vmem:[#allocation158_spill] sm:$0xff]  ;;  %v6836_v12 = vpop.permute.xlu0 %2688  ;;  %v1693_v50 = vadd.f32 %v8000_v48, %v1561_v2  ;;  %v8001_v1 = vld [vmem:[#allocation160_spill] sm:$0xff] }
 0x329   :  { %v1692_v31 = vadd.f32 %v7998_v33, %v1560_v3  ;;  %v1690_v62 = vadd.f32 %v7999_v55, %v1558_v49  ;;  %v1736_v59 = vadd.f32 %v8001_v1, %v1592_v38  ;;  %v8002_v8 = vld [vmem:[#allocation174_spill] sm:$0xff]  ;;  %v8003_v32 = vld [vmem:[#allocation33_spill] sm:$0xff]  ;;  %v8004_v42 = vld [vmem:[#allocation180_spill] sm:$0xff] }
 0x32a   :  { %v1740_v60 = vadd.f32 %v8002_v8, %v1596_v35  ;;  %v1916_v22 = vadd.f32 %v8003_v32, %v1784_v53  ;;  %v1788_v45 = vadd.f32 %v8004_v42, %v1644_v40  ;;  %v8005_v16 = vld [vmem:[#allocation185_spill] sm:$0xff]  ;;  %v8006_v54 = vld [vmem:[#allocation34_spill] sm:$0xff]  ;;  %v8007_v49 = vld [vmem:[#allocation232_spill] sm:$0xff] }
 0x32b   :  { %v1786_v11 = vadd.f32 %v8005_v16, %v1642_v14  ;;  %v1917_v3 = vadd.f32 %v8006_v54, %v1785_v0  ;;  %3278 = vrot.lane.b32.xlu0 %v6510_v44, %s3828_s13  ;;  %v8008_v33 = vld [vmem:[#allocation235_spill] sm:$0xff]  ;;  %v8009_v55 = vld [vmem:[#allocation41_spill] sm:$0xff]  ;;  %v8012_v8 = vld [vmem:[#allocation190_spill] sm:$0xff] }
 0x32c   :  { %3274 = vrot.lane.b32.xlu1 %v6495_v46, %s3828_s13  ;;  %v1884_v2 = vadd.f32 %v8007_v49, %v1740_v60  ;;  %v1919_v38 = vadd.f32 %v8008_v33, %v1787_v57  ;;  %v1989_v35 = vadd.f32 %v8009_v55, %v1881_v4  ;;  %v8010_v48 = vld [vmem:[#allocation43_spill] sm:$0xff]  ;;  %v8011_v1 = vld [vmem:[#allocation181_spill] sm:$0xff]  ;;  %v1789_v14 = vadd.f32 %v8012_v8, %v1645_v63  ;;  %v6857_v46 = vpop.permute.xlu1 %2694  ;;  %v6859_v54 = vpop.permute.xlu0 %2732  ;;  %v8015_v44 = vld [vmem:[#allocation198_spill] sm:$0xff] }
 0x32d   :  { %v1991_v53 = vadd.f32 %v8010_v48, %v1883_v23  ;;  %v1738_v40 = vadd.f32 %v8011_v1, %v1594_v34  ;;  %v8013_v32 = vld [vmem:[#allocation191_spill] sm:$0xff]  ;;  %v8014_v42 = vld [vmem:[#allocation197_spill] sm:$0xff]  ;;  %v1835_v60 = vadd.f32 %v8015_v44, %v1691_v56  ;;  %v8017_v33 = vld [vmem:[#allocation36_spill] sm:$0xff] }
 0x32e   :  { %v1832_v0 = vadd.f32 %v8013_v32, %v1688_v24  ;;  %v1833_v16 = vadd.f32 %v8014_v42, %v1689_v5  ;;  %v8016_v49 = vld [vmem:[#allocation199_spill] sm:$0xff]  ;;  %v2133_v4 = vadd.f32 %v8017_v33, %v1989_v35  ;;  %v8018_v55 = vld [vmem:[#allocation236_spill] sm:$0xff]  ;;  %v8021_v8 = vld [vmem:[#allocation30_spill] sm:$0xff]  ;;  %v8023_v5 = vrot.slane %v6405_v10, 2 }
 0x32f   :  { %v1836_v57 = vadd.f32 %v8016_v49, %v1692_v31  ;;  %v2135_v23 = vadd.f32 %v8018_v55, %v1991_v53  ;;  %v8019_v48 = vld [vmem:[#allocation184_spill] sm:$0xff]  ;;  %v8020_v1 = vld [vmem:[#allocation35_spill] sm:$0xff]  ;;  %v8022_v24 = vrot.slane %v8021_v8, 2  ;;  %v8024_v56 = vld [vmem:[#allocation14_spill] sm:$0xff] }
 0x330   :  { %v1741_v34 = vadd.f32 %v8019_v48, %v1597_v20  ;;  %v1920_v63 = vadd.f32 %v8020_v1, %v1788_v45  ;;  %3280 = vrot.lane.b32.xlu1 %v6574_v19, %s3828_s13  ;;  %3276 = vrot.lane.b32.xlu0 %v8023_v5, %s3828_s13  ;;  %v2036_v31 = vadd.f32 %v8024_v56, %v1916_v22  ;;  %v8025_v42 = vld [vmem:[#allocation44_spill] sm:$0xff]  ;;  %v8026_v44 = vld [vmem:[#allocation54_spill] sm:$0xff]  ;;  %v8027_v49 = vld [vmem:[#allocation249_spill] sm:$0xff]  ;;  %v6885_v10 = vpop.permute.xlu1 %2734  ;;  %v6887_v5 = vpop.permute.xlu0 %2738 }
 0x331   :  { %v1918_v32 = vadd.f32 %v8022_v24, %v1786_v11  ;;  %v1992_v35 = vadd.f32 %v8025_v42, %v1884_v2  ;;  %v2277_v53 = vadd.f32 %v8026_v44, %v2133_v4  ;;  %v2279_v20 = vadd.f32 %v8027_v49, %v2135_v23  ;;  %v8028_v33 = vld [vmem:[#allocation200_spill] sm:$0xff]  ;;  %v8029_v55 = vld [vmem:[#allocation169_spill] sm:$0xff]  ;;  %v8032_v19 = vld [vmem:[#allocation38_spill] sm:$0xff] }
 0x332   :  { %v1834_v45 = vadd.f32 %v8028_v33, %v1690_v62  ;;  %v8030_v48 = vrot.slane %v8029_v55, 2  ;;  %v8031_v1 = vld [vmem:[#allocation37_spill] sm:$0xff]  ;;  %v6883_v24 = vadd.f32 %v8032_v19, %v1833_v16  ;;  %v8034_v4 = vld [vmem:[#allocation187_spill] sm:$0xff]  ;;  %v8035_v23 = vld [vmem:[#allocation170_spill] sm:$0xff] }
 0x333   :  { %v1952_v8 = vadd.f32 %v8031_v1, %v1832_v0  ;;  %v8033_v22 = vld [vmem:[#allocation241_spill] sm:$0xff]  ;;  %v6893_v56 = vadd.f32 %v8034_v4, %v1836_v57  ;;  %v2136_v62 = vadd.f32 %v8035_v23, %v1992_v35  ;;  %v8036_v42 = vld [vmem:[#allocation238_spill] sm:$0xff]  ;;  %v8039_v16 = vld [vmem:[#allocation16_spill] sm:$0xff]  ;;  %v8040_v1 = vrot.slane %v6486_v13, 2 }
 0x334   :  { %v1921_v11 = vadd.f32 %v8030_v48, %v1789_v14  ;;  %v6890_v2 = vadd.f32 %v8033_v22, %v1835_v60  ;;  %v2180_v44 = vadd.f32 %v8036_v42, %v2036_v31  ;;  %v8037_v14 = vld [vmem:[#allocation233_spill] sm:$0xff]  ;;  %v8038_v0 = vld [vmem:[#allocation162_spill] sm:$0xff]  ;;  %v2037_v55 = vadd.f32 %v8039_v16, %v1917_v3  ;;  %3320 = vrot.lane.b32.xlu0 %v6595_v27, %s3828_s13  ;;  %v8041_v60 = vld [vmem:[#allocation167_spill] sm:$0xff] }
 0x335   :  { %v1882_v49 = vadd.f32 %v8037_v14, %v1738_v40  ;;  %v1885_v33 = vadd.f32 %v8038_v0, %v1741_v34  ;;  %3282 = vrot.lane.b32.xlu1 %v8040_v1, %s3828_s13  ;;  %v2039_v57 = vadd.f32 %v8041_v60, %v1919_v38  ;;  %v8042_v35 = vld [vmem:[#allocation253_spill] sm:$0xff]  ;;  %v8043_v31 = vld [vmem:[#allocation59_spill] sm:$0xff]  ;;  %v8044_v40 = vld [vmem:[#allocation60_spill] sm:$0xff]  ;;  %v6921_v1 = vpop.permute.xlu1 %2740  ;;  %v6923_v38 = vpop.permute.xlu0 %2736 }
 0x336   :  { %v2280_v19 = vadd.f32 %v8042_v35, %v2136_v62  ;;  %v2319_v22 = vadd.f32 %v8043_v31, %v2277_v53  ;;  %v2321_v4 = vadd.f32 %v8044_v40, %v2279_v20  ;;  %v8045_v34 = vld [vmem:[#allocation213_spill] sm:$0xff]  ;;  %v8046_v3 = vld [vmem:[#allocation214_spill] sm:$0xff]  ;;  %v8049_v16 = vld [vmem:[#allocation239_spill] sm:$0xff] }
 0x337   :  { %v6911_v23 = vadd.f32 %v8045_v34, %v1693_v50  ;;  %v6914_v42 = vadd.f32 %v8046_v3, %v1736_v59  ;;  %v8047_v14 = vld [vmem:[#allocation237_spill] sm:$0xff]  ;;  %v2181_v27 = vadd.f32 %v8049_v16, %v2037_v55  ;;  %v8050_v62 = vld [vmem:[#allocation240_spill] sm:$0xff]  ;;  %v8053_v31 = vld [vmem:[#allocation71_spill] sm:$0xff]  ;;  %v2607_v16 = vrot.slane %v6514_v15, 1 }
 0x338   :  { %v8048_v13 = vrot.slane %v8047_v14, 2  ;;  %v2183_v53 = vadd.f32 %v8050_v62, %v2039_v57  ;;  %v8051_v60 = vld [vmem:[#allocation49_spill] sm:$0xff]  ;;  %v2435_v40 = vadd.f32 %v8053_v31, %v2321_v4  ;;  %v8055_v3 = vld [vmem:[#allocation39_spill] sm:$0xff]  ;;  %3326 = vrot.lane.b32.xlu0 %v6603_v26, %s3828_s13  ;;  %v8065_v26 = vld [vmem:[#allocation24_spill] sm:$0xff] }
 0x339   :  { %v2290_v20 = vadd.f32 %v8051_v60, %v2180_v44  ;;  %v8052_v35 = vld [vmem:[#allocation193_spill] sm:$0xff]  ;;  %v8056_v14 = vrot.slane %v8055_v3, 2  ;;  %3322 = vrot.lane.b32.xlu1 %v6600_v7, %s3828_s13  ;;  %v8059_v44 = vld [vmem:[#allocation256_spill] sm:$0xff]  ;;  %v6947_v7 = vpop.permute.xlu1 %2742 }
 0x33a   :  { %v6918_v0 = vadd.f32 %v8048_v13, %v1834_v45  ;;  %v2433_v50 = vadd.f32 %v8052_v35, %v2319_v22  ;;  %v8054_v59 = vld [vmem:[#allocation173_spill] sm:$0xff]  ;;  %v8057_v13 = vld [vmem:[#allocation188_spill] sm:$0xff]  ;;  %v8060_v22 = vld [vmem:[#allocation258_spill] sm:$0xff]  ;;  %v2549_v62 = vadd.f32 %v6734_v28, %v2435_v40 }
 0x33b   :  { %v2040_v34 = vadd.f32 %v8054_v59, %v1920_v63  ;;  %v1990_v45 = vadd.f32 %v8056_v14, %v1882_v49  ;;  %v8058_v48 = vrot.slane %v8057_v13, 2  ;;  %v2356_v57 = vadd.f32 %v8059_v44, %v2290_v20  ;;  %v8061_v49 = vld [vmem:[#allocation20_spill] sm:$0xff]  ;;  %v8062_v35 = vld [vmem:[#allocation242_spill] sm:$0xff]  ;;  %v6949_v14 = vpop.permute.xlu0 %2780  ;;  %v8068_v40 = vld [vmem:[#allocation25_spill] sm:$0xff] }
 0x33c   :  { %v2322_v4 = vadd.f32 %v8060_v22, %v2280_v19  ;;  %v2547_v63 = vadd.f32 %v6732_v39, %v2433_v50  ;;  %v2038_v60 = vadd.f32 %v8061_v49, %v1918_v32  ;;  %v8064_v59 = vld [vmem:[#allocation50_spill] sm:$0xff]  ;;  %v2041_v20 = vadd.f32 %v8065_v26, %v1921_v11  ;;  %v8067_v50 = vld [vmem:[#allocation72_spill] sm:$0xff]  ;;  %v8070_v22 = vld [vmem:[#allocation189_spill] sm:$0xff] }
 0x33d   :  { %v1993_v55 = vadd.f32 %v8058_v48, %v1885_v33  ;;  %v2184_v33 = vadd.f32 %v8062_v35, %v2040_v34  ;;  %v8063_v48 = vld [vmem:[#allocation243_spill] sm:$0xff]  ;;  %v2291_v3 = vadd.f32 %v8064_v59, %v2181_v27  ;;  %v8066_v13 = vld [vmem:[#allocation246_spill] sm:$0xff]  ;;  %v2470_v28 = vadd.f32 %v8067_v50, %v2356_v57  ;;  %3328 = vrot.lane.b32.xlu1 %v6618_v61, %s3828_s13 }
 0x33e   :  { %v2134_v31 = vadd.f32 %v8063_v48, %v1990_v45  ;;  %v2293_v19 = vadd.f32 %v8066_v13, %v2183_v53  ;;  %v2436_v39 = vadd.f32 %v6433_v41, %v2322_v4  ;;  %v2084_v32 = vadd.f32 %v8068_v40, %v1952_v8  ;;  %v8069_v44 = vld [vmem:[#allocation254_spill] sm:$0xff]  ;;  %v8072_v53 = vld [vmem:[#allocation257_spill] sm:$0xff]  ;;  %v8073_v4 = vld [vmem:[#allocation40_spill] sm:$0xff]  ;;  %v2783_v13 = vpop.permute.xlu1 %2782 }
 0x33f   :  { %v2357_v45 = vadd.f32 %v8070_v22, %v2291_v3  ;;  %v2608_v27 = vrot.slane %v6559_v30, 1  ;;  %v8071_v11 = vrot.slane %v6519_v25, 2  ;;  %v2655_v57 = vadd.f32 %v6627_v52, %v2547_v63  ;;  %v8074_v48 = vld [vmem:[#allocation171_spill] sm:$0xff]  ;;  %v2787_v50 = vpop.permute.xlu0 %2786 }
 0x340   :  { %v2278_v34 = vadd.f32 %v8069_v44, %v2134_v31  ;;  %v2359_v49 = vadd.f32 %v8072_v53, %v2293_v19  ;;  %v2550_v41 = vadd.f32 %v6755_v51, %v2436_v39  ;;  %v2657_v8 = vadd.f32 %v6630_v58, %v2549_v62  ;;  %v8075_v59 = vld [vmem:[#allocation247_spill] sm:$0xff]  ;;  %v8078_v44 = vld [vmem:[#allocation73_spill] sm:$0xff] }
 0x341   :  { %3324 = vrot.lane.b32.xlu0 %v8071_v11, %s3828_s13  ;;  %v2137_v35 = vadd.f32 %v8073_v4, %v1993_v55  ;;  %v2182_v31 = vadd.f32 %v8074_v48, %v2038_v60  ;;  %v2294_v3 = vadd.f32 %v8075_v59, %v2184_v33  ;;  %v8076_v26 = vld [vmem:[#allocation75_spill] sm:$0xff]  ;;  %v2582_v19 = vadd.f32 %v8078_v44, %v2470_v28  ;;  %v8080_v55 = vld [vmem:[#allocation42_spill] sm:$0xff]  ;;  %v8085_v53 = vld [vmem:[#allocation61_spill] sm:$0xff] }
 0x342   :  { %v2471_v61 = vadd.f32 %v8076_v26, %v2357_v45  ;;  %v8077_v25 = vld [vmem:[#allocation207_spill] sm:$0xff]  ;;  %v6974_v22 = vadd.f32 %v2783_v13, %v2655_v57  ;;  %v6976_v51 = vadd.f32 %v2787_v50, %v2657_v8  ;;  %v2185_v63 = vadd.f32 %v8080_v55, %v2041_v20  ;;  %v8087_v20 = vld [vmem:[#allocation53_spill] sm:$0xff]  ;;  %v2789_v13 = vpop.permute.xlu1 %2788  ;;  %v8091_v44 = vld [vmem:[#allocation206_spill] sm:$0xff] }
 0x343   :  { %v2473_v40 = vadd.f32 %v8077_v25, %v2359_v49  ;;  %v8079_v52 = vld [vmem:[#allocation179_spill] sm:$0xff]  ;;  %v8083_v45 = vrot.slane %v6534_v18, 2  ;;  %v2320_v49 = vadd.f32 %v8085_v53, %v2278_v34  ;;  %v2702_v57 = vadd.f32 %v6783_v21, %v2582_v19  ;;  %v2829_v18 = vpop.permute.xlu0 %2828 }
 0x344   :  { %v2085_v58 = vadd.f32 %v8079_v52, %v6883_v24  ;;  %v8081_v62 = vld [vmem:[#allocation255_spill] sm:$0xff]  ;;  %v2658_v8 = vadd.f32 %v6635_v9, %v2550_v41  ;;  %v8086_v24 = vld [vmem:[#allocation245_spill] sm:$0xff]  ;;  %v2292_v48 = vadd.f32 %v8087_v20, %v2182_v31  ;;  %v8094_v31 = vld [vmem:[#allocation248_spill] sm:$0xff] }
 0x345   :  { %v2281_v60 = vadd.f32 %v8081_v62, %v2137_v35  ;;  %v8082_v33 = vld [vmem:[#allocation195_spill] sm:$0xff]  ;;  %3330 = vrot.lane.b32.xlu1 %v8083_v45, %s3828_s13  ;;  %v2228_v4 = vadd.f32 %v8086_v24, %v2084_v32  ;;  %v8088_v35 = vld [vmem:[#allocation196_spill] sm:$0xff]  ;;  %v6999_v34 = vadd.f32 %v2829_v18, %v2702_v57  ;;  %v2295_v19 = vadd.f32 %v8094_v31, %v2185_v63  ;;  %v8096_v62 = vld [vmem:[#allocation182_spill] sm:$0xff]  ;;  %s3707_s13 = sld [smem:[#allocation8 + $0x33]] }
 0x346   :  { %v2360_v39 = vadd.f32 %v8082_v33, %v2294_v3  ;;  %v8084_v11 = vld [vmem:[#allocation27_spill] sm:$0xff]  ;;  %v8089_v3 = vld [vmem:[#allocation74_spill] sm:$0xff]  ;;  %v6997_v52 = vadd.f32 %v2789_v13, %v2658_v8  ;;  %v8093_v32 = vld [vmem:[#allocation32_spill] sm:$0xff]  ;;  %v2358_v33 = vadd.f32 %v8096_v62, %v2292_v48  ;;  %v2831_v20 = vpop.permute.xlu1 %2830 }
 0x347   :  { %v2087_v28 = vadd.f32 %v8084_v11, %v6890_v2  ;;  %v2583_v26 = vadd.f32 %v8089_v3, %v2471_v61  ;;  %v8090_v50 = vld [vmem:[#allocation263_spill] sm:$0xff]  ;;  %v2585_v2 = vadd.f32 %v8091_v44, %v2473_v40  ;;  %v2086_v41 = vadd.f32 %v8093_v32, %v6918_v0  ;;  %v8097_v11 = vld [vmem:[#allocation45_spill] sm:$0xff]  ;;  %v8100_v24 = vld [vmem:[#allocation194_spill] sm:$0xff]  ;;  %v2835_v63 = vpop.permute.xlu0 %2834 }
 0x348   :  { %v2474_v59 = vadd.f32 %v8088_v35, %v2360_v39  ;;  %v2434_v25 = vadd.f32 %v8090_v50, %v2320_v49  ;;  %v8092_v9 = vld [vmem:[#allocation31_spill] sm:$0xff]  ;;  %v2229_v53 = vadd.f32 %v8097_v11, %v2085_v58  ;;  %v8098_v49 = vld [vmem:[#allocation46_spill] sm:$0xff]  ;;  %v8101_v35 = vld [vmem:[#allocation77_spill] sm:$0xff] }
 0x349   :  { %v2088_v21 = vadd.f32 %v8092_v9, %v6893_v56  ;;  %v8095_v55 = vld [vmem:[#allocation63_spill] sm:$0xff]  ;;  %v2703_v40 = vadd.f32 %v6810_v6, %v2583_v26  ;;  %v2705_v45 = vadd.f32 %v6812_v17, %v2585_v2  ;;  %v2231_v57 = vadd.f32 %v8098_v49, %v2087_v28  ;;  %v8099_v56 = vld [vmem:[#allocation250_spill] sm:$0xff]  ;;  %v8103_v26 = vld [vmem:[#allocation48_spill] sm:$0xff] }
 0x34a   :  { %v2323_v61 = vadd.f32 %v8095_v55, %v2281_v60  ;;  %v2548_v39 = vadd.f32 %v6757_v43, %v2434_v25  ;;  %v2304_v8 = vadd.f32 %v8099_v56, %v2228_v4  ;;  %v2586_v0 = vadd.f32 %v8100_v24, %v2474_v59  ;;  %v8102_v6 = vld [vmem:[#allocation47_spill] sm:$0xff]  ;;  %v8104_v13 = vld [vmem:[#allocation64_spill] sm:$0xff]  ;;  %v8106_v59 = vld [vmem:[#allocation186_spill] sm:$0xff] }
 0x34b   :  { %v2472_v48 = vadd.f32 %v8101_v35, %v2358_v33  ;;  %v7017_v3 = vadd.f32 %v2831_v20, %v2703_v40  ;;  %v7019_v43 = vadd.f32 %v2835_v63, %v2705_v45  ;;  %v2232_v17 = vadd.f32 %v8102_v6, %v2088_v21  ;;  %v8105_v18 = vld [vmem:[#allocation259_spill] sm:$0xff]  ;;  %v8108_v2 = vld [vmem:[#allocation265_spill] sm:$0xff]  ;;  %v8110_v31 = vld [vmem:[#allocation244_spill] sm:$0xff]  ;;  %v2837_v40 = vpop.permute.xlu1 %2836  ;;  %v2785_v45 = vpop.permute.xlu0 %2784 }
 0x34c   :  { %v2437_v60 = vadd.f32 %v6562_v36, %v2323_v61  ;;  %v2230_v58 = vadd.f32 %v8103_v26, %v2086_v41  ;;  %v2361_v28 = vadd.f32 %v8104_v13, %v2295_v19  ;;  %v2394_v4 = vadd.f32 %v8105_v18, %v2304_v8  ;;  %v8111_v55 = vld [vmem:[#allocation251_spill] sm:$0xff]  ;;  %v8112_v61 = vld [vmem:[#allocation80_spill] sm:$0xff]  ;;  %v8113_v62 = vld [vmem:[#allocation81_spill] sm:$0xff] }
 0x34d   :  { %v8107_v50 = vrot.slane %v8106_v59, 2  ;;  %v2706_v44 = vadd.f32 %v6834_v29, %v2586_v0  ;;  %v8109_v9 = vrot.slane %v8108_v2, 1  ;;  %v1988_v21 = vadd.f32 %v8110_v31, %v6914_v42  ;;  %v8114_v11 = vld [vmem:[#allocation252_spill] sm:$0xff]  ;;  %v8115_v49 = vld [vmem:[#allocation203_spill] sm:$0xff]  ;;  %v8118_v42 = vld [vmem:[#allocation234_spill] sm:$0xff] }
 0x34e   :  { %v2551_v36 = vadd.f32 %v6781_v47, %v2437_v60  ;;  %v2305_v41 = vadd.f32 %v8111_v55, %v2229_v53  ;;  %v2475_v19 = vadd.f32 %v8112_v61, %v2361_v28  ;;  %v2508_v33 = vadd.f32 %v8113_v62, %v2394_v4  ;;  %v8119_v53 = vld [vmem:[#allocation55_spill] sm:$0xff]  ;;  %v8120_v63 = vld [vmem:[#allocation56_spill] sm:$0xff]  ;;  %v8121_v35 = vld [vmem:[#allocation65_spill] sm:$0xff] }
 0x34f   :  { %v1957_v25 = vadd.f32 %v8107_v50, %v6911_v23  ;;  %v2656_v32 = vadd.f32 %v8109_v9, %v2548_v39  ;;  %v2307_v23 = vadd.f32 %v8114_v11, %v2231_v57  ;;  %v8116_v47 = vrot.slane %v8115_v49, 1  ;;  %v8117_v39 = vld [vmem:[#allocation183_spill] sm:$0xff]  ;;  %v8122_v26 = vld [vmem:[#allocation66_spill] sm:$0xff]  ;;  %v8126_v50 = vld [vmem:[#allocation52_spill] sm:$0xff]  ;;  %v2791_v31 = vpop.permute.xlu1 %2790 }
 0x350   :  { %v7040_v29 = vadd.f32 %v2837_v40, %v2706_v44  ;;  %v2132_v0 = vadd.f32 %v8118_v42, %v1988_v21  ;;  %v2308_v20 = vadd.f32 %v8119_v53, %v2232_v17  ;;  %v2306_v60 = vadd.f32 %v8120_v63, %v2230_v58  ;;  %v8123_v28 = vld [vmem:[#allocation266_spill] sm:$0xff]  ;;  %v8125_v4 = vld [vmem:[#allocation51_spill] sm:$0xff]  ;;  %v2833_v58 = vpop.permute.xlu0 %2832  ;;  %v8135_v49 = vld [vmem:[#allocation208_spill] sm:$0xff] }
 0x351   :  { %v2584_v56 = vadd.f32 %v8116_v47, %v2472_v48  ;;  %v7042_v8 = vadd.f32 %v2785_v45, %v2656_v32  ;;  %v2089_v24 = vadd.f32 %v8117_v39, %v1957_v25  ;;  %v2395_v6 = vadd.f32 %v8121_v35, %v2305_v41  ;;  %v8127_v25 = vld [vmem:[#allocation70_spill] sm:$0xff]  ;;  %v8131_v41 = vld [vmem:[#allocation83_spill] sm:$0xff]  ;;  %v8133_v45 = vld [vmem:[#allocation68_spill] sm:$0xff] }
 0x352   :  { %v2397_v13 = vadd.f32 %v8122_v26, %v2307_v23  ;;  %v8124_v48 = vrot.slane %v8123_v28, 1  ;;  %v2276_v44 = vadd.f32 %v8126_v50, %v2132_v0  ;;  %v8128_v2 = vrot.slane %v8127_v25, 1  ;;  %v8129_v32 = vld [vmem:[#allocation78_spill] sm:$0xff]  ;;  %v8132_v40 = vld [vmem:[#allocation67_spill] sm:$0xff]  ;;  %v7077_v0 = vld [vmem:[#allocation2 + $0x30] sm:$0xff] }
 0x353   :  { %v2704_v57 = vadd.f32 %v6836_v12, %v2584_v56  ;;  %v2233_v59 = vadd.f32 %v8125_v4, %v2089_v24  ;;  %v2618_v17 = vadd.f32 %v8129_v32, %v2508_v33  ;;  %v8130_v21 = vld [vmem:[#allocation82_spill] sm:$0xff]  ;;  %v2396_v11 = vadd.f32 %v8133_v45, %v2306_v60  ;;  %v8137_v33 = vld [vmem:[#allocation79_spill] sm:$0xff]  ;;  %v8138_v53 = vld [vmem:[#allocation76_spill] sm:$0xff] }
 0x354   :  { %v2659_v18 = vadd.f32 %v8124_v48, %v2551_v36  ;;  %v2587_v9 = vadd.f32 %v8128_v2, %v2475_v19  ;;  %v2509_v55 = vadd.f32 %v8130_v21, %v2395_v6  ;;  %v2511_v61 = vadd.f32 %v8131_v41, %v2397_v13  ;;  %v8139_v63 = vld [vmem:[#allocation58_spill] sm:$0xff]  ;;  %v8140_v35 = vld [vmem:[#allocation57_spill] sm:$0xff]  ;;  %v8141_v26 = vld [vmem:[#allocation84_spill] sm:$0xff]  ;;  %v2877_v28 = vpop.permute.xlu0 %2876 }
 0x355   :  { %v7060_v12 = vadd.f32 %v2833_v58, %v2704_v57  ;;  %v2398_v36 = vadd.f32 %v8132_v40, %v2308_v20  ;;  %v8134_v23 = vrot.slane %v6499_v37, 1  ;;  %v8136_v47 = vrot.slane %v8135_v49, 1  ;;  %v8143_v50 = vld [vmem:[#allocation202_spill] sm:$0xff]  ;;  %v8144_v25 = vld [vmem:[#allocation192_spill] sm:$0xff]  ;;  %v8146_v41 = vld [vmem:[#allocation85_spill] sm:$0xff] }
 0x356   :  { %v2803_v62 = vadd.f32 %v2791_v31, %v2659_v18  ;;  %v2610_v56 = vrot.slane %v8137_v33, 1  ;;  %v2707_v39 = vadd.f32 %v6857_v46, %v2587_v9  ;;  %v2750_v24 = vadd.f32 %v6859_v54, %v2618_v17  ;;  %v8142_v46 = vld [vmem:[#allocation94_spill] sm:$0xff]  ;;  %v2839_v54 = vpop.permute.xlu1 %2838  ;;  %v8147_v30 = vld [vmem:[#allocation95_spill] sm:$0xff] }
 0x357   :  { %v2606_v19 = vsel %vm440_vm3, %v8136_v47, %v8134_v23  ;;  %v2609_v42 = vsel %vm440_vm3, %v2607_v16, %v2608_v27  ;;  %v2626_v20 = vmul.f32 %v7077_v0, %v8138_v53  ;;  %v2309_v60 = vadd.f32 %v8139_v63, %v2233_v59 }
 0x358   :  { %v2318_v6 = vadd.f32 %v8140_v35, %v2276_v44  ;;  %v2512_v13 = vadd.f32 %v8141_v26, %v2398_v36  ;;  %v2510_v57 = vadd.f32 %v8142_v46, %v2396_v11  ;;  %v2619_v48 = vadd.f32 %v2606_v19, %v2509_v55  ;;  %v2883_v55 = vpop.permute.xlu0 %2882 }
 0x359   :  { %v2621_v18 = vadd.f32 %v2609_v42, %v2511_v61  ;;  %v7085_v15 = vadd.f32 %v2839_v54, %v2707_v39  ;;  %v7087_v16 = vadd.f32 %v2877_v28, %v2750_v24  ;;  %v2611_v4 = vsel %vm440_vm3, %v2608_v27, %v2610_v56 }
 0x35a   :  { %v2399_v59 = vadd.f32 %v8143_v50, %v2309_v60  ;;  %v2432_v44 = vadd.f32 %v8144_v25, %v2318_v6  ;;  %v2751_v2 = vadd.f32 %v6885_v10, %v2619_v48  ;;  %v2622_v32 = vadd.f32 %v2611_v4, %v2512_v13  ;;  %v2879_v21 = vpop.permute.xlu1 %2878 }
 0x35b   :  { %v2753_v9 = vadd.f32 %v6887_v5, %v2621_v18  ;;  %v8145_v17 = vmov %v8134_v23  ;;  %v2638_v58 = vrot.slane %v2626_v20, 1  ;;  %v8148_v5 = vld [vmem:[#allocation264_spill] sm:$0xff]  ;;  %v2949_v4 = vstv %s3706_s8 }
 0x35c   :  { %v2620_v31 = vadd.f32 %v8145_v17, %v2510_v57  ;;  %v2513_v61 = vadd.f32 %v8146_v41, %v2399_v59  ;;  %v2546_v40 = vadd.f32 %v8147_v30, %v2432_v44  ;;  %v7100_v27 = vadd.f32 %v2879_v21, %v2751_v2  ;;  %v2881_v49 = vpop.permute.xlu0 %2880  ;;  %v7144_v59 = vld [vmem:[#allocation2 + $0x38] sm:$0xff]  ;;  %v7157_v21 = vld [vmem:[#allocation2 + $0x80] sm:$0xff] }
 0x35d   :  { %v7102_v36 = vadd.f32 %v2883_v55, %v2753_v9  ;;  %v2754_v45 = vadd.f32 %v6921_v1, %v2622_v32  ;;  %v8149_v11 = vrot.slane %v8148_v5, 1  ;;  %v7151_v32 = vld [vmem:[#allocation2 + $0x40] sm:$0x3f]  ;;  %v2954_v55 = vmul.f32 %v7157_v21, %v2949_v4  ;;  %v7165_v5 = vld [vmem:[#allocation2 + $0x88] sm:$0x3f] }
 0x35e   :  { %v2752_v10 = vadd.f32 %v6923_v38, %v2620_v31  ;;  %v2885_v23 = vpop.permute.xlu1 %2884  ;;  %v2623_v47 = vadd.f32 %v2610_v56, %v2513_v61  ;;  %v2952_v17 = vmul.f32 %v7151_v32, %v2949_v4  ;;  %v7154_v31 = vld [vmem:[#allocation2 + $0x78] sm:$0xff] }
 0x35f   :  { %v2640_v37 = vsel %vm440_vm3, %v2638_v58, %v8149_v11  ;;  %v7109_v33 = vadd.f32 %v2885_v23, %v2754_v45  ;;  %v2953_v58 = vmul.f32 %v7154_v31, %v2949_v4  ;;  %v2955_v11 = vmul.f32 %v7165_v5, %v2949_v4 }
 0x360   :  { %v2654_v19 = vadd.f32 %v2640_v37, %v2546_v40  ;;  %v7111_v39 = vadd.f32 %v2881_v49, %v2752_v10  ;;  %v2755_v24 = vadd.f32 %v6947_v7, %v2623_v47  ;;  %v2925_v1 = vpop.permute.xlu0 %2924  ;;  %v2965_v40 = vrot.slane %v2952_v17, 2 }
 0x361   :  { %v2967_v45 = vrot.slane %v2953_v58, 2  ;;  %v2968_v10 = vrot.slane %v2954_v55, 2 }
 0x362   :  { %v2798_v42 = vadd.f32 %v6949_v14, %v2654_v19  ;;  %v2887_v53 = vpop.permute.xlu1 %2886 }
 0x363   :  { %v7115_v20 = vadd.f32 %v2887_v53, %v2755_v24  ;;  %v2969_v24 = vsel %vm837_vm4, %v2967_v45, %v2968_v10 }
 0x364   :  { %v7117_v38 = vadd.f32 %v2925_v1, %v2798_v42  ;;  %v2931_v60 = vpop.permute.xlu0 %2930  ;;  %v2970_v42 = vrot.slane %v2955_v11, 2 }
 0x365   :  { %v7123_v56 = vadd.f32 %v2931_v60, %v6976_v51  ;;  %v2981_v60 = vadd.f32 %v2969_v24, %v7019_v43  ;;  %v3021_v24 = vstv %s3708_s0 }
 0x366   :  { %v2927_v63 = vpop.permute.xlu1 %2926 }
 0x367   :  { %v7120_v35 = vadd.f32 %v2927_v63, %v6974_v22 }
 0x368   :  { %v2929_v26 = vpop.permute.xlu0 %2928 }
 0x369   :  { %v7129_v14 = vadd.f32 %v2929_v26, %v7042_v8  ;;  %v2950_v8 = vmul.f32 %v7077_v0, %v2949_v4 }
 0x36a   :  { %v2933_v6 = vpop.permute.xlu1 %2932 }
 0x36b   :  { %v7126_v7 = vadd.f32 %v2933_v6, %v6997_v52  ;;  %v2962_v2 = vrot.slane %v2950_v8, 2  ;;  %v2985_v6 = vstv %s3707_s13 }
 0x36c   :  { %v3081_v46 = vpop.permute.xlu0 %3080  ;;  %v2986_v8 = vmul.f32 %v7077_v0, %v2985_v6  ;;  %v2988_v58 = vmul.f32 %v7151_v32, %v2985_v6  ;;  %v2990_v11 = vmul.f32 %v7157_v21, %v2985_v6 }
 0x36e   :  { %v2935_v13 = vpop.permute.xlu1 %2934  ;;  %v2998_v45 = vrot.slane %v2986_v8, 2 }
 0x36f   :  { %v7131_v57 = vadd.f32 %v2935_v13, %v2803_v62  ;;  %v2951_v62 = vmul.f32 %v7144_v59, %v2949_v4 }
 0x370   :  { %v3087_v28 = vpop.permute.xlu0 %3086 }
 0x371   :  { %v2963_v9 = vrot.slane %v2951_v62, 2  ;;  %v3101_v4 = vadd.f32 %v3087_v28, %v2981_v60  ;;  %v2987_v62 = vmul.f32 %v7144_v59, %v2985_v6 }
 0x372   :  { %v3083_v54 = vpop.permute.xlu1 %3082 }
 0x373   :  { %v2964_v30 = vsel %vm837_vm4, %v2962_v2, %v2963_v9  ;;  %v2966_v19 = vsel %vm837_vm4, %v2963_v9, %v2965_v40 }
 0x374   :  { %v7133_v48 = vpop.permute.xlu0 %3084  ;;  %v2978_v49 = vadd.f32 %v2964_v30, %v6999_v34  ;;  %v2979_v63 = vadd.f32 %v2966_v19, %v7017_v3 }
 0x376   :  { %v3089_v22 = vpop.permute.xlu1 %3088  ;;  %v3098_v47 = vadd.f32 %v3081_v46, %v2978_v49  ;;  %v3099_v13 = vadd.f32 %v3083_v54, %v2979_v63  ;;  %v2971_v46 = vsel %vm837_vm4, %v2968_v10, %v2970_v42  ;;  %v2989_v54 = vmul.f32 %v7154_v31, %v2985_v6 }
 0x377   :  { %v2982_v3 = vadd.f32 %v2971_v46, %v7040_v29  ;;  %v2999_v10 = vrot.slane %v2987_v62, 2  ;;  %v2980_v29 = vadd.f32 %v2965_v40, %v7060_v12  ;;  %v2983_v12 = vadd.f32 %v2970_v42, %v7085_v15 }
 0x378   :  { %v7137_v18 = vpop.permute.xlu0 %3128  ;;  %v3003_v63 = vrot.slane %v2989_v54, 2 }
 0x379   :  { %v3102_v55 = vadd.f32 %v3089_v22, %v2982_v3  ;;  %v3100_v22 = vadd.f32 %v7133_v48, %v2980_v29 }
 0x37a   :  { %v7135_v51 = vpop.permute.xlu1 %3090 }
 0x37b   :  { %v3103_v48 = vadd.f32 %v7135_v51, %v2983_v12 }
 0x37c   :  { %v7141_v50 = vpop.permute.xlu0 %3134 }
 0x37e   :  { %v7139_v52 = vpop.permute.xlu1 %3130 }
 0x380   :  { %v7149_v44 = vpop.permute.xlu0 %3132 }
 0x382   :  { %v7147_v25 = vpop.permute.xlu1 %3136 }
 0x384   :  { %v7162_v61 = vpop.permute.xlu0 %3176 }
 0x386   :  { %v7160_v41 = vpop.permute.xlu1 %3138 }
 0x388   :  { %v7170_v23 = vpop.permute.xlu0 %3182 }
 0x38a   :  { %v7168_v37 = vpop.permute.xlu1 %3178 }
 0x38c   :  { %v3225_v1 = vpop.permute.xlu0 %3224 }
 0x38d   :  { %v3242_v26 = vadd.f32 %v3225_v1, %v3098_v47  ;;  %v3001_v1 = vrot.slane %v2988_v58, 2 }
 0x38e   :  { %v7175_v53 = vpop.permute.xlu1 %3184 }
 0x38f   :  { %v3345_v34 = vsel %vm3344_vm5, %v3242_v26, 0.0  ;;  %v3000_v26 = vsel %vm837_vm4, %v2998_v45, %v2999_v10 }
 0x390   :  { %v3231_v9 = vpop.permute.xlu0 %3230  ;;  %3346 = vadd.xlane.f32.xlu0 %v3345_v34  ;;  %v3014_v40 = vadd.f32 %v3000_v26, %v7087_v16 }
 0x391   :  { %v3245_v43 = vadd.f32 %v3231_v9, %v3101_v4  ;;  %v2991_v4 = vmul.f32 %v7165_v5, %v2985_v6  ;;  %v3002_v6 = vsel %vm837_vm4, %v2999_v10, %v3001_v1 }
 0x392   :  { %v3227_v2 = vpop.permute.xlu1 %3226  ;;  %v3146_v62 = vadd.f32 %v7137_v18, %v3014_v40  ;;  %v3015_v16 = vadd.f32 %v3002_v6, %v7100_v27 }
 0x393   :  { %v3243_v17 = vadd.f32 %v3227_v2, %v3099_v13  ;;  %v3355_v30 = vsel %vm3344_vm5, %v3245_v43, 0.0  ;;  %v3004_v13 = vrot.slane %v2990_v11, 2  ;;  %v3022_v2 = vmul.f32 %v7077_v0, %v3021_v24 }
 0x394   :  { %v7189_v47 = vpop.permute.xlu0 %3180  ;;  %3356 = vadd.xlane.f32.xlu0 %v3355_v30  ;;  %v3023_v43 = vmul.f32 %v7144_v59, %v3021_v24  ;;  %v3024_v0 = vmul.f32 %v7151_v32, %v3021_v24  ;;  %v3147_v54 = vadd.f32 %v7139_v52, %v3015_v16  ;;  %v3016_v52 = vadd.f32 %v3001_v1, %v7111_v39 }
 0x395   :  { %v3348_v28 = vsel %vm3344_vm5, %v3243_v17, 0.0  ;;  %v3005_v3 = vsel %vm837_vm4, %v3003_v63, %v3004_v13  ;;  %v3006_v17 = vrot.slane %v2991_v4, 2  ;;  %v3034_v10 = vrot.slane %v3022_v2, 2 }
 0x396   :  { %v3233_v49 = vpop.permute.xlu1 %3232  ;;  %3349 = vadd.xlane.f32.xlu1 %v3348_v28  ;;  %v3017_v51 = vadd.f32 %v3005_v3, %v7102_v36  ;;  %v3035_v27 = vrot.slane %v3023_v43, 2  ;;  %v3026_v36 = vmul.f32 %v7157_v21, %v3021_v24  ;;  %v3037_v29 = vrot.slane %v3024_v0, 2 }
 0x397   :  { %v3246_v19 = vadd.f32 %v3233_v49, %v3102_v55  ;;  %v3025_v55 = vmul.f32 %v7154_v31, %v3021_v24  ;;  %v3007_v45 = vsel %vm837_vm4, %v3004_v13, %v3006_v17  ;;  %v3027_v4 = vmul.f32 %v7165_v5, %v3021_v24 }
 0x398   :  { %v3229_v46 = vpop.permute.xlu0 %3228  ;;  %v3149_v28 = vadd.f32 %v7141_v50, %v3017_v51  ;;  %v3018_v32 = vadd.f32 %v3007_v45, %v7109_v33  ;;  %v3036_v21 = vsel %vm837_vm4, %v3034_v10, %v3035_v27  ;;  %v3040_v13 = vrot.slane %v3026_v36, 2 }
 0x399   :  { %v3358_v60 = vsel %vm3344_vm5, %v3246_v19, 0.0  ;;  %v3244_v8 = vadd.f32 %v3229_v46, %v3100_v22  ;;  %v3148_v22 = vadd.f32 %v7149_v44, %v3016_v52  ;;  %v3039_v26 = vrot.slane %v3025_v55, 2 }
 0x39a   :  { %v7196_v34 = vpop.permute.xlu1 %3186  ;;  %3359 = vadd.xlane.f32.xlu0 %v3358_v60  ;;  %v3150_v19 = vadd.f32 %v7147_v25, %v3018_v32  ;;  %v3019_v39 = vadd.f32 %v3006_v17, %v7115_v20  ;;  %v3050_v25 = vadd.f32 %v3036_v21, %v7117_v38  ;;  %v3038_v5 = vsel %vm837_vm4, %v3035_v27, %v3037_v29 }
 0x39b   :  { %v3352_v9 = vsel %vm3351_vm6, %v3244_v8, 0.0  ;;  %v3041_v24 = vsel %vm837_vm4, %v3039_v26, %v3040_v13  ;;  %v3051_v20 = vadd.f32 %v3038_v5, %v7120_v35  ;;  %v3370_v27 = vlaneseq }
 0x39c   :  { %3353 = vadd.xlane.f32.xlu1 %v3352_v9  ;;  %v3273_v15 = vpop.permute.xlu0 %3272  ;;  %v3151_v12 = vadd.f32 %v7160_v41, %v3019_v39  ;;  %v3194_v40 = vadd.f32 %v7162_v61, %v3050_v25  ;;  %v3053_v38 = vadd.f32 %v3041_v24, %v7123_v56  ;;  %v3052_v56 = vadd.f32 %v3037_v29, %v7129_v14 }
 0x39d   :  { %v3290_v18 = vadd.f32 %v3273_v15, %v3146_v62  ;;  %v3042_v62 = vrot.slane %v3027_v4, 2  ;;  %v3195_v61 = vadd.f32 %v7168_v37, %v3051_v20  ;;  %v3373_v52 = vshrl.u32 %v3370_v27, 7 }
 0x39e   :  { %v3235_v58 = vpop.permute.xlu1 %3234  ;;  %v3197_v3 = vadd.f32 %v7170_v23, %v3053_v38  ;;  %v3196_v23 = vadd.f32 %v7189_v47, %v3052_v56 }
 0x39f   :  { %v3247_v42 = vadd.f32 %v3235_v58, %v3103_v48  ;;  %v3413_v30 = vsel %vm3344_vm5, %v3290_v18, 0.0  ;;  %v3043_v58 = vsel %vm837_vm4, %v3040_v13, %v3042_v62 }
 0x3a0   :  { %v3279_v49 = vpop.permute.xlu0 %3278  ;;  %3414 = vadd.xlane.f32.xlu1 %v3413_v30  ;;  %v3054_v35 = vadd.f32 %v3043_v58, %v7126_v7 }
 0x3a1   :  { %v3361_v59 = vsel %vm3351_vm6, %v3247_v42, 0.0  ;;  %v3293_v50 = vadd.f32 %v3279_v49, %v3149_v28  ;;  %v3055_v28 = vadd.f32 %v3042_v62, %v7131_v57 }
 0x3a2   :  { %v3275_v11 = vpop.permute.xlu1 %3274  ;;  %3362 = vadd.xlane.f32.xlu0 %v3361_v59  ;;  %v3198_v37 = vadd.f32 %v7175_v53, %v3054_v35 }
 0x3a3   :  { %v3291_v31 = vadd.f32 %v3275_v11, %v3147_v54  ;;  %v3422_v63 = vsel %vm3344_vm5, %v3293_v50, 0.0  ;;  %v3199_v14 = vadd.f32 %v7196_v34, %v3055_v28  ;;  %v3371_v11 = vand.u32 127, %v3370_v27 }
 0x3a4   :  { %v3277_v46 = vpop.permute.xlu0 %3276  ;;  %3423 = vadd.xlane.f32.xlu1 %v3422_v63 }
 0x3a5   :  { %v3416_v60 = vsel %vm3344_vm5, %v3291_v31, 0.0  ;;  %v3292_v44 = vadd.f32 %v3277_v46, %v3148_v22  ;;  %v3376_v57 = vadd.s32 4294967288, %v3371_v11  ;;  %v3383_v32 = vadd.s32 4294967280, %v3371_v11 }
 0x3a6   :  { %v3281_v33 = vpop.permute.xlu1 %3280  ;;  %3417 = vadd.xlane.f32.xlu0 %v3416_v60 }
 0x3a7   :  { %v3294_v1 = vadd.f32 %v3281_v33, %v3150_v19  ;;  %v3419_v8 = vsel %vm3351_vm6, %v3292_v44, 0.0  ;;  %v3379_v34 = vsub.s32 %v3376_v57, %v3373_v52  ;;  %v3386_v29 = vsub.s32 %v3383_v32, %v3373_v52  ;;  %v3715_v57 = vld [vmem:[%s7291_s3] ss:$0 sm:$0xff] }
 0x3a8   :  { %v3321_v9 = vpop.permute.xlu0 %3320  ;;  %3420 = vadd.xlane.f32.xlu1 %v3419_v8  ;;  %v3374_v19 = vsub.s32 %v3371_v11, %v3373_v52 }
 0x3a9   :  { %v3425_v48 = vsel %vm3344_vm5, %v3294_v1, 0.0  ;;  %v3338_v6 = vadd.f32 %v3321_v9, %v3194_v40 }
 0x3aa   :  { %v3283_v2 = vpop.permute.xlu1 %3282  ;;  %3426 = vadd.xlane.f32.xlu0 %v3425_v48 }
 0x3ab   :  { %v3295_v41 = vadd.f32 %v3283_v2, %v3151_v12  ;;  %v3472_v17 = vsel %vm3344_vm5, %v3338_v6, 0.0 }
 0x3ac   :  { %v3327_v16 = vpop.permute.xlu0 %3326  ;;  %3473 = vadd.xlane.f32.xlu1 %v3472_v17 }
 0x3ad   :  { %v3428_v43 = vsel %vm3351_vm6, %v3295_v41, 0.0  ;;  %v3341_v42 = vadd.f32 %v3327_v16, %v3197_v3 }
 0x3ae   :  { %v3323_v15 = vpop.permute.xlu1 %3322  ;;  %3429 = vadd.xlane.f32.xlu0 %v3428_v43 }
 0x3af   :  { %v3339_v51 = vadd.f32 %v3323_v15, %v3195_v61  ;;  %v3481_v18 = vsel %vm3344_vm5, %v3341_v42, 0.0 }
 0x3b0   :  { %3482 = vadd.xlane.f32.xlu1 %v3481_v18 }
 0x3b1   :  { %v3475_v0 = vsel %vm3344_vm5, %v3339_v51, 0.0 }
 0x3b2   :  { %v3329_v55 = vpop.permute.xlu1 %3328  ;;  %3476 = vadd.xlane.f32.xlu0 %v3475_v0 }
 0x3b3   :  { %v3325_v54 = vpop.permute.xlu0 %3324  ;;  %v3342_v30 = vadd.f32 %v3329_v55, %v3198_v37 }
 0x3b4   :  { %v3340_v7 = vadd.f32 %v3325_v54, %v3196_v23 }
 0x3b5   :  { %v3484_v53 = vsel %vm3344_vm5, %v3342_v30, 0.0 }
 0x3b6   :  { %v3478_v59 = vsel %vm3351_vm6, %v3340_v7, 0.0  ;;  %3485 = vadd.xlane.f32.xlu0 %v3484_v53 }
 0x3b7   :  { %v3331_v45 = vpop.permute.xlu1 %3330  ;;  %3479 = vadd.xlane.f32.xlu1 %v3478_v59 }
 0x3b8   :  { %v3343_v47 = vadd.f32 %v3331_v45, %v3199_v14 }
 0x3ba   :  { %v3487_v10 = vsel %vm3351_vm6, %v3343_v47, 0.0  ;;  %v3532_v47 = vld [vmem:[%s7290_s2] sm:$0x7]  ;;  %s3830_s2 = smov [#allocation9]  }
 0x3bb   :  { %3488 = vadd.xlane.f32.xlu0 %v3487_v10  ;;  %3721 = vmatpush3.msk.msra.mxu0 %vm3544_vm11, %v3532_v47  ;;  %v8150_v10 = vmov 0.0   ;;  %s3625_s14 = sshll.u32 %s3830_s2, 4  ;;  %s3626_s14 = int_to_ptr.vmem [resolvable:$true] %s3625_s14 }
 0x3bc   :  { %3722 = vmatprep.mubr.msk.f32.mxu0 %vm3829_vm12, %v8150_v10  ;;  %s3793_s15 = scalar_lea.vmem %s3626_s14, 32  ;;  %p3798_p0 = scmp.lt.s32.totalorder %s3626_s14, %s3626_s14 }
 0x3bd   :  { %p3794_p13 = scmp.ne.s32.totalorder %s3626_s14, %s3793_s15  ;;  %p3799_p1 = scmp.lt.s32.totalorder %s3793_s15, %s3793_s15 }
 0x3bf   :  { %p3800_p2 = por %p3799_p1, %p3798_p0 }
 0x3c1   :  { %p3801_p3 = pnand %p3800_p2, %p3794_p13 }
 0x41d   :  { %v3347_v36 = vpop.xlane.xlu0 %3346 }
 0x41e   :  { %v3375_v26 = vrot.slane %v3347_v36, %v3374_v19 }
 0x421   :  { %v3357_v49 = vpop.xlane.xlu0 %3356 }
 0x422   :  { %v3393_v13 = vrot.slane %v3357_v49, %v3374_v19 }
 0x423   :  { %v3350_v31 = vpop.xlane.xlu1 %3349 }
 0x424   :  { %v3380_v63 = vrot.slane %v3350_v31, %v3379_v34 }
 0x426   :  { %v3382_v39 = vsel %vm3381_vm7, %v3380_v63, %v3375_v26 }
 0x427   :  { %v3360_v50 = vpop.xlane.xlu0 %3359 }
 0x428   :  { %v3397_v60 = vrot.slane %v3360_v50, %v3379_v34 }
 0x429   :  { %v3354_v22 = vpop.xlane.xlu1 %3353 }
 0x42a   :  { %v3387_v21 = vrot.slane %v3354_v22, %v3386_v29  ;;  %v3398_v25 = vsel %vm3381_vm7, %v3397_v60, %v3393_v13 }
 0x42c   :  { %v3389_v1 = vsel %vm3388_vm8, %v3387_v21, %v3382_v39 }
 0x42d   :  { %v3415_v4 = vpop.xlane.xlu1 %3414 }
 0x42e   :  { %v3440_v20 = vrot.slane %v3415_v4, %v3374_v19 }
 0x42f   :  { %v3363_v33 = vpop.xlane.xlu0 %3362 }
 0x430   :  { %v3402_v46 = vrot.slane %v3363_v33, %v3386_v29 }
 0x431   :  { %v3424_v12 = vpop.xlane.xlu1 %3423 }
 0x432   :  { %v3403_v44 = vsel %vm3388_vm8, %v3402_v46, %v3398_v25  ;;  %v3454_v38 = vrot.slane %v3424_v12, %v3374_v19 }
 0x433   :  { %v3418_v40 = vpop.xlane.xlu0 %3417  ;;  %v3405_v8 = vsel %vm3404_vm9, %v3403_v44, %v3389_v1 }
 0x434   :  { %v3408_v48 = vsel %vm3407_vm10, %v3405_v8, 0.0  ;;  %v3444_v62 = vrot.slane %v3418_v40, %v3379_v34 }
 0x435   :  { %3409 = vadd.xlane.f32.xlu1 %v3408_v48  ;;  %v3421_v5 = vpop.xlane.xlu1 %3420 }
 0x436   :  { %v3449_v9 = vrot.slane %v3421_v5, %v3386_v29  ;;  %v3445_v3 = vsel %vm3381_vm7, %v3444_v62, %v3440_v20 }
 0x437   :  { %v3427_v24 = vpop.xlane.xlu0 %3426 }
 0x438   :  { %v3458_v2 = vrot.slane %v3427_v24, %v3379_v34  ;;  %v3450_v43 = vsel %vm3388_vm8, %v3449_v9, %v3445_v3 }
 0x439   :  { %v3474_v41 = vpop.xlane.xlu1 %3473 }
 0x43a   :  { %v3459_v17 = vsel %vm3381_vm7, %v3458_v2, %v3454_v38  ;;  %v3499_v0 = vrot.slane %v3474_v41, %v3374_v19 }
 0x43b   :  { %v3430_v6 = vpop.xlane.xlu0 %3429 }
 0x43c   :  { %v3463_v61 = vrot.slane %v3430_v6, %v3386_v29 }
 0x43d   :  { %v3483_v15 = vpop.xlane.xlu1 %3482 }
 0x43e   :  { %v3464_v58 = vsel %vm3388_vm8, %v3463_v61, %v3459_v17  ;;  %v3513_v55 = vrot.slane %v3483_v15, %v3374_v19 }
 0x43f   :  { %v3477_v16 = vpop.xlane.xlu0 %3476  ;;  %v3465_v35 = vsel %vm3404_vm9, %v3464_v58, %v3450_v43 }
 0x440   :  { %v3467_v56 = vsel %vm3407_vm10, %v3465_v35, 0.0  ;;  %v3503_v37 = vrot.slane %v3477_v16, %v3379_v34 }
 0x441   :  { %3468 = vadd.xlane.f32.xlu0 %v3467_v56 }
 0x442   :  { %v3504_v30 = vsel %vm3381_vm7, %v3503_v37, %v3499_v0 }
 0x443   :  { %v3486_v42 = vpop.xlane.xlu0 %3485 }
 0x444   :  { %v3480_v51 = vpop.xlane.xlu1 %3479  ;;  %v3517_v23 = vrot.slane %v3486_v42, %v3379_v34 }
 0x445   :  { %v3508_v18 = vrot.slane %v3480_v51, %v3386_v29 }
 0x446   :  { %v3518_v7 = vsel %vm3381_vm7, %v3517_v23, %v3513_v55 }
 0x447   :  { %v3509_v14 = vsel %vm3388_vm8, %v3508_v18, %v3504_v30 }
 0x448   :  { %v3489_v54 = vpop.xlane.xlu0 %3488 }
 0x449   :  { %v3522_v28 = vrot.slane %v3489_v54, %v3386_v29 }
 0x44b   :  { %v3523_v59 = vsel %vm3388_vm8, %v3522_v28, %v3518_v7 }
 0x44c   :  { %v3524_v53 = vsel %vm3404_vm9, %v3523_v59, %v3509_v14 }
 0x44d   :  { %v3526_v45 = vsel %vm3407_vm10, %v3524_v53, 0.0 }
 0x44e   :  { %3527 = vadd.xlane.f32.xlu1 %v3526_v45 }
 0x4c2   :  { %v3410_v27 = vpop.xlane.xlu1 %3409 }
 0x4c3   :  { %3412 = vst.msk [vmem:[#allocation3] sm:$0x3] %vm3411_vm13, %v3410_v27 }
 0x4ce   :  { %v3469_v36 = vpop.xlane.xlu0 %3468 }
 0x4cf   :  { %3471 = vst.msk [vmem:[#allocation3] sm:$0x3] %vm3470_vm14, %v3469_v36 }
 0x4db   :  { %v3528_v11 = vpop.xlane.xlu1 %3527 }
 0x4dc   :  { %3530 = vst.msk [vmem:[#allocation3] sm:$0x3] %vm3529_vm15, %v3528_v11 }
 0x4e3   :  { %v3531_v49 = vld [vmem:[#allocation3] sm:$0x3] }
 0x4e4   :  { %3723 = vmatmul.mubr.msk.f32.vlgmr.msra.gmra.mrb[0].mxu0 %vm3540_vm0, %v3531_v49 }
 0x5b7   :  { %v3614_v32 = vpop.f32.mrb[0].mxu0 }
 0x5b8   :  { %v3615_v52 = vadd.f32 %v3715_v57, %v3614_v32  ;;  %v3724_v31 = vpop.f32.mrb[1].mxu0 }
 0x5ba   :  { %3618 = vst [vmem:[#allocation9] sm:$0x3] %v3615_v52 }
 0x5bb   :  { %3804 = shalt.err (!%p3801_p3)
}
 0x5bc   :  { %s3805_s18 = scalar_lea.hbm %s7292_s4, 32 }
 0x5bd   :  { %p3806_p4 = scmp.ne.s32.totalorder %s7292_s4, %s3805_s18  ;;  %p3809_p5 = scmp.lt.u32.totalorder %s3805_s18, %s7292_s4 }
 0x5bf   :  { %p3811_p6 = pnand %p3809_p5, %p3806_p4 }
 0x5c1   :  { %3814 = shalt.err (!%p3811_p6)
}
 0x5c2   :  { %3628 = dma.vmem_to_hbm [thread:$0]  %s3626_s14, 32, %s7292_s4, [#allocation6]  }
 0x5c3   :  { %3819 = dma.done.wait [#allocation6], 32  }
 0x5c4   :  { %3820 = vsyncadd [#allocation6], 4294967264 }
 0x5c5   :  { %3632 = vsyncpa [#allocation5], 1 }
 0x5c6   :  { %3633 = vsyncpa [#allocation6], 1 }
 0x5c7   :  { %3634 = vsyncpa [#allocation7], 1 }

</bundles_post_ra>
